<compile_context>
chip_gen: v5e
topology: v5e:2x2
jax: 0.10.0
libtpu: 0.0.40
codegen_flags: <defaults>
</compile_context>

<pallas_src>
import jax
import jax.numpy as jnp
from jax import lax
from jax.experimental import pallas as pl
from jax.experimental.pallas import tpu as pltpu


# ----------------------------------------------------------------------------
# Kernel: one grid step == one image (H*W rows of the flattened activation).
# ----------------------------------------------------------------------------
def bottleneck_kernel(x_ref, w1_ref, w2_ref, w3_ref, b1_ref, b2_ref, b3_ref,
                      o_ref, pad_ref):
    Hp2, Wp2, width = pad_ref.shape
    H, W = Hp2 - 2, Wp2 - 2
    HW, _ = x_ref.shape  # HW == H * W (per-image row band)

    x_bf16 = x_ref[...]                                    # (HW, Cin) bf16

    # ---- conv1 (1x1, BN scale folded into w1) + bias + relu ----------------
    h1 = jnp.dot(x_bf16, w1_ref[...], preferred_element_type=jnp.float32)
    h1 = jnp.maximum(h1 + b1_ref[...], 0.0)                # f32 (HW, width)

    # ---- write interior of padded scratch; zero only the 1-wide halo -------
    # (halo re-zeroed every step so the grid axis can be "parallel" on v7x)
    zero_row = jnp.zeros((1, Wp2, width), pad_ref.dtype)
    pad_ref[0:1, :, :] = zero_row
    pad_ref[H + 1:H + 2, :, :] = zero_row
    zero_col = jnp.zeros((H, 1, width), pad_ref.dtype)
    pad_ref[1:H + 1, 0:1, :] = zero_col
    pad_ref[1:H + 1, W + 1:W + 2, :] = zero_col
    pad_ref[1:H + 1, 1:W + 1, :] = h1.astype(pad_ref.dtype).reshape(H, W, width)

    # ---- conv2 (3x3, stride=1, groups=1) as 3 matmuls with K = 3*width -----
    # kx taps are folded into the contraction dim (im2col along W only); the
    # ky taps stay as a short unrolled loop.
    acc = jnp.zeros((HW, width), jnp.float32)
    for ky in range(3):
        slab = pad_ref[ky:ky + H, :, :]                    # (H, W+2, width) bf16
        patch = jnp.concatenate(
            [slab[:, 0:W, :], slab[:, 1:W + 1, :], slab[:, 2:W + 2, :]],
            axis=-1)                                       # (H, W, 3*width)
        patch = patch.reshape(HW, 3 * width)
        acc = acc + jnp.dot(patch, w2_ref[ky],
                            preferred_element_type=jnp.float32)
    h2 = jnp.maximum(acc + b2_ref[...], 0.0)               # f32 (HW, width)

    # ---- conv3 (1x1, BN scale folded into w3) + bias ------------------------
    h3 = jnp.dot(h2.astype(w3_ref.dtype), w3_ref[...],
                 preferred_element_type=jnp.float32)
    h3 = h3 + b3_ref[...]                                  # f32 (HW, Cout)

    # ---- identity residual (downsample is None) + final relu, f32 epilogue --
    out = jnp.maximum(h3 + x_bf16.astype(jnp.float32), 0.0)
    o_ref[...] = out.astype(o_ref.dtype)


# ----------------------------------------------------------------------------
# Parameter preparation (eval-mode BN folded into weights/biases, bf16 weights)
# ----------------------------------------------------------------------------
def _fold_bn(gamma, beta, mean, var, eps=1e-5):
    scale = gamma / jnp.sqrt(var + eps)
    shift = beta - mean * scale
    return scale, shift


def _prepare_params(params):
    w1, w2, w3 = params["w1"], params["w2"], params["w3"]
    s1, b1 = _fold_bn(*params["bn1"])
    s2, b2 = _fold_bn(*params["bn2"])
    s3, b3 = _fold_bn(*params["bn3"])
    width = w2.shape[2]
    # BN scale folded into the conv output channels; matmul weights in bf16.
    w1f = (w1 * s1[None, :]).astype(jnp.bfloat16)                    # (Cin, width)
    w2f = (w2 * s2[None, None, None, :]).reshape(3, 3 * width, width) \
        .astype(jnp.bfloat16)                                        # (3, 3w, w)
    w3f = (w3 * s3[None, :]).astype(jnp.bfloat16)                    # (width, Cout)
    return (w1f, w2f, w3f,
            b1.reshape(1, -1).astype(jnp.float32),
            b2.reshape(1, -1).astype(jnp.float32),
            b3.reshape(1, -1).astype(jnp.float32))


def _vmem_limit_bytes(HW, Cin, width, Cout, H, W):
    bf2, f4 = 2, 4
    tiles = 2 * (HW * Cin * bf2 + HW * Cout * f4)          # double-buffered in/out
    weights = (Cin * width + 9 * width * width + width * Cout) * bf2 \
        + (2 * width + Cout) * f4
    scratch = (H + 2) * (W + 2) * width * bf2
    temps = HW * (2 * width * f4 + 3 * width * bf2 + Cout * f4)
    est = tiles + weights + scratch + temps
    # Headroom, but stay well under v7x's 64 MiB physical VMEM.
    return int(min(max(2 * est, 32 * 1024 * 1024), 48 * 1024 * 1024))


# ----------------------------------------------------------------------------
# Forward pass (NHWC is the native layout; NCHW adapter for PyTorch parity)
# ----------------------------------------------------------------------------
def bottleneck_forward_nhwc(x_nhwc, params):
    N, H, W, Cin = x_nhwc.shape
    w1f, w2f, w3f, b1, b2, b3 = _prepare_params(params)
    width, Cout = w1f.shape[1], w3f.shape[1]
    assert Cin == Cout, "downsample=None (identity residual) needs Cin == Cout"
    assert (H * W) % 8 == 0, "per-image row band must be a multiple of 8"

    HW = H * W
    x2d = x_nhwc.reshape(N * HW, Cin).astype(jnp.bfloat16)

    out2d = pl.pallas_call(
        bottleneck_kernel,
        out_shape=jax.ShapeDtypeStruct((N * HW, Cout), jnp.float32),
        grid_spec=pltpu.PrefetchScalarGridSpec(
            num_scalar_prefetch=0,
            grid=(N,),
            in_specs=[
                pl.BlockSpec((HW, Cin), lambda n: (n, 0)),        # activations
                pl.BlockSpec(w1f.shape, lambda n: (0, 0)),        # resident weights
                pl.BlockSpec(w2f.shape, lambda n: (0, 0, 0)),
                pl.BlockSpec(w3f.shape, lambda n: (0, 0)),
                pl.BlockSpec(b1.shape, lambda n: (0, 0)),         # resident biases
                pl.BlockSpec(b2.shape, lambda n: (0, 0)),
                pl.BlockSpec(b3.shape, lambda n: (0, 0)),
            ],
            out_specs=pl.BlockSpec((HW, Cout), lambda n: (n, 0)),
            scratch_shapes=[pltpu.VMEM((H + 2, W + 2, width), jnp.bfloat16)],
        ),
        compiler_params=pltpu.CompilerParams(
            dimension_semantics=("parallel",),
            vmem_limit_bytes=_vmem_limit_bytes(HW, Cin, width, Cout, H, W),
        ),
    )(x2d, w1f, w2f, w3f, b1, b2, b3)

    return out2d.reshape(N, H, W, Cout)


def bottleneck_forward(x_nchw, params):
    """PyTorch-layout adapter.  A full NHWC network should call
    bottleneck_forward_nhwc directly and skip these two boundary transposes."""
    x_nhwc = jnp.transpose(x_nchw, (0, 2, 3, 1))
    out_nhwc = bottleneck_forward_nhwc(x_nhwc, params)
    return jnp.transpose(out_nhwc, (0, 3, 1, 2))


# ----------------------------------------------------------------------------
# Parameter init + plain-JAX reference (same bf16 rounding points as kernel)
# ----------------------------------------------------------------------------
def init_params(key, inplanes, planes, groups=1, base_width=64):
    width = int(planes * (base_width / 64.0)) * groups
    cout = planes * 4  # Bottleneck.expansion = 4
    ks = jax.random.split(key, 6)

    def bn_params(k, c):
        kg, kb, km, kv = jax.random.split(k, 4)
        gamma = 1.0 + 0.1 * jax.random.normal(kg, (c,), jnp.float32)
        beta = 0.1 * jax.random.normal(kb, (c,), jnp.float32)
        mean = 0.1 * jax.random.normal(km, (c,), jnp.float32)
        var = jnp.abs(jax.random.normal(kv, (c,), jnp.float32)) + 0.5
        return (gamma, beta, mean, var)

    return {
        # channels-last weights: (Cin, Cout) and (kh, kw, Cin, Cout) [HWIO]
        "w1": 0.1 * jax.random.normal(ks[0], (inplanes, width), jnp.float32),
        "w2": 0.1 * jax.random.normal(ks[1], (3, 3, width, width), jnp.float32),
        "w3": 0.1 * jax.random.normal(ks[2], (width, cout), jnp.float32),
        "bn1": bn_params(ks[3], width),
        "bn2": bn_params(ks[4], width),
        "bn3": bn_params(ks[5], cout),
    }


def reference_forward(x_nchw, params):
    """Plain-JAX reference with the same folded weights and bf16 cast points."""
    x = jnp.transpose(x_nchw, (0, 2, 3, 1))
    w1f, w2f, w3f, b1, b2, b3 = _prepare_params(params)
    width = w1f.shape[1]

    xf = x.astype(jnp.bfloat16).astype(jnp.float32)
    h = jnp.einsum("nhwc,cd->nhwd", xf, w1f.astype(jnp.float32),
                   precision="highest")
    h = jnp.maximum(h + b1[0], 0.0)

    hb = h.astype(jnp.bfloat16).astype(jnp.float32)
    w2_4d = w2f.reshape(3, 3, width, width).astype(jnp.float32)
    h = lax.conv_general_dilated(hb, w2_4d, window_strides=(1, 1),
                                 padding=((1, 1), (1, 1)),
                                 dimension_numbers=("NHWC", "HWIO", "NHWC"),
                                 precision=lax.Precision.HIGHEST)
    h = jnp.maximum(h + b2[0], 0.0)

    hb = h.astype(jnp.bfloat16).astype(jnp.float32)
    h = jnp.einsum("nhwc,cd->nhwd", hb, w3f.astype(jnp.float32),
                   precision="highest")
    h = h + b3[0]

    out = jnp.maximum(h + xf, 0.0)
    return jnp.transpose(out, (0, 3, 1, 2))


if __name__ == "__main__":
    key = jax.random.PRNGKey(0)
    kx, kp = jax.random.split(key)

    # Small but lane-friendly shapes: inplanes = planes*4 so downsample=None
    # (identity residual) is valid; Cout = 128 keeps the output lane-dense.
    N, inplanes, planes, H, W = 2, 128, 32, 16, 16
    x = jax.random.normal(kx, (N, inplanes, H, W), jnp.float32)
    params = init_params(kp, inplanes, planes)

    out = bottleneck_forward(x, params)
    out = jax.block_until_ready(out)

    ref = reference_forward(x, params)
    assert out.shape == (N, planes * 4, H, W), out.shape
    max_err = float(jnp.max(jnp.abs(out - ref)))
    scale = float(jnp.max(jnp.abs(ref))) + 1e-6
    assert max_err / scale < 1e-2, f"mismatch vs reference: {max_err} (rel {max_err / scale})"

    print("KERNEL_OK")
</pallas_src>

<mosaic_0001>
module attributes {stable_mosaic.version = 11 : i64} {
  func.func @bottleneck_kernel(%arg0: i32, %arg1: memref<256x128xbf16, #tpu.memory_space<vmem>>, %arg2: memref<128x32xbf16, #tpu.memory_space<vmem>>, %arg3: memref<3x96x32xbf16, #tpu.memory_space<vmem>>, %arg4: memref<32x128xbf16, #tpu.memory_space<vmem>>, %arg5: memref<1x32xf32, #tpu.memory_space<vmem>>, %arg6: memref<1x32xf32, #tpu.memory_space<vmem>>, %arg7: memref<1x128xf32, #tpu.memory_space<vmem>>, %arg8: memref<256x128xf32, #tpu.memory_space<vmem>>, %arg9: memref<18x18x32xbf16, #tpu.memory_space<vmem>>) attributes {dimension_semantics = [#tpu.dimension_semantics<parallel>], iteration_bounds = array<i64: 2>, scalar_prefetch = 0 : i64, scratch_operands = 1 : i64, tpu.core_type = #tpu.core_type<tc>, window_params = [{transform_indices = @transform_0, window_bounds = array<i64: 256, 128>}, {pipeline_mode = #tpu.pipeline_mode<synchronous>, transform_indices = @transform_1, window_bounds = array<i64: 128, 32>}, {pipeline_mode = #tpu.pipeline_mode<synchronous>, transform_indices = @transform_2, window_bounds = array<i64: 3, 96, 32>}, {pipeline_mode = #tpu.pipeline_mode<synchronous>, transform_indices = @transform_3, window_bounds = array<i64: 32, 128>}, {pipeline_mode = #tpu.pipeline_mode<synchronous>, transform_indices = @transform_4, window_bounds = array<i64: 1, 32>}, {pipeline_mode = #tpu.pipeline_mode<synchronous>, transform_indices = @transform_5, window_bounds = array<i64: 1, 32>}, {pipeline_mode = #tpu.pipeline_mode<synchronous>, transform_indices = @transform_6, window_bounds = array<i64: 1, 128>}, {transform_indices = @transform_7, window_bounds = array<i64: 256, 128>}]} {
    %c0 = arith.constant 0 : index
    %c0_0 = arith.constant 0 : index
    %0 = vector.load %arg1[%c0, %c0_0] : memref<256x128xbf16, #tpu.memory_space<vmem>>, vector<256x128xbf16>
    %c0_1 = arith.constant 0 : index
    %c0_2 = arith.constant 0 : index
    %1 = vector.load %arg2[%c0_1, %c0_2] : memref<128x32xbf16, #tpu.memory_space<vmem>>, vector<128x32xbf16>
    %cst = arith.constant dense<0.000000e+00> : vector<256x32xf32>
    %2 = tpu.matmul %0, %1, %cst {dimension_numbers = #tpu.dot_dimension_numbers<[1], [0], [0], [1], [0, 0, 1, 1], [], []>} : vector<256x128xbf16>, vector<128x32xbf16>, vector<256x32xf32> -> vector<256x32xf32>
    %c0_3 = arith.constant 0 : index
    %c0_4 = arith.constant 0 : index
    %3 = vector.load %arg5[%c0_3, %c0_4] : memref<1x32xf32, #tpu.memory_space<vmem>>, vector<1x32xf32>
    %4 = vector.broadcast %3 : vector<1x32xf32> to vector<256x32xf32>
    %5 = arith.addf %2, %4 : vector<256x32xf32>
    %cst_5 = arith.constant 0.000000e+00 : f32
    %6 = vector.broadcast %cst_5 : f32 to vector<256x32xf32>
    %7 = arith.maximumf %5, %6 : vector<256x32xf32>
    %cst_6 = arith.constant 0.000000e+00 : bf16
    %8 = vector.broadcast %cst_6 : bf16 to vector<1x18x32xbf16>
    %c0_7 = arith.constant 0 : index
    %c0_8 = arith.constant 0 : index
    %c0_9 = arith.constant 0 : index
    %9 = vector.load %arg9[%c0_7, %c0_8, %c0_9] : memref<18x18x32xbf16, #tpu.memory_space<vmem>>, vector<1x18x32xbf16>
    tpu.vector_store %arg9[%c0_7, %c0_8, %c0_9], %8 {strides = array<i32>} : memref<18x18x32xbf16, #tpu.memory_space<vmem>>, vector<1x18x32xbf16>,
    %c17 = arith.constant 17 : index
    %c0_10 = arith.constant 0 : index
    %c0_11 = arith.constant 0 : index
    %10 = vector.load %arg9[%c17, %c0_10, %c0_11] : memref<18x18x32xbf16, #tpu.memory_space<vmem>>, vector<1x18x32xbf16>
    tpu.vector_store %arg9[%c17, %c0_10, %c0_11], %8 {strides = array<i32>} : memref<18x18x32xbf16, #tpu.memory_space<vmem>>, vector<1x18x32xbf16>,
    %cst_12 = arith.constant 0.000000e+00 : bf16
    %11 = vector.broadcast %cst_12 : bf16 to vector<16x1x32xbf16>
    %c1 = arith.constant 1 : index
    %c0_13 = arith.constant 0 : index
    %c0_14 = arith.constant 0 : index
    %12 = vector.load %arg9[%c1, %c0_13, %c0_14] : memref<18x18x32xbf16, #tpu.memory_space<vmem>>, vector<16x1x32xbf16>
    tpu.vector_store %arg9[%c1, %c0_13, %c0_14], %11 {strides = array<i32>} : memref<18x18x32xbf16, #tpu.memory_space<vmem>>, vector<16x1x32xbf16>,
    %c1_15 = arith.constant 1 : index
    %c17_16 = arith.constant 17 : index
    %c0_17 = arith.constant 0 : index
    %13 = vector.load %arg9[%c1_15, %c17_16, %c0_17] : memref<18x18x32xbf16, #tpu.memory_space<vmem>>, vector<16x1x32xbf16>
    tpu.vector_store %arg9[%c1_15, %c17_16, %c0_17], %11 {strides = array<i32>} : memref<18x18x32xbf16, #tpu.memory_space<vmem>>, vector<16x1x32xbf16>,
    %14 = arith.truncf %7 : vector<256x32xf32> to vector<256x32xbf16>
    %15 = vector.shape_cast %14 : vector<256x32xbf16> to vector<16x16x32xbf16>
    %c1_18 = arith.constant 1 : index
    %c1_19 = arith.constant 1 : index
    %c0_20 = arith.constant 0 : index
    %16 = vector.load %arg9[%c1_18, %c1_19, %c0_20] : memref<18x18x32xbf16, #tpu.memory_space<vmem>>, vector<16x16x32xbf16>
    tpu.vector_store %arg9[%c1_18, %c1_19, %c0_20], %15 {strides = array<i32>} : memref<18x18x32xbf16, #tpu.memory_space<vmem>>, vector<16x16x32xbf16>,
    %cst_21 = arith.constant 0.000000e+00 : f32
    %17 = vector.broadcast %cst_21 : f32 to vector<256x32xf32>
    %c0_22 = arith.constant 0 : index
    %c0_23 = arith.constant 0 : index
    %c0_24 = arith.constant 0 : index
    %18 = vector.load %arg9[%c0_22, %c0_23, %c0_24] : memref<18x18x32xbf16, #tpu.memory_space<vmem>>, vector<16x18x32xbf16>
    %19 = vector.extract_strided_slice %18 {offsets = [0, 0, 0], sizes = [16, 16, 32], strides = [1, 1, 1]} : vector<16x18x32xbf16> to vector<16x16x32xbf16>
    %20 = vector.extract_strided_slice %18 {offsets = [0, 1, 0], sizes = [16, 16, 32], strides = [1, 1, 1]} : vector<16x18x32xbf16> to vector<16x16x32xbf16>
    %21 = vector.extract_strided_slice %18 {offsets = [0, 2, 0], sizes = [16, 16, 32], strides = [1, 1, 1]} : vector<16x18x32xbf16> to vector<16x16x32xbf16>
    %22 = tpu.concatenate %19, %20, %21 in 2 : vector<16x16x32xbf16>, vector<16x16x32xbf16>, vector<16x16x32xbf16> -> vector<16x16x96xbf16>
    %23 = vector.shape_cast %22 : vector<16x16x96xbf16> to vector<256x96xbf16>
    %c0_25 = arith.constant 0 : index
    %c0_26 = arith.constant 0 : index
    %c0_27 = arith.constant 0 : index
    %24 = vector.load %arg3[%c0_25, %c0_26, %c0_27] : memref<3x96x32xbf16, #tpu.memory_space<vmem>>, vector<1x96x32xbf16>
    %25 = vector.shape_cast %24 : vector<1x96x32xbf16> to vector<96x32xbf16>
    %cst_28 = arith.constant dense<0.000000e+00> : vector<256x32xf32>
    %26 = tpu.matmul %23, %25, %cst_28 {dimension_numbers = #tpu.dot_dimension_numbers<[1], [0], [0], [1], [0, 0, 1, 1], [], []>} : vector<256x96xbf16>, vector<96x32xbf16>, vector<256x32xf32> -> vector<256x32xf32>
    %27 = arith.addf %17, %26 : vector<256x32xf32>
    %c1_29 = arith.constant 1 : index
    %c0_30 = arith.constant 0 : index
    %c0_31 = arith.constant 0 : index
    %28 = vector.load %arg9[%c1_29, %c0_30, %c0_31] : memref<18x18x32xbf16, #tpu.memory_space<vmem>>, vector<16x18x32xbf16>
    %29 = vector.extract_strided_slice %28 {offsets = [0, 0, 0], sizes = [16, 16, 32], strides = [1, 1, 1]} : vector<16x18x32xbf16> to vector<16x16x32xbf16>
    %30 = vector.extract_strided_slice %28 {offsets = [0, 1, 0], sizes = [16, 16, 32], strides = [1, 1, 1]} : vector<16x18x32xbf16> to vector<16x16x32xbf16>
    %31 = vector.extract_strided_slice %28 {offsets = [0, 2, 0], sizes = [16, 16, 32], strides = [1, 1, 1]} : vector<16x18x32xbf16> to vector<16x16x32xbf16>
    %32 = tpu.concatenate %29, %30, %31 in 2 : vector<16x16x32xbf16>, vector<16x16x32xbf16>, vector<16x16x32xbf16> -> vector<16x16x96xbf16>
    %33 = vector.shape_cast %32 : vector<16x16x96xbf16> to vector<256x96xbf16>
    %c1_32 = arith.constant 1 : index
    %c0_33 = arith.constant 0 : index
    %c0_34 = arith.constant 0 : index
    %34 = vector.load %arg3[%c1_32, %c0_33, %c0_34] : memref<3x96x32xbf16, #tpu.memory_space<vmem>>, vector<1x96x32xbf16>
    %35 = vector.shape_cast %34 : vector<1x96x32xbf16> to vector<96x32xbf16>
    %cst_35 = arith.constant dense<0.000000e+00> : vector<256x32xf32>
    %36 = tpu.matmul %33, %35, %cst_35 {dimension_numbers = #tpu.dot_dimension_numbers<[1], [0], [0], [1], [0, 0, 1, 1], [], []>} : vector<256x96xbf16>, vector<96x32xbf16>, vector<256x32xf32> -> vector<256x32xf32>
    %37 = arith.addf %27, %36 : vector<256x32xf32>
    %c2 = arith.constant 2 : index
    %c0_36 = arith.constant 0 : index
    %c0_37 = arith.constant 0 : index
    %38 = vector.load %arg9[%c2, %c0_36, %c0_37] : memref<18x18x32xbf16, #tpu.memory_space<vmem>>, vector<16x18x32xbf16>
    %39 = vector.extract_strided_slice %38 {offsets = [0, 0, 0], sizes = [16, 16, 32], strides = [1, 1, 1]} : vector<16x18x32xbf16> to vector<16x16x32xbf16>
    %40 = vector.extract_strided_slice %38 {offsets = [0, 1, 0], sizes = [16, 16, 32], strides = [1, 1, 1]} : vector<16x18x32xbf16> to vector<16x16x32xbf16>
    %41 = vector.extract_strided_slice %38 {offsets = [0, 2, 0], sizes = [16, 16, 32], strides = [1, 1, 1]} : vector<16x18x32xbf16> to vector<16x16x32xbf16>
    %42 = tpu.concatenate %39, %40, %41 in 2 : vector<16x16x32xbf16>, vector<16x16x32xbf16>, vector<16x16x32xbf16> -> vector<16x16x96xbf16>
    %43 = vector.shape_cast %42 : vector<16x16x96xbf16> to vector<256x96xbf16>
    %c2_38 = arith.constant 2 : index
    %c0_39 = arith.constant 0 : index
    %c0_40 = arith.constant 0 : index
    %44 = vector.load %arg3[%c2_38, %c0_39, %c0_40] : memref<3x96x32xbf16, #tpu.memory_space<vmem>>, vector<1x96x32xbf16>
    %45 = vector.shape_cast %44 : vector<1x96x32xbf16> to vector<96x32xbf16>
    %cst_41 = arith.constant dense<0.000000e+00> : vector<256x32xf32>
    %46 = tpu.matmul %43, %45, %cst_41 {dimension_numbers = #tpu.dot_dimension_numbers<[1], [0], [0], [1], [0, 0, 1, 1], [], []>} : vector<256x96xbf16>, vector<96x32xbf16>, vector<256x32xf32> -> vector<256x32xf32>
    %47 = arith.addf %37, %46 : vector<256x32xf32>
    %c0_42 = arith.constant 0 : index
    %c0_43 = arith.constant 0 : index
    %48 = vector.load %arg6[%c0_42, %c0_43] : memref<1x32xf32, #tpu.memory_space<vmem>>, vector<1x32xf32>
    %49 = vector.broadcast %48 : vector<1x32xf32> to vector<256x32xf32>
    %50 = arith.addf %47, %49 : vector<256x32xf32>
    %cst_44 = arith.constant 0.000000e+00 : f32
    %51 = vector.broadcast %cst_44 : f32 to vector<256x32xf32>
    %52 = arith.maximumf %50, %51 : vector<256x32xf32>
    %53 = arith.truncf %52 : vector<256x32xf32> to vector<256x32xbf16>
    %c0_45 = arith.constant 0 : index
    %c0_46 = arith.constant 0 : index
    %54 = vector.load %arg4[%c0_45, %c0_46] : memref<32x128xbf16, #tpu.memory_space<vmem>>, vector<32x128xbf16>
    %cst_47 = arith.constant dense<0.000000e+00> : vector<256x128xf32>
    %55 = tpu.matmul %53, %54, %cst_47 {dimension_numbers = #tpu.dot_dimension_numbers<[1], [0], [0], [1], [0, 0, 1, 1], [], []>} : vector<256x32xbf16>, vector<32x128xbf16>, vector<256x128xf32> -> vector<256x128xf32>
    %c0_48 = arith.constant 0 : index
    %c0_49 = arith.constant 0 : index
    %56 = vector.load %arg7[%c0_48, %c0_49] : memref<1x128xf32, #tpu.memory_space<vmem>>, vector<1x128xf32>
    %57 = vector.broadcast %56 : vector<1x128xf32> to vector<256x128xf32>
    %58 = arith.addf %55, %57 : vector<256x128xf32>
    %59 = arith.extf %0 : vector<256x128xbf16> to vector<256x128xf32>
    %60 = arith.addf %58, %59 : vector<256x128xf32>
    %cst_50 = arith.constant 0.000000e+00 : f32
    %61 = vector.broadcast %cst_50 : f32 to vector<256x128xf32>
    %62 = arith.maximumf %60, %61 : vector<256x128xf32>
    %c0_51 = arith.constant 0 : index
    %c0_52 = arith.constant 0 : index
    %63 = vector.load %arg8[%c0_51, %c0_52] : memref<256x128xf32, #tpu.memory_space<vmem>>, vector<256x128xf32>
    tpu.vector_store %arg8[%c0_51, %c0_52], %62 {strides = array<i32>} : memref<256x128xf32, #tpu.memory_space<vmem>>, vector<256x128xf32>,
    return
  }
  func.func @transform_0(%arg0: i32) -> (i32, i32) {
    %c0_i32 = arith.constant 0 : i32
    %c0_i32_0 = arith.constant 0 : i32
    return %arg0, %c0_i32 : i32, i32
  }
  func.func @transform_1(%arg0: i32) -> (i32, i32) {
    %c0_i32 = arith.constant 0 : i32
    %c0_i32_0 = arith.constant 0 : i32
    %c0_i32_1 = arith.constant 0 : i32
    return %c0_i32, %c0_i32_0 : i32, i32
  }
  func.func @transform_2(%arg0: i32) -> (i32, i32, i32) {
    %c0_i32 = arith.constant 0 : i32
    %c0_i32_0 = arith.constant 0 : i32
    %c0_i32_1 = arith.constant 0 : i32
    %c0_i32_2 = arith.constant 0 : i32
    return %c0_i32, %c0_i32_0, %c0_i32_1 : i32, i32, i32
  }
  func.func @transform_3(%arg0: i32) -> (i32, i32) {
    %c0_i32 = arith.constant 0 : i32
    %c0_i32_0 = arith.constant 0 : i32
    %c0_i32_1 = arith.constant 0 : i32
    return %c0_i32, %c0_i32_0 : i32, i32
  }
  func.func @transform_4(%arg0: i32) -> (i32, i32) {
    %c0_i32 = arith.constant 0 : i32
    %c0_i32_0 = arith.constant 0 : i32
    %c0_i32_1 = arith.constant 0 : i32
    return %c0_i32, %c0_i32_0 : i32, i32
  }
  func.func @transform_5(%arg0: i32) -> (i32, i32) {
    %c0_i32 = arith.constant 0 : i32
    %c0_i32_0 = arith.constant 0 : i32
    %c0_i32_1 = arith.constant 0 : i32
    return %c0_i32, %c0_i32_0 : i32, i32
  }
  func.func @transform_6(%arg0: i32) -> (i32, i32) {
    %c0_i32 = arith.constant 0 : i32
    %c0_i32_0 = arith.constant 0 : i32
    %c0_i32_1 = arith.constant 0 : i32
    return %c0_i32, %c0_i32_0 : i32, i32
  }
  func.func @transform_7(%arg0: i32) -> (i32, i32) {
    %c0_i32 = arith.constant 0 : i32
    %c0_i32_0 = arith.constant 0 : i32
    return %arg0, %c0_i32 : i32, i32
  }
}

</mosaic_0001>

<bundles_post_ra>
// kernel: tpu_custom_call.1
= control target key start
LH: loop header
LB: loop body
LE: loop exit
PB: predicated region body
PF: predicated region fallthrough
CT: control target
= control target key end

     0   :  { %12 = vsyncpa [#allocation4], 0  ;;  %s5991_s0 = inlined_call_operand.hbm [shape: bf16[512,128], index: 0, kind: input, shape index: {}]   ;;  %s5992_s1 = inlined_call_operand.vmem [shape: bf16[128,32], index: 1, kind: input, shape index: {}]   ;;  %s5993_s2 = inlined_call_operand.vmem [shape: bf16[3,96,32], index: 2, kind: input, shape index: {}]   ;;  %s5994_s3 = inlined_call_operand.vmem [shape: bf16[32,128], index: 3, kind: input, shape index: {}]   ;;  %s5995_s4 = inlined_call_operand.vmem [shape: f32[1,32], index: 4, kind: input, shape index: {}]   ;;  %s5996_s5 = inlined_call_operand.vmem [shape: f32[1,32], index: 5, kind: input, shape index: {}]   ;;  %s5997_s6 = inlined_call_operand.vmem [shape: f32[1,128], index: 6, kind: input, shape index: {}]   ;;  %s5998_s7 = inlined_call_operand.hbm [shape: f32[512,128], index: 7, kind: output, shape index: {}]  }
   0x1   :  { %14 = vsyncpa [#allocation4 + $0x1], 0 }
   0x2   :  { %15 = vsyncpa [#allocation5], 0 }
   0x3   :  { %17 = vsyncpa [#allocation5 + $0x1], 0  ;;  %s4627_s24 = smov 0   ;;  %s4629_s25 = smov 0  }
   0x4   :  { %s4631_s26 = smov 0   ;;  %s4633_s27 = smov 0  }
   0x5 LB: > { %s4648_s28 = sadd.s32 4294967295, %s4578_s27   ;;  %s3835_s29 = sadd.s32 4294967294, %s4578_s27   ;;  %s4578_s27 = sphi %s4633_s27, %s6018_s27   ;;  %s4574_s26 = sphi %s4631_s26, %s6017_s26   ;;  %s4570_s25 = sphi %s4629_s25, %s6016_s25   ;;  %s4566_s24 = sphi %s4627_s24, %s6015_s24  }
   0x6   : > { %s4652_s30 = sadd.s32 1, %s4578_s27   ;;  %s30_s8 = sadd.s32 1, %s4574_s26 }
   0x7   : > { %s27_s9 = ssub.s32 %s4578_s27, %s4652_s30  ;;  %p37_p0 = scmp.ne.s32.totalorder %s4574_s26, %s4570_s25 }
   0x8   : > { %p28_p1 = scmp.eq.s32.totalorder %s27_s9, 0  ;;  %p38_p2 = scmp.eq.s32.totalorder %s4578_s27, 0 }
   0x9   : > { %p43_p3 = scmp.ne.s32.totalorder %s4570_s25, %s4566_s24  ;;  %p44_p4 = scmp.eq.s32.totalorder %s4648_s28, 0 }
   0xa   : > { %s4664_s10 = scalar_select %p28_p1, %s4574_s26, %s30_s8  }
   0xb   : > { %p4666_p5 = por %p38_p2, %p37_p0  ;;  %p4670_p6 = por %p44_p4, %p43_p3 }
   0xc   : > { %5999 = sst [smem:[#allocation9_spill]] %s4664_s10  ;;  %p193_p7 = scmp.eq.s32.totalorder %s4648_s28, 1 }
   0xd   : > { %p199_p8 = scmp.eq.s32.totalorder %s3835_s29, 1  ;;  %p4429_p10 = scmp.lt.s32.totalorder %s4578_s27, 2 }
   0xe   : > { %p4677_p11 = por %p193_p7, %p37_p0  ;;  %s237_s15 = sand.u32 1, %s4574_s26  }
   0xf   : > { %p4681_p12 = por %p199_p8, %p43_p3  ;;  %s4305_s16 = sshll.u32 %s4578_s27, 7 }
  0x10   : > { %s3838_s17 = sshll.u32 %s237_s15, 7  ;;  %s246_s20 = scalar_lea.hbm %s5991_s0, %s4305_s16 }
  0x11   : > { %s247_s21 = sshll.u32 %s246_s20, 4  ;;  %s241_s22 = scalar_lea.vmem [#allocation3], %s3838_s17  ;;  %s248_s21 = int_to_ptr.hbm [resolvable:$true] %s247_s21 }
  0x12   : > { %s249_s23 = sshll.u32 %s241_s22, 4  ;;  %p4692_p13 = pnand %p4429_p10, %p4666_p5  ;;  %s250_s23 = int_to_ptr.vmem [resolvable:$true] %s249_s23 }
  0x13   : > { %p3841_p0 = scmp.ge.s32.totalorder %s4578_s27, 1  ;;  %p257_p1 = scmp.lt.s32.totalorder %s4578_s27, 3 }
  0x14   : > { %s238_s8 = scalar_lea.sflag [#allocation4], %s237_s15  ;;  %s4482_s9 = sshra.s32 %s248_s21, 4  ;;  %s4483_s9 = int_to_ptr.hbm [resolvable:$true] %s4482_s9 }
  0x15   : > { %s4484_s10 = scalar_lea.hbm %s4483_s9, 128  ;;  %p4486_p3 = pneg %p4692_p13 }
  0x16   : > { %p4485_p2 = scmp.ne.s32.totalorder %s4483_s9, %s4484_s10  ;;  %s4489_s11 = scalar_lea.hbm %s5991_s0, 256 }
  0x17   : > { %p4490_p5 = scmp.lt.s32.totalorder %s4483_s9, %s5991_s0  ;;  %p4491_p8 = scmp.lt.s32.totalorder %s4489_s11, %s4484_s10 }
  0x18   : > { %p4487_p4 = pnand %p4486_p3, %p4485_p2 }
  0x19   : > { %p4492_p10 = por %p4491_p8, %p4490_p5 }
  0x1a   : > { %p4488_p7 = pneg %p4487_p4 }
  0x1c   : > { %p4493_p9 = pnand %p4492_p10, %p4488_p7 }
  0x1e   : > { %4496 = shalt.err (!%p4493_p9)
}
  0x1f   : > { %s4580_s15 = smov 64   ;;  %s4581_s20 = smov 4  }
  0x20   : > { %4424 = dma.hbm_to_vmem [thread:$0]  (!%p4692_p13), %s248_s21, 2048, %s250_s23, %s238_s8, %s4580_s15, %s4580_s15, %s4581_s20  }
  0x21   : > { %p258_p2 = pnand %p3841_p0, %p257_p1 }
  0x22   : > { %s4713_s22 = sand.u32 (!%p258_p2), 1, %s4570_s25  }
  0x23   : > { %261 = sbr.rel (%p258_p2) target bundleno = 1143 (0x477), region = 48  ;;  %s3842_s10 = sshll.u32 (!%p258_p2), %s4713_s22, 7 }
  0x24   : > { %s264_s9 = scalar_lea.sflag (!%p258_p2), [#allocation4], %s4713_s22  ;;  %s4717_s16 = scalar_lea.vmem (!%p258_p2), [#allocation3], %s3842_s10 }
  0x28   : > { %4557 = dma.done.wait (%p4670_p6), %s264_s9, 2048  }
  0x29   : > { %4559 = vsyncadd (%p4670_p6), %s264_s9, 4294965248  ;;  %v4329_v0 = vld [vmem:[%s5992_s1 + $0x38] sm:$0xff]  ;;  %v4328_v1 = vld [vmem:[%s5992_s1 + $0x30] sm:$0xff]  ;;  %vm622_vm0 = vcmask 253952   ;;  %vm630_vm1 = vsmask.f32 256 }
  0x2a   : > { %498 = vmatpush.bf16.msra.mxu0 %v4329_v0  ;;  %v4327_v2 = vld [vmem:[%s5992_s1 + $0x28] sm:$0xff]  ;;  %v4326_v3 = vld [vmem:[%s5992_s1 + $0x20] sm:$0xff]  ;;  %v4325_v4 = vld [vmem:[%s5992_s1 + $0x18] sm:$0xff]  ;;  %vm680_vm3 = vsmask.f32 7938  ;;  %vm619_vm5 = vcmask 257024  }
  0x2b   : > { %v4324_v5 = vld [vmem:[%s5992_s1 + $0x10] sm:$0xff]  ;;  %v4323_v6 = vld [vmem:[%s5992_s1 + $0x8] sm:$0xff]  ;;  %v4322_v7 = vld [vmem:[%s5992_s1] sm:$0xff]  ;;  %vm762_vm7 = vsmask.f32 4368  ;;  %s4582_s18 = smov 32  }
  0x2c   : > { %v4306_v8 = vld [vmem:[%s4717_s16] sm:$0xff]  ;;  %v4307_v9 = vld [vmem:[%s4717_s16 + $0x8] sm:$0xff]  ;;  %v4308_v10 = vld [vmem:[%s4717_s16 + $0x10] sm:$0xff]  ;;  %vm1374_vm9 = vsmask.f32 7424  ;;  %vm1599_vm10 = vcmask 1046528  }
  0x2d   : > { %v4309_v11 = vld [vmem:[%s4717_s16 + $0x18] sm:$0xff]  ;;  %v4310_v12 = vld [vmem:[%s4717_s16 + $0x20] sm:$0xff]  ;;  %v4311_v13 = vld [vmem:[%s4717_s16 + $0x28] sm:$0xff]  ;;  %s4583_s20 = smov 64   ;;  %vm1680_vm11 = vcmask 261120   ;;  %vm1713_vm12 = vcmask 523264  }
  0x2e   : > { %499 = vmatpush.bf16.msra.mxu0 %v4328_v1  ;;  %v4312_v14 = vld [vmem:[%s4717_s16 + $0x30] sm:$0xff]  ;;  %vm4756_vm2 = vmand %vm622_vm0, %vm630_vm1  ;;  %v682_v19 = vld [vmem:[#allocation2 + $0x14] sm:$0x1]  ;;  %vm2351_vm13 = vcmask 785408   ;;  %s3843_s11 = sshll.u32 %s4713_s22, 8  ;;  %s4398_s19 = sshll.u32 %s4648_s28, 8 }
  0x2f   : > { %v632_v16 = vld [vmem:[#allocation2 + $0xc] sm:$0x1]  ;;  %vm4764_vm4 = vmand %vm622_vm0, %vm680_vm3  ;;  %v4313_v21 = vld [vmem:[%s4717_s16 + $0x38] sm:$0xff]  ;;  %s5843_s12 = scalar_lea.vmem [#allocation6], %s3843_s11  ;;  %s3758_s9 = scalar_lea.hbm %s5998_s7, %s4398_s19 }
  0x30   : > { %v633_v17 = vsel %vm4756_vm2, 0, %v632_v16  ;;  %v683_v20 = vsel %vm4764_vm4, 0, %v682_v19  ;;  %v635_v22 = vld [vmem:[#allocation2 + $0x18] sm:$0x1]  ;;  %v685_v24 = vld [vmem:[#allocation2 + $0x20] sm:$0x1]  ;;  %vm4787_vm6 = vmand %vm619_vm5, %vm680_vm3 }
  0x31   : > { %634 = vst [vmem:[#allocation2 + $0xc] sm:$0x1] %v633_v17  ;;  %v636_v23 = vsel %vm4756_vm2, 0, %v635_v22  ;;  %v4776_v25 = vld [vmem:[%s5995_s4] ss:$0 sm:$0xff]  ;;  %v686_v26 = vsel %vm4764_vm4, 0, %v685_v24  ;;  %vm4798_vm8 = vmor %vm630_vm1, %vm762_vm7 }
  0x32   : > { %500 = vmatpush.bf16.msra.mxu0 %v4327_v2  ;;  %684 = vst [vmem:[#allocation2 + $0x14] sm:$0x1] %v683_v20  ;;  %v4314_v27 = vld [vmem:[%s4717_s16 + $0x40] sm:$0xff]  ;;  %v638_v31 = vld [vmem:[#allocation2 + $0x24] sm:$0x1]  ;;  %s3761_s21 = sshll.u32 %s3758_s9, 4  ;;  %s3762_s21 = int_to_ptr.hbm [resolvable:$true] %s3761_s21 }
  0x33   : > { %637 = vst [vmem:[#allocation2 + $0x18] sm:$0x1] %v636_v23  ;;  %v639_v33 = vsel %vm4756_vm2, 0, %v638_v31  ;;  %v688_v43 = vld [vmem:[#allocation2 + $0x2c] sm:$0x1]  ;;  %v4315_v48 = vld [vmem:[%s4717_s16 + $0x48] sm:$0xff] }
  0x34   : > { %687 = vst [vmem:[#allocation2 + $0x20] sm:$0x1] %v686_v26  ;;  %v689_v46 = vsel %vm4764_vm4, 0, %v688_v43  ;;  %v641_v59 = vld [vmem:[#allocation2 + $0x30] sm:$0x1]  ;;  %s3747_s23 = scalar_lea.sflag [#allocation5], %s4713_s22 }
  0x35   : > { %640 = vst [vmem:[#allocation2 + $0x24] sm:$0x1] %v639_v33  ;;  %v642_v63 = vsel %vm4756_vm2, 0, %v641_v59  ;;  %v644_v26 = vld [vmem:[#allocation2 + $0x3c] sm:$0x1]  ;;  %s4526_s28 = sshra.s32 %s3762_s21, 4  ;;  %s4527_s28 = int_to_ptr.hbm [resolvable:$true] %s4526_s28 }
  0x36   : > { %501 = vmatpush.bf16.msra.mxu0 %v4326_v3  ;;  %690 = vst [vmem:[#allocation2 + $0x2c] sm:$0x1] %v689_v46  ;;  %s4528_s29 = scalar_lea.hbm %s4527_s28, 256  ;;  %s4532_s8 = scalar_lea.hbm %s5998_s7, 512 }
  0x37   : > { %643 = vst [vmem:[#allocation2 + $0x30] sm:$0x1] %v642_v63  ;;  %p4529_p6 = scmp.ne.s32.totalorder %s4527_s28, %s4528_s29  ;;  %p4533_p0 = scmp.lt.s32.totalorder %s4527_s28, %s5998_s7 }
  0x38   : > { %v1086_v40 = vld [vmem:[#allocation2 + $0xc] sm:$0xf]  ;;  %p4534_p1 = scmp.lt.s32.totalorder %s4532_s8, %s4528_s29 }
  0x39   : > { %v1090_v54 = vld [vmem:[#allocation2 + $0x14] sm:$0x1]  ;;  %p4530_p9 = pnand %p4529_p6, %p4677_p11 }
  0x3a   : > { %502 = vmatpush.bf16.msra.mxu0 %v4325_v4  ;;  %p4535_p3 = por %p4534_p1, %p4533_p0 }
  0x3b   : > { %v1097_v20 = vld [vmem:[#allocation2 + $0x20] sm:$0x1]  ;;  %p4531_p13 = pneg %p4530_p9 }
  0x3d   : > { %p4536_p4 = pnand %p4535_p3, %p4531_p13 }
  0x3e   : > { %503 = vmatpush.bf16.msra.mxu0 %v4324_v5  ;;  %v1093_v5 = vld [vmem:[#allocation2 + $0x18] sm:$0xf] }
  0x42   : > { %504 = vmatpush.bf16.msra.mxu0 %v4323_v6 }
  0x46   : > { %505 = vmatpush.bf16.msra.mxu0 %v4322_v7 }
  0x49   : > { %506 = vmatmul.bf16.vlgmr.msra.gmra.mxu0 %v4306_v8  ;;  %v691_v8 = vld [vmem:[#allocation2 + $0x38] sm:$0x1] }
  0x59   : > { %511 = vmatmul.bf16.gmra.mxu0 %v4307_v9 }
  0x69   : > { %516 = vmatmul.bf16.gmra.mxu0 %v4308_v10 }
  0x79   : > { %521 = vmatmul.bf16.gmra.mxu0 %v4309_v11  ;;  %v692_v11 = vsel %vm4764_vm4, 0, %v691_v8 }
  0x7a   : > { %693 = vst [vmem:[#allocation2 + $0x38] sm:$0x1] %v692_v11 }
  0x89   : > { %526 = vmatmul.bf16.gmra.mxu0 %v4310_v12 }
  0x99   : > { %531 = vmatmul.bf16.gmra.mxu0 %v4311_v13  ;;  %v4316_v13 = vld [vmem:[%s4717_s16 + $0x50] sm:$0xff] }
  0xa9   : > { %536 = vmatmul.bf16.gmra.mxu0 %v4312_v14 }
  0xb9   : > { %541 = vmatmul.bf16.gmra.mxu0 %v4313_v21 }
  0xc6   : > { %v507_v28 = vpop.f32.mrf.mxu0 }
  0xc7   : > { %v508_v29 = vadd.f32 %v4776_v25, %v507_v28 }
  0xc9   : > { %v587_v30 = vmax.f32 %v508_v29, 0.0  ;;  %546 = vmatmul.bf16.gmra.mxu0 %v4314_v27 }
  0xcb   : > { %v730_v32 = vpack.c.bf16 %v587_v30, %v587_v30  ;;  %v645_v30 = vsel %vm4756_vm2, 0, %v644_v26 }
  0xcc   : > { %646 = vst [vmem:[#allocation2 + $0x3c] sm:$0x1] %v645_v30 }
  0xcd   : > { %v765_v34 = vshrl.u32 %v730_v32, 16  ;;  %v768_v37 = vshll.u32 %v730_v32, 16 }
  0xce   : > { %v509_v35 = vpop.f32.mrf.mxu0 }
  0xcf   : > { %v767_v36 = vrot.slane %v765_v34, 7  ;;  %v510_v38 = vadd.f32 %v4776_v25, %v509_v35 }
  0xd1   : > { %v770_v41 = vor.u32 %v768_v37, %v767_v36  ;;  %v588_v42 = vmax.f32 %v510_v38, 0.0  ;;  %v771_v55 = vrot.slane %v767_v36, 4  ;;  %v1100_v36 = vld [vmem:[#allocation2 + $0x24] sm:$0xf] }
  0xd3   : > { %v1087_v44 = vsel %vm4787_vm6, %v770_v41, %v1086_v40  ;;  %v731_v45 = vpack.c.bf16 %v588_v42, %v588_v42  ;;  %v694_v40 = vld [vmem:[#allocation2 + $0x44] sm:$0x1] }
  0xd4   : > { %1088 = vst [vmem:[#allocation2 + $0xc] sm:$0xf] %v1087_v44  ;;  %v695_v43 = vsel %vm4764_vm4, 0, %v694_v40 }
  0xd5   : > { %v773_v47 = vshrl.u32 %v731_v45, 16  ;;  %v776_v51 = vshll.u32 %v731_v45, 16  ;;  %v4317_v45 = vld [vmem:[%s4717_s16 + $0x58] sm:$0xff]  ;;  %696 = vst [vmem:[#allocation2 + $0x44] sm:$0x1] %v695_v43 }
  0xd6   : > { %v512_v49 = vpop.f32.mrf.mxu0 }
  0xd7   : > { %v775_v50 = vrot.slane %v773_v47, 7  ;;  %v513_v52 = vadd.f32 %v4776_v25, %v512_v49 }
  0xd9   : > { %v778_v56 = vor.u32 %v776_v51, %v775_v50  ;;  %v780_v57 = vrot.slane %v775_v50, 4  ;;  %v589_v58 = vmax.f32 %v513_v52, 0.0  ;;  %551 = vmatmul.bf16.gmra.mxu0 %v4315_v48  ;;  %v1104_v50 = vld [vmem:[#allocation2 + $0x2c] sm:$0x1] }
  0xdb   : > { %v779_v60 = vsel %vm4798_vm8, %v771_v55, %v778_v56  ;;  %v1091_v61 = vsel %vm4756_vm2, %v780_v57, %v1090_v54  ;;  %v732_v62 = vpack.c.bf16 %v589_v58, %v589_v58  ;;  %v647_v56 = vld [vmem:[#allocation2 + $0x48] sm:$0x1] }
  0xdc   : > { %1089 = vst.msk [vmem:[#allocation2 + $0x10] sm:$0xf] %vm619_vm5, %v779_v60  ;;  %v648_v60 = vsel %vm4756_vm2, 0, %v647_v56 }
  0xdd   : > { %1092 = vst [vmem:[#allocation2 + $0x14] sm:$0x1] %v1091_v61  ;;  %v782_v0 = vshrl.u32 %v732_v62, 16  ;;  %v785_v3 = vshll.u32 %v732_v62, 16 }
  0xde   : > { %v514_v1 = vpop.f32.mrf.mxu0  ;;  %649 = vst [vmem:[#allocation2 + $0x48] sm:$0x1] %v648_v60 }
  0xdf   : > { %v784_v2 = vrot.slane %v782_v0, 7  ;;  %v515_v4 = vadd.f32 %v4776_v25, %v514_v1 }
  0xe1   : > { %v787_v6 = vor.u32 %v785_v3, %v784_v2  ;;  %v590_v7 = vmax.f32 %v515_v4, 0.0  ;;  %v788_v21 = vrot.slane %v784_v2, 4  ;;  %v1107_v2 = vld [vmem:[#allocation2 + $0x30] sm:$0xf] }
  0xe3   : > { %v1094_v9 = vsel %vm4787_vm6, %v787_v6, %v1093_v5  ;;  %v733_v10 = vpack.c.bf16 %v590_v7, %v590_v7  ;;  %v697_v5 = vld [vmem:[#allocation2 + $0x50] sm:$0x1] }
  0xe4   : > { %1095 = vst [vmem:[#allocation2 + $0x18] sm:$0xf] %v1094_v9  ;;  %v698_v8 = vsel %vm4764_vm4, 0, %v697_v5 }
  0xe5   : > { %v790_v12 = vshrl.u32 %v733_v10, 16  ;;  %v793_v17 = vshll.u32 %v733_v10, 16  ;;  %v4318_v10 = vld [vmem:[%s4717_s16 + $0x60] sm:$0xff]  ;;  %699 = vst [vmem:[#allocation2 + $0x50] sm:$0x1] %v698_v8 }
  0xe6   : > { %v517_v14 = vpop.f32.mrf.mxu0 }
  0xe7   : > { %v792_v16 = vrot.slane %v790_v12, 7  ;;  %v518_v19 = vadd.f32 %v4776_v25, %v517_v14 }
  0xe9   : > { %v795_v22 = vor.u32 %v793_v17, %v792_v16  ;;  %v797_v23 = vrot.slane %v792_v16, 4  ;;  %v591_v24 = vmax.f32 %v518_v19, 0.0  ;;  %556 = vmatmul.bf16.gmra.mxu0 %v4316_v13  ;;  %v1111_v16 = vld [vmem:[#allocation2 + $0x38] sm:$0x1] }
  0xeb   : > { %v796_v27 = vsel %vm4798_vm8, %v788_v21, %v795_v22  ;;  %v1098_v28 = vsel %vm4756_vm2, %v797_v23, %v1097_v20  ;;  %v734_v29 = vpack.c.bf16 %v591_v24, %v591_v24  ;;  %v650_v22 = vld [vmem:[#allocation2 + $0x54] sm:$0x1] }
  0xec   : > { %1096 = vst.msk [vmem:[#allocation2 + $0x1c] sm:$0xf] %vm619_vm5, %v796_v27  ;;  %v651_v27 = vsel %vm4756_vm2, 0, %v650_v22 }
  0xed   : > { %1099 = vst [vmem:[#allocation2 + $0x20] sm:$0x1] %v1098_v28  ;;  %v799_v31 = vshrl.u32 %v734_v29, 16  ;;  %v802_v34 = vshll.u32 %v734_v29, 16 }
  0xee   : > { %v519_v32 = vpop.f32.mrf.mxu0  ;;  %652 = vst [vmem:[#allocation2 + $0x54] sm:$0x1] %v651_v27 }
  0xef   : > { %v801_v33 = vrot.slane %v799_v31, 7  ;;  %v520_v35 = vadd.f32 %v4776_v25, %v519_v32 }
  0xf1   : > { %v804_v37 = vor.u32 %v802_v34, %v801_v33  ;;  %v592_v38 = vmax.f32 %v520_v35, 0.0  ;;  %v805_v51 = vrot.slane %v801_v33, 4  ;;  %v1114_v33 = vld [vmem:[#allocation2 + $0x3c] sm:$0xf] }
  0xf3   : > { %v1101_v41 = vsel %vm4787_vm6, %v804_v37, %v1100_v36  ;;  %v735_v42 = vpack.c.bf16 %v592_v38, %v592_v38  ;;  %v700_v36 = vld [vmem:[#allocation2 + $0x5c] sm:$0x1] }
  0xf4   : > { %1102 = vst [vmem:[#allocation2 + $0x24] sm:$0xf] %v1101_v41  ;;  %v701_v40 = vsel %vm4764_vm4, 0, %v700_v36  ;;  %v2633_v53 = vld [vmem:[#allocation2 + $0x20] sm:$0x1] }
  0xf5   : > { %v807_v44 = vshrl.u32 %v735_v42, 16  ;;  %v810_v48 = vshll.u32 %v735_v42, 16  ;;  %v4319_v42 = vld [vmem:[%s4717_s16 + $0x68] sm:$0xff]  ;;  %702 = vst [vmem:[#allocation2 + $0x5c] sm:$0x1] %v701_v40 }
  0xf6   : > { %v522_v46 = vpop.f32.mrf.mxu0 }
  0xf7   : > { %v809_v47 = vrot.slane %v807_v44, 7  ;;  %v523_v49 = vadd.f32 %v4776_v25, %v522_v46 }
  0xf9   : > { %v812_v52 = vor.u32 %v810_v48, %v809_v47  ;;  %v814_v54 = vrot.slane %v809_v47, 4  ;;  %v593_v55 = vmax.f32 %v523_v49, 0.0  ;;  %561 = vmatmul.bf16.gmra.mxu0 %v4317_v45  ;;  %v1118_v47 = vld [vmem:[#allocation2 + $0x44] sm:$0x1] }
  0xfb   : > { %v813_v57 = vsel %vm4798_vm8, %v805_v51, %v812_v52  ;;  %v1105_v58 = vsel %vm4756_vm2, %v814_v54, %v1104_v50  ;;  %v736_v59 = vpack.c.bf16 %v593_v55, %v593_v55  ;;  %v653_v52 = vld [vmem:[#allocation2 + $0x60] sm:$0x1] }
  0xfc   : > { %1103 = vst.msk [vmem:[#allocation2 + $0x28] sm:$0xf] %vm619_vm5, %v813_v57  ;;  %v654_v57 = vsel %vm4756_vm2, 0, %v653_v52 }
  0xfd   : > { %1106 = vst [vmem:[#allocation2 + $0x2c] sm:$0x1] %v1105_v58  ;;  %v816_v61 = vshrl.u32 %v736_v59, 16  ;;  %v819_v0 = vshll.u32 %v736_v59, 16 }
  0xfe   : > { %v524_v62 = vpop.f32.mrf.mxu0  ;;  %655 = vst [vmem:[#allocation2 + $0x60] sm:$0x1] %v654_v57 }
  0xff   : > { %v818_v63 = vrot.slane %v816_v61, 7  ;;  %v525_v1 = vadd.f32 %v4776_v25, %v524_v62 }
 0x101   : > { %v821_v3 = vor.u32 %v819_v0, %v818_v63  ;;  %v594_v4 = vmax.f32 %v525_v1, 0.0  ;;  %v822_v17 = vrot.slane %v818_v63, 4  ;;  %v1121_v63 = vld [vmem:[#allocation2 + $0x48] sm:$0xf] }
 0x103   : > { %v1108_v6 = vsel %vm4787_vm6, %v821_v3, %v1107_v2  ;;  %v737_v7 = vpack.c.bf16 %v594_v4, %v594_v4  ;;  %v703_v2 = vld [vmem:[#allocation2 + $0x68] sm:$0x1] }
 0x104   : > { %1109 = vst [vmem:[#allocation2 + $0x30] sm:$0xf] %v1108_v6  ;;  %v704_v5 = vsel %vm4764_vm4, 0, %v703_v2 }
 0x105   : > { %v824_v9 = vshrl.u32 %v737_v7, 16  ;;  %v827_v13 = vshll.u32 %v737_v7, 16  ;;  %v4320_v7 = vld [vmem:[%s4717_s16 + $0x70] sm:$0xff]  ;;  %705 = vst [vmem:[#allocation2 + $0x68] sm:$0x1] %v704_v5 }
 0x106   : > { %v527_v11 = vpop.f32.mrf.mxu0 }
 0x107   : > { %v826_v12 = vrot.slane %v824_v9, 7  ;;  %v528_v14 = vadd.f32 %v4776_v25, %v527_v11 }
 0x109   : > { %v829_v19 = vor.u32 %v827_v13, %v826_v12  ;;  %v831_v20 = vrot.slane %v826_v12, 4  ;;  %v595_v21 = vmax.f32 %v528_v14, 0.0  ;;  %566 = vmatmul.bf16.gmra.mxu0 %v4318_v10  ;;  %v1125_v12 = vld [vmem:[#allocation2 + $0x50] sm:$0x1] }
 0x10b   : > { %v830_v23 = vsel %vm4798_vm8, %v822_v17, %v829_v19  ;;  %v1112_v24 = vsel %vm4756_vm2, %v831_v20, %v1111_v16  ;;  %v738_v26 = vpack.c.bf16 %v595_v21, %v595_v21  ;;  %v656_v19 = vld [vmem:[#allocation2 + $0x6c] sm:$0x1] }
 0x10c   : > { %1110 = vst.msk [vmem:[#allocation2 + $0x34] sm:$0xf] %vm619_vm5, %v830_v23  ;;  %v657_v23 = vsel %vm4756_vm2, 0, %v656_v19 }
 0x10d   : > { %1113 = vst [vmem:[#allocation2 + $0x38] sm:$0x1] %v1112_v24  ;;  %v833_v28 = vshrl.u32 %v738_v26, 16  ;;  %v836_v31 = vshll.u32 %v738_v26, 16 }
 0x10e   : > { %v529_v29 = vpop.f32.mrf.mxu0  ;;  %658 = vst [vmem:[#allocation2 + $0x6c] sm:$0x1] %v657_v23 }
 0x10f   : > { %v835_v30 = vrot.slane %v833_v28, 7  ;;  %v530_v32 = vadd.f32 %v4776_v25, %v529_v29 }
 0x111   : > { %v838_v34 = vor.u32 %v836_v31, %v835_v30  ;;  %v596_v35 = vmax.f32 %v530_v32, 0.0  ;;  %v839_v48 = vrot.slane %v835_v30, 4  ;;  %v1128_v30 = vld [vmem:[#allocation2 + $0x54] sm:$0xf] }
 0x113   : > { %v1115_v37 = vsel %vm4787_vm6, %v838_v34, %v1114_v33  ;;  %v739_v38 = vpack.c.bf16 %v596_v35, %v596_v35  ;;  %v706_v33 = vld [vmem:[#allocation2 + $0x74] sm:$0x1] }
 0x114   : > { %1116 = vst [vmem:[#allocation2 + $0x3c] sm:$0xf] %v1115_v37  ;;  %v707_v36 = vsel %vm4764_vm4, 0, %v706_v33  ;;  %v4373_v33 = vld [vmem:[%s5993_s2 + $0x58] sm:$0xff] }
 0x115   : > { %v841_v41 = vshrl.u32 %v739_v38, 16  ;;  %v844_v45 = vshll.u32 %v739_v38, 16  ;;  %v4321_v38 = vld [vmem:[%s4717_s16 + $0x78] sm:$0xff]  ;;  %708 = vst [vmem:[#allocation2 + $0x74] sm:$0x1] %v707_v36  ;;  %2386 = vmatpush.bf16.msrb.mxu0 %v4373_v33  ;;  %4400 = vmatpush.bf16.msra.mxu2 %v4373_v33 }
 0x116   : > { %v532_v43 = vpop.f32.mrf.mxu0  ;;  %4401 = vmatpush.bf16.msra.mxu3 %v4373_v33  ;;  %4399 = vmatpush.bf16.msra.mxu1 %v4373_v33 }
 0x117   : > { %v843_v44 = vrot.slane %v841_v41, 7  ;;  %v533_v46 = vadd.f32 %v4776_v25, %v532_v43 }
 0x119   : > { %v846_v49 = vor.u32 %v844_v45, %v843_v44  ;;  %v848_v50 = vrot.slane %v843_v44, 4  ;;  %v597_v51 = vmax.f32 %v533_v46, 0.0  ;;  %571 = vmatmul.bf16.gmra.mxu0 %v4319_v42  ;;  %v1132_v44 = vld [vmem:[#allocation2 + $0x5c] sm:$0x1] }
 0x11b   : > { %v847_v54 = vsel %vm4798_vm8, %v839_v48, %v846_v49  ;;  %v1119_v55 = vsel %vm4756_vm2, %v848_v50, %v1118_v47  ;;  %v740_v56 = vpack.c.bf16 %v597_v51, %v597_v51  ;;  %v659_v49 = vld [vmem:[#allocation2 + $0x78] sm:$0x1] }
 0x11c   : > { %1117 = vst.msk [vmem:[#allocation2 + $0x40] sm:$0xf] %vm619_vm5, %v847_v54  ;;  %v660_v54 = vsel %vm4756_vm2, 0, %v659_v49 }
 0x11d   : > { %1120 = vst [vmem:[#allocation2 + $0x44] sm:$0x1] %v1119_v55  ;;  %v850_v58 = vshrl.u32 %v740_v56, 16  ;;  %v853_v61 = vshll.u32 %v740_v56, 16 }
 0x11e   : > { %v534_v59 = vpop.f32.mrf.mxu0  ;;  %661 = vst [vmem:[#allocation2 + $0x78] sm:$0x1] %v660_v54 }
 0x11f   : > { %v852_v60 = vrot.slane %v850_v58, 7  ;;  %v535_v62 = vadd.f32 %v4776_v25, %v534_v59 }
 0x121   : > { %v855_v0 = vor.u32 %v853_v61, %v852_v60  ;;  %v598_v1 = vmax.f32 %v535_v62, 0.0  ;;  %v856_v13 = vrot.slane %v852_v60, 4  ;;  %v1135_v60 = vld [vmem:[#allocation2 + $0x60] sm:$0xf] }
 0x123   : > { %v1122_v3 = vsel %vm4787_vm6, %v855_v0, %v1121_v63  ;;  %v741_v4 = vpack.c.bf16 %v598_v1, %v598_v1  ;;  %v709_v63 = vld [vmem:[#allocation2 + $0x80] sm:$0x1] }
 0x124   : > { %1123 = vst [vmem:[#allocation2 + $0x48] sm:$0xf] %v1122_v3  ;;  %v710_v2 = vsel %vm4764_vm4, 0, %v709_v63 }
 0x125   : > { %v858_v6 = vshrl.u32 %v741_v4, 16  ;;  %v861_v10 = vshll.u32 %v741_v4, 16  ;;  %711 = vst [vmem:[#allocation2 + $0x80] sm:$0x1] %v710_v2 }
 0x126   : > { %v537_v8 = vpop.f32.mrf.mxu0 }
 0x127   : > { %v860_v9 = vrot.slane %v858_v6, 7  ;;  %v538_v11 = vadd.f32 %v4776_v25, %v537_v8  ;;  %v1139_v8 = vld [vmem:[#allocation2 + $0x68] sm:$0x1] }
 0x129   : > { %v863_v14 = vor.u32 %v861_v10, %v860_v9  ;;  %v865_v16 = vrot.slane %v860_v9, 4  ;;  %v599_v17 = vmax.f32 %v538_v11, 0.0  ;;  %576 = vmatmul.bf16.gmra.mxu0 %v4320_v7 }
 0x12b   : > { %v864_v20 = vsel %vm4798_vm8, %v856_v13, %v863_v14  ;;  %v1126_v21 = vsel %vm4756_vm2, %v865_v16, %v1125_v12  ;;  %v742_v22 = vpack.c.bf16 %v599_v17, %v599_v17  ;;  %v662_v13 = vld [vmem:[#allocation2 + $0x84] sm:$0x1] }
 0x12c   : > { %1124 = vst.msk [vmem:[#allocation2 + $0x4c] sm:$0xf] %vm619_vm5, %v864_v20  ;;  %v663_v19 = vsel %vm4756_vm2, 0, %v662_v13 }
 0x12d   : > { %1127 = vst [vmem:[#allocation2 + $0x50] sm:$0x1] %v1126_v21  ;;  %v867_v24 = vshrl.u32 %v742_v22, 16  ;;  %v870_v28 = vshll.u32 %v742_v22, 16 }
 0x12e   : > { %v539_v26 = vpop.f32.mrf.mxu0  ;;  %664 = vst [vmem:[#allocation2 + $0x84] sm:$0x1] %v663_v19 }
 0x12f   : > { %v869_v27 = vrot.slane %v867_v24, 7  ;;  %v540_v29 = vadd.f32 %v4776_v25, %v539_v26  ;;  %v1142_v26 = vld [vmem:[#allocation2 + $0x6c] sm:$0xf] }
 0x131   : > { %v872_v31 = vor.u32 %v870_v28, %v869_v27  ;;  %v600_v32 = vmax.f32 %v540_v29, 0.0  ;;  %v873_v45 = vrot.slane %v869_v27, 4  ;;  %v712_v29 = vld [vmem:[#allocation2 + $0x8c] sm:$0x1] }
 0x133   : > { %v1129_v34 = vsel %vm4787_vm6, %v872_v31, %v1128_v30  ;;  %v743_v35 = vpack.c.bf16 %v600_v32, %v600_v32  ;;  %v713_v32 = vsel %vm4764_vm4, 0, %v712_v29 }
 0x134   : > { %1130 = vst [vmem:[#allocation2 + $0x54] sm:$0xf] %v1129_v34 }
 0x135   : > { %v875_v37 = vshrl.u32 %v743_v35, 16  ;;  %v878_v42 = vshll.u32 %v743_v35, 16  ;;  %714 = vst [vmem:[#allocation2 + $0x8c] sm:$0x1] %v713_v32 }
 0x136   : > { %v542_v40 = vpop.f32.mrf.mxu0 }
 0x137   : > { %v877_v41 = vrot.slane %v875_v37, 7  ;;  %v543_v43 = vadd.f32 %v4776_v25, %v542_v40  ;;  %v1146_v40 = vld [vmem:[#allocation2 + $0x74] sm:$0x1] }
 0x139   : > { %v880_v46 = vor.u32 %v878_v42, %v877_v41  ;;  %v882_v47 = vrot.slane %v877_v41, 4  ;;  %v601_v48 = vmax.f32 %v543_v43, 0.0  ;;  %581 = vmatmul.bf16.gmra.mxu0 %v4321_v38 }
 0x13b   : > { %v881_v50 = vsel %vm4798_vm8, %v873_v45, %v880_v46  ;;  %v1133_v51 = vsel %vm4756_vm2, %v882_v47, %v1132_v44  ;;  %v744_v52 = vpack.c.bf16 %v601_v48, %v601_v48  ;;  %v665_v45 = vld [vmem:[#allocation2 + $0x90] sm:$0x1] }
 0x13c   : > { %1131 = vst.msk [vmem:[#allocation2 + $0x58] sm:$0xf] %vm619_vm5, %v881_v50  ;;  %v666_v49 = vsel %vm4756_vm2, 0, %v665_v45 }
 0x13d   : > { %1134 = vst [vmem:[#allocation2 + $0x5c] sm:$0x1] %v1133_v51  ;;  %v884_v55 = vshrl.u32 %v744_v52, 16  ;;  %v887_v58 = vshll.u32 %v744_v52, 16 }
 0x13e   : > { %v544_v56 = vpop.f32.mrf.mxu0  ;;  %667 = vst [vmem:[#allocation2 + $0x90] sm:$0x1] %v666_v49 }
 0x13f   : > { %v886_v57 = vrot.slane %v884_v55, 7  ;;  %v545_v59 = vadd.f32 %v4776_v25, %v544_v56  ;;  %v1149_v56 = vld [vmem:[#allocation2 + $0x78] sm:$0xf] }
 0x141   : > { %v889_v61 = vor.u32 %v887_v58, %v886_v57  ;;  %v602_v62 = vmax.f32 %v545_v59, 0.0  ;;  %v890_v9 = vrot.slane %v886_v57, 4  ;;  %v715_v59 = vld [vmem:[#allocation2 + $0x98] sm:$0x1] }
 0x143   : > { %v1136_v0 = vsel %vm4787_vm6, %v889_v61, %v1135_v60  ;;  %v745_v1 = vpack.c.bf16 %v602_v62, %v602_v62  ;;  %v716_v62 = vsel %vm4764_vm4, 0, %v715_v59  ;;  %v4372_v59 = vld [vmem:[%s5993_s2 + $0x50] sm:$0xff] }
 0x144   : > { %1137 = vst [vmem:[#allocation2 + $0x60] sm:$0xf] %v1136_v0  ;;  %2387 = vmatpush.bf16.msrb.mxu0 %v4372_v59  ;;  %4403 = vmatpush.bf16.msra.mxu2 %v4372_v59 }
 0x145   : > { %v892_v3 = vshrl.u32 %v745_v1, 16  ;;  %v895_v6 = vshll.u32 %v745_v1, 16  ;;  %717 = vst [vmem:[#allocation2 + $0x98] sm:$0x1] %v716_v62  ;;  %4404 = vmatpush.bf16.msra.mxu3 %v4372_v59  ;;  %4402 = vmatpush.bf16.msra.mxu1 %v4372_v59 }
 0x146   : > { %v547_v4 = vpop.f32.mrf.mxu0 }
 0x147   : > { %v894_v5 = vrot.slane %v892_v3, 7  ;;  %v548_v7 = vadd.f32 %v4776_v25, %v547_v4  ;;  %v1153_v4 = vld [vmem:[#allocation2 + $0x80] sm:$0x1] }
 0x149   : > { %v897_v10 = vor.u32 %v895_v6, %v894_v5  ;;  %v899_v11 = vrot.slane %v894_v5, 4  ;;  %v603_v12 = vmax.f32 %v548_v7, 0.0 }
 0x14b   : > { %v898_v14 = vsel %vm4798_vm8, %v890_v9, %v897_v10  ;;  %v1140_v16 = vsel %vm4756_vm2, %v899_v11, %v1139_v8  ;;  %v746_v17 = vpack.c.bf16 %v603_v12, %v603_v12  ;;  %v668_v12 = vld [vmem:[#allocation2 + $0x9c] sm:$0x1] }
 0x14c   : > { %1138 = vst.msk [vmem:[#allocation2 + $0x64] sm:$0xf] %vm619_vm5, %v898_v14  ;;  %v669_v13 = vsel %vm4756_vm2, 0, %v668_v12 }
 0x14d   : > { %1141 = vst [vmem:[#allocation2 + $0x68] sm:$0x1] %v1140_v16  ;;  %v901_v20 = vshrl.u32 %v746_v17, 16  ;;  %v904_v23 = vshll.u32 %v746_v17, 16 }
 0x14e   : > { %v549_v21 = vpop.f32.mrf.mxu0  ;;  %670 = vst [vmem:[#allocation2 + $0x9c] sm:$0x1] %v669_v13 }
 0x14f   : > { %v903_v22 = vrot.slane %v901_v20, 7  ;;  %v550_v24 = vadd.f32 %v4776_v25, %v549_v21  ;;  %v1156_v21 = vld [vmem:[#allocation2 + $0x84] sm:$0xf] }
 0x151   : > { %v906_v27 = vor.u32 %v904_v23, %v903_v22  ;;  %v604_v28 = vmax.f32 %v550_v24, 0.0  ;;  %v907_v41 = vrot.slane %v903_v22, 4 }
 0x153   : > { %v1143_v30 = vsel %vm4787_vm6, %v906_v27, %v1142_v26  ;;  %v747_v31 = vpack.c.bf16 %v604_v28, %v604_v28  ;;  %v718_v28 = vld [vmem:[#allocation2 + $0xa4] sm:$0x1] }
 0x154   : > { %1144 = vst [vmem:[#allocation2 + $0x6c] sm:$0xf] %v1143_v30  ;;  %v719_v30 = vsel %vm4764_vm4, 0, %v718_v28 }
 0x155   : > { %v909_v34 = vshrl.u32 %v747_v31, 16  ;;  %v912_v37 = vshll.u32 %v747_v31, 16  ;;  %720 = vst [vmem:[#allocation2 + $0xa4] sm:$0x1] %v719_v30 }
 0x156   : > { %v552_v35 = vpop.f32.mrf.mxu0 }
 0x157   : > { %v911_v36 = vrot.slane %v909_v34, 7  ;;  %v553_v38 = vadd.f32 %v4776_v25, %v552_v35 }
 0x159   : > { %v914_v42 = vor.u32 %v912_v37, %v911_v36  ;;  %v916_v43 = vrot.slane %v911_v36, 4  ;;  %v605_v44 = vmax.f32 %v553_v38, 0.0 }
 0x15b   : > { %v915_v46 = vsel %vm4798_vm8, %v907_v41, %v914_v42  ;;  %v1147_v47 = vsel %vm4756_vm2, %v916_v43, %v1146_v40  ;;  %v748_v48 = vpack.c.bf16 %v605_v44, %v605_v44  ;;  %v1160_v41 = vld [vmem:[#allocation2 + $0x8c] sm:$0x1] }
 0x15c   : > { %1145 = vst.msk [vmem:[#allocation2 + $0x70] sm:$0xf] %vm619_vm5, %v915_v46 }
 0x15d   : > { %1148 = vst [vmem:[#allocation2 + $0x74] sm:$0x1] %v1147_v47  ;;  %v918_v50 = vshrl.u32 %v748_v48, 16  ;;  %v921_v54 = vshll.u32 %v748_v48, 16 }
 0x15e   : > { %v554_v51 = vpop.f32.mrf.mxu0 }
 0x15f   : > { %v920_v52 = vrot.slane %v918_v50, 7  ;;  %v555_v55 = vadd.f32 %v4776_v25, %v554_v51 }
 0x161   : > { %v923_v57 = vor.u32 %v921_v54, %v920_v52  ;;  %v606_v58 = vmax.f32 %v555_v55, 0.0  ;;  %v924_v5 = vrot.slane %v920_v52, 4  ;;  %v671_v54 = vld [vmem:[#allocation2 + $0xa8] sm:$0x1] }
 0x162   : > { %v672_v55 = vsel %vm4756_vm2, 0, %v671_v54  ;;  %v724_v54 = vld [vmem:[#allocation2 + $0xbc] sm:$0x1] }
 0x163   : > { %v1150_v60 = vsel %vm4787_vm6, %v923_v57, %v1149_v56  ;;  %v749_v61 = vpack.c.bf16 %v606_v58, %v606_v58  ;;  %673 = vst [vmem:[#allocation2 + $0xa8] sm:$0x1] %v672_v55 }
 0x164   : > { %1151 = vst [vmem:[#allocation2 + $0x78] sm:$0xf] %v1150_v60 }
 0x165   : > { %v926_v63 = vshrl.u32 %v749_v61, 16  ;;  %v929_v2 = vshll.u32 %v749_v61, 16 }
 0x166   : > { %v557_v0 = vpop.f32.mrf.mxu0 }
 0x167   : > { %v928_v1 = vrot.slane %v926_v63, 7  ;;  %v558_v3 = vadd.f32 %v4776_v25, %v557_v0  ;;  %v1163_v63 = vld [vmem:[#allocation2 + $0x90] sm:$0xf] }
 0x169   : > { %v931_v6 = vor.u32 %v929_v2, %v928_v1  ;;  %v933_v7 = vrot.slane %v928_v1, 4  ;;  %v607_v8 = vmax.f32 %v558_v3, 0.0 }
 0x16b   : > { %v932_v9 = vsel %vm4798_vm8, %v924_v5, %v931_v6  ;;  %v1154_v10 = vsel %vm4756_vm2, %v933_v7, %v1153_v4  ;;  %v750_v11 = vpack.c.bf16 %v607_v8, %v607_v8  ;;  %v721_v7 = vld [vmem:[#allocation2 + $0xb0] sm:$0x1] }
 0x16c   : > { %1152 = vst.msk [vmem:[#allocation2 + $0x7c] sm:$0xf] %vm619_vm5, %v932_v9  ;;  %v722_v9 = vsel %vm4764_vm4, 0, %v721_v7 }
 0x16d   : > { %1155 = vst [vmem:[#allocation2 + $0x80] sm:$0x1] %v1154_v10  ;;  %v935_v14 = vshrl.u32 %v750_v11, 16  ;;  %v938_v19 = vshll.u32 %v750_v11, 16 }
 0x16e   : > { %v559_v16 = vpop.f32.mrf.mxu0  ;;  %723 = vst [vmem:[#allocation2 + $0xb0] sm:$0x1] %v722_v9 }
 0x16f   : > { %v937_v17 = vrot.slane %v935_v14, 7  ;;  %v560_v20 = vadd.f32 %v4776_v25, %v559_v16 }
 0x171   : > { %v940_v22 = vor.u32 %v938_v19, %v937_v17  ;;  %v608_v23 = vmax.f32 %v560_v20, 0.0  ;;  %v941_v40 = vrot.slane %v937_v17, 4 }
 0x173   : > { %v1157_v24 = vsel %vm4787_vm6, %v940_v22, %v1156_v21  ;;  %v751_v26 = vpack.c.bf16 %v608_v23, %v608_v23  ;;  %v4938_v27 = vld [vmem:[#allocation2 + $0x78] sm:$0xff] }
 0x174   : > { %1158 = vst [vmem:[#allocation2 + $0x84] sm:$0xf] %v1157_v24  ;;  %v1787_v29 = vld [vmem:[#allocation2 + $0x80] sm:$0x1]  ;;  %v2045_v34 = vshll.u32 %v4938_v27, 16  ;;  %v2043_v42 = vshrl.u32 %v4938_v27, 16 }
 0x175   : > { %v943_v31 = vshrl.u32 %v751_v26, 16  ;;  %v1911_v32 = vunpack.c.l.b16 %v1787_v29  ;;  %v946_v36 = vshll.u32 %v751_v26, 16  ;;  %v2185_v5 = vrot.slane %v4938_v27, 1  ;;  %v1167_v22 = vld [vmem:[#allocation2 + $0x98] sm:$0x1] }
 0x176   : > { %v562_v33 = vpop.f32.mrf.mxu0  ;;  %v2047_v43 = vrot.slane %v2045_v34, 1 }
 0x177   : > { %v945_v35 = vrot.slane %v943_v31, 7  ;;  %v563_v37 = vadd.f32 %v4776_v25, %v562_v33  ;;  %v1927_v38 = vpack.c.b16 %v1911_v32, %v1911_v32 }
 0x178   : > { %v2048_v48 = vor.u32 %v2047_v43, %v2043_v42 }
 0x179   : > { %v948_v44 = vor.u32 %v946_v36, %v945_v35  ;;  %v950_v45 = vrot.slane %v945_v35, 4  ;;  %v609_v46 = vmax.f32 %v563_v37, 0.0  ;;  %v2050_v47 = vshll.u32 %v1927_v38, 16  ;;  %v674_v36 = vld [vmem:[#allocation2 + $0xb4] sm:$0x1] }
 0x17a   : > { %v2186_v2 = vrot.slane %v1927_v38, 1  ;;  %v675_v37 = vsel %vm4756_vm2, 0, %v674_v36  ;;  %v727_v36 = vld [vmem:[#allocation2 + $0xc8] sm:$0x1] }
 0x17b   : > { %v949_v49 = vsel %vm4798_vm8, %v941_v40, %v948_v44  ;;  %v1161_v50 = vsel %vm4756_vm2, %v950_v45, %v1160_v41  ;;  %v752_v51 = vpack.c.bf16 %v609_v46, %v609_v46  ;;  %v2052_v52 = vrot.slane %v2050_v47, 1  ;;  %676 = vst [vmem:[#allocation2 + $0xb4] sm:$0x1] %v675_v37  ;;  %v1170_v45 = vld [vmem:[#allocation2 + $0x9c] sm:$0xf] }
 0x17c   : > { %1159 = vst.msk [vmem:[#allocation2 + $0x88] sm:$0xf] %vm619_vm5, %v949_v49  ;;  %v2187_v11 = vsel %vm1599_vm10, %v2185_v5, %v2186_v2 }
 0x17d   : > { %1162 = vst [vmem:[#allocation2 + $0x8c] sm:$0x1] %v1161_v50  ;;  %v952_v56 = vshrl.u32 %v752_v51, 16  ;;  %v2053_v57 = vsel %vm1374_vm9, %v2048_v48, %v2052_v52  ;;  %v955_v61 = vshll.u32 %v752_v51, 16 }
 0x17e   : > { %2144 = vrot.lane.b32.xlu0 %v2053_v57, %s4582_s18  ;;  %v564_v58 = vpop.f32.mrf.mxu0 }
 0x17f   : > { %v954_v60 = vrot.slane %v952_v56, 7  ;;  %v565_v62 = vadd.f32 %v4776_v25, %v564_v58  ;;  %v725_v56 = vsel %vm4764_vm4, 0, %v724_v54 }
 0x180   : > { %726 = vst [vmem:[#allocation2 + $0xbc] sm:$0x1] %v725_v56 }
 0x181   : > { %v957_v0 = vor.u32 %v955_v61, %v954_v60  ;;  %v610_v1 = vmax.f32 %v565_v62, 0.0  ;;  %v958_v21 = vrot.slane %v954_v60, 4 }
 0x183   : > { %v1164_v3 = vsel %vm4787_vm6, %v957_v0, %v1163_v63  ;;  %v753_v4 = vpack.c.bf16 %v610_v1, %v610_v1  ;;  %v4961_v6 = vld [vmem:[#allocation2 + $0x84] sm:$0xff] }
 0x184   : > { %1165 = vst [vmem:[#allocation2 + $0x90] sm:$0xf] %v1164_v3  ;;  %v1790_v8 = vld [vmem:[#allocation2 + $0x8c] sm:$0x1]  ;;  %v2057_v14 = vshll.u32 %v4961_v6, 16  ;;  %v2055_v23 = vshrl.u32 %v4961_v6, 16 }
 0x185   : > { %v960_v10 = vshrl.u32 %v753_v4, 16  ;;  %v1912_v12 = vunpack.c.l.b16 %v1790_v8  ;;  %v963_v17 = vshll.u32 %v753_v4, 16  ;;  %v2188_v51 = vrot.slane %v4961_v6, 1  ;;  %v1174_v3 = vld [vmem:[#allocation2 + $0xa4] sm:$0x1] }
 0x186   : > { %2224 = vrot.lane.b32.xlu0 %v2187_v11, %s4583_s20  ;;  %v567_v13 = vpop.f32.mrf.mxu0  ;;  %v2059_v24 = vrot.slane %v2057_v14, 1 }
 0x187   : > { %v962_v16 = vrot.slane %v960_v10, 7  ;;  %v568_v19 = vadd.f32 %v4776_v25, %v567_v13  ;;  %v1928_v20 = vpack.c.b16 %v1912_v12, %v1912_v12 }
 0x188   : > { %v2060_v31 = vor.u32 %v2059_v24, %v2055_v23 }
 0x189   : > { %v965_v26 = vor.u32 %v963_v17, %v962_v16  ;;  %v967_v28 = vrot.slane %v962_v16, 4  ;;  %v611_v29 = vmax.f32 %v568_v19, 0.0  ;;  %v2062_v30 = vshll.u32 %v1928_v20, 16  ;;  %v677_v17 = vld [vmem:[#allocation2 + $0xc0] sm:$0x1] }
 0x18a   : > { %v2189_v48 = vrot.slane %v1928_v20, 1  ;;  %v678_v19 = vsel %vm4756_vm2, 0, %v677_v17 }
 0x18b   : > { %v966_v32 = vsel %vm4798_vm8, %v958_v21, %v965_v26  ;;  %v1168_v33 = vsel %vm4756_vm2, %v967_v28, %v1167_v22  ;;  %v754_v34 = vpack.c.bf16 %v611_v29, %v611_v29  ;;  %v2064_v35 = vrot.slane %v2062_v30, 1  ;;  %679 = vst [vmem:[#allocation2 + $0xc0] sm:$0x1] %v678_v19  ;;  %v1177_v28 = vld [vmem:[#allocation2 + $0xa8] sm:$0xf] }
 0x18c   : > { %1166 = vst.msk [vmem:[#allocation2 + $0x94] sm:$0xf] %vm619_vm5, %v966_v32  ;;  %v2190_v58 = vsel %vm1599_vm10, %v2188_v51, %v2189_v48 }
 0x18d   : > { %1169 = vst [vmem:[#allocation2 + $0x98] sm:$0x1] %v1168_v33  ;;  %v969_v38 = vshrl.u32 %v754_v34, 16  ;;  %v2065_v40 = vsel %vm1374_vm9, %v2060_v31, %v2064_v35  ;;  %v972_v43 = vshll.u32 %v754_v34, 16 }
 0x18e   : > { %2146 = vrot.lane.b32.xlu1 %v2065_v40, %s4582_s18  ;;  %v569_v41 = vpop.f32.mrf.mxu0 }
 0x18f   : > { %v971_v42 = vrot.slane %v969_v38, 7  ;;  %v570_v44 = vadd.f32 %v4776_v25, %v569_v41  ;;  %v4371_v38 = vld [vmem:[%s5993_s2 + $0x48] sm:$0xff] }
 0x190   : > { %2388 = vmatpush.bf16.msrb.mxu0 %v4371_v38  ;;  %4406 = vmatpush.bf16.msra.mxu2 %v4371_v38 }
 0x191   : > { %v974_v46 = vor.u32 %v972_v43, %v971_v42  ;;  %v612_v47 = vmax.f32 %v570_v44, 0.0  ;;  %v975_v2 = vrot.slane %v971_v42, 4  ;;  %4407 = vmatpush.bf16.msra.mxu3 %v4371_v38  ;;  %4405 = vmatpush.bf16.msra.mxu1 %v4371_v38 }
 0x193   : > { %v1171_v49 = vsel %vm4787_vm6, %v974_v46, %v1170_v45  ;;  %v755_v50 = vpack.c.bf16 %v612_v47, %v612_v47  ;;  %v4983_v52 = vld [vmem:[#allocation2 + $0x90] sm:$0xff]  ;;  %v5018_v47 = vld [vmem:[%s5995_s4] ss:$0 sm:$0xff] }
 0x194   : > { %1172 = vst [vmem:[#allocation2 + $0x9c] sm:$0xf] %v1171_v49  ;;  %v1793_v55 = vld [vmem:[#allocation2 + $0x98] sm:$0x1]  ;;  %v2069_v61 = vshll.u32 %v4983_v52, 16  ;;  %v2067_v4 = vshrl.u32 %v4983_v52, 16 }
 0x195   : > { %v977_v57 = vshrl.u32 %v755_v50, 16  ;;  %v1913_v59 = vunpack.c.l.b16 %v1793_v55  ;;  %v980_v63 = vshll.u32 %v755_v50, 16  ;;  %v2191_v34 = vrot.slane %v4983_v52, 1  ;;  %v1181_v50 = vld [vmem:[#allocation2 + $0xb0] sm:$0x1] }
 0x196   : > { %2226 = vrot.lane.b32.xlu1 %v2190_v58, %s4583_s20  ;;  %v572_v60 = vpop.f32.mrf.mxu0  ;;  %v2071_v5 = vrot.slane %v2069_v61, 1 }
 0x197   : > { %v979_v62 = vrot.slane %v977_v57, 7  ;;  %v573_v0 = vadd.f32 %v4776_v25, %v572_v60  ;;  %v1929_v1 = vpack.c.b16 %v1913_v59, %v1913_v59 }
 0x198   : > { %v2072_v11 = vor.u32 %v2071_v5, %v2067_v4 }
 0x199   : > { %v982_v7 = vor.u32 %v980_v63, %v979_v62  ;;  %v984_v8 = vrot.slane %v979_v62, 4  ;;  %v613_v9 = vmax.f32 %v573_v0, 0.0  ;;  %v2074_v10 = vshll.u32 %v1929_v1, 16 }
 0x19a   : > { %v2192_v31 = vrot.slane %v1929_v1, 1 }
 0x19b   : > { %v983_v12 = vsel %vm4798_vm8, %v975_v2, %v982_v7  ;;  %v1175_v13 = vsel %vm4756_vm2, %v984_v8, %v1174_v3  ;;  %v756_v14 = vpack.c.bf16 %v613_v9, %v613_v9  ;;  %v2076_v16 = vrot.slane %v2074_v10, 1 }
 0x19c   : > { %1173 = vst.msk [vmem:[#allocation2 + $0xa0] sm:$0xf] %vm619_vm5, %v983_v12  ;;  %v2193_v41 = vsel %vm1599_vm10, %v2191_v34, %v2192_v31  ;;  %v4584_v10 = vmov 0   ;;  %v1188_v31 = vld [vmem:[#allocation2 + $0xbc] sm:$0x1] }
 0x19d   : > { %1176 = vst [vmem:[#allocation2 + $0xa4] sm:$0x1] %v1175_v13  ;;  %v986_v20 = vshrl.u32 %v756_v14, 16  ;;  %v2077_v21 = vsel %vm1374_vm9, %v2072_v11, %v2076_v16  ;;  %v989_v24 = vshll.u32 %v756_v14, 16  ;;  %v1184_v11 = vld [vmem:[#allocation2 + $0xb4] sm:$0xf] }
 0x19e   : > { %2148 = vrot.lane.b32.xlu2 %v2077_v21, %s4582_s18  ;;  %v574_v22 = vpop.f32.mrf.mxu0  ;;  %620 = vst.msk [vmem:[#allocation2] sm:$0xf] %vm619_vm5, %v4584_v10 }
 0x19f   : > { %v988_v23 = vrot.slane %v986_v20, 7  ;;  %v575_v26 = vadd.f32 %v4776_v25, %v574_v22  ;;  %v728_v25 = vsel %vm4764_vm4, 0, %v727_v36  ;;  %621 = vst.msk [vmem:[#allocation2 + $0x4] sm:$0xf] %vm619_vm5, %v4584_v10 }
 0x1a0   : > { %729 = vst [vmem:[#allocation2 + $0xc8] sm:$0x1] %v728_v25 }
 0x1a1   : > { %v991_v29 = vor.u32 %v989_v24, %v988_v23  ;;  %v614_v30 = vmax.f32 %v575_v26, 0.0  ;;  %v992_v49 = vrot.slane %v988_v23, 4  ;;  %623 = vst.msk [vmem:[#allocation2 + $0x8] sm:$0x1] %vm622_vm0, %v4584_v10 }
 0x1a2   : > { %625 = vst.msk [vmem:[#allocation2 + $0xcc] sm:$0xf] %vm619_vm5, %v4584_v10 }
 0x1a3   : > { %v1178_v32 = vsel %vm4787_vm6, %v991_v29, %v1177_v28  ;;  %v757_v33 = vpack.c.bf16 %v614_v30, %v614_v30  ;;  %v5005_v35 = vld [vmem:[#allocation2 + $0x9c] sm:$0xff]  ;;  %626 = vst.msk [vmem:[#allocation2 + $0xd0] sm:$0xf] %vm619_vm5, %v4584_v10 }
 0x1a4   : > { %1179 = vst [vmem:[#allocation2 + $0xa8] sm:$0xf] %v1178_v32  ;;  %v1796_v37 = vld [vmem:[#allocation2 + $0xa4] sm:$0x1]  ;;  %v2081_v44 = vshll.u32 %v5005_v35, 16  ;;  %v2194_v51 = vrot.slane %v5005_v35, 1 }
 0x1a5   : > { %v994_v40 = vshrl.u32 %v757_v33, 16  ;;  %v1914_v42 = vunpack.c.l.b16 %v1796_v37  ;;  %v997_v46 = vshll.u32 %v757_v33, 16  ;;  %v2079_v54 = vshrl.u32 %v5005_v35, 16  ;;  %627 = vst.msk [vmem:[#allocation2 + $0xd4] sm:$0x1] %vm622_vm0, %v4584_v10 }
 0x1a6   : > { %2228 = vrot.lane.b32.xlu2 %v2193_v41, %s4583_s20  ;;  %v577_v43 = vpop.f32.mrf.mxu0  ;;  %v2083_v55 = vrot.slane %v2081_v44, 1 }
 0x1a7   : > { %v996_v45 = vrot.slane %v994_v40, 7  ;;  %v578_v18 = vadd.f32 %v5018_v47, %v577_v43  ;;  %v1930_v48 = vpack.c.b16 %v1914_v42, %v1914_v42  ;;  %v1195_v39 = vld [vmem:[#allocation2 + $0xc8] sm:$0x1] }
 0x1a8   : > { %v2084_v60 = vor.u32 %v2083_v55, %v2079_v54 }
 0x1a9   : > { %v999_v56 = vor.u32 %v997_v46, %v996_v45  ;;  %v1001_v57 = vrot.slane %v996_v45, 4  ;;  %v615_v58 = vmax.f32 %v578_v18, 0.0  ;;  %v2195_v59 = vrot.slane %v1930_v48, 1 }
 0x1aa   : > { %v2086_v61 = vshll.u32 %v1930_v48, 16 }
 0x1ab   : > { %v1000_v62 = vsel %vm4798_vm8, %v992_v49, %v999_v56  ;;  %v1182_v63 = vsel %vm4756_vm2, %v1001_v57, %v1181_v50  ;;  %v758_v0 = vpack.c.bf16 %v615_v58, %v615_v58  ;;  %v2196_v1 = vsel %vm1599_vm10, %v2194_v51, %v2195_v59  ;;  %v1191_v50 = vld [vmem:[#allocation2 + $0xc0] sm:$0xf] }
 0x1ac   : > { %1180 = vst.msk [vmem:[#allocation2 + $0xac] sm:$0xf] %vm619_vm5, %v1000_v62  ;;  %2230 = vrot.lane.b32.xlu1 %v2196_v1, %s4583_s20  ;;  %v2088_v2 = vrot.slane %v2086_v61, 1  ;;  %v4370_v62 = vld [vmem:[%s5993_s2 + $0x40] sm:$0xff]  ;;  %v1200_v1 = vld [vmem:[#allocation2 + $0x8] sm:$0x1] }
 0x1ad   : > { %1183 = vst [vmem:[#allocation2 + $0xb0] sm:$0x1] %v1182_v63  ;;  %v1003_v3 = vshrl.u32 %v758_v0, 16  ;;  %v1006_v8 = vshll.u32 %v758_v0, 16  ;;  %2389 = vmatpush.bf16.msrb.mxu0 %v4370_v62  ;;  %4409 = vmatpush.bf16.msra.mxu2 %v4370_v62 }
 0x1ae   : > { %v2089_v4 = vsel %vm1374_vm9, %v2084_v60, %v2088_v2  ;;  %v579_v5 = vpop.f32.mrf.mxu0  ;;  %4410 = vmatpush.bf16.msra.mxu3 %v4370_v62  ;;  %4408 = vmatpush.bf16.msra.mxu1 %v4370_v62 }
 0x1af   : > { %v1005_v7 = vrot.slane %v1003_v3, 7  ;;  %2150 = vrot.lane.b32.xlu0 %v2089_v4, %s4582_s18  ;;  %v580_v9 = vadd.f32 %v5018_v47, %v579_v5 }
 0x1b1   : > { %v1008_v12 = vor.u32 %v1006_v8, %v1005_v7  ;;  %v616_v13 = vmax.f32 %v580_v9, 0.0  ;;  %v1009_v30 = vrot.slane %v1005_v7, 4 }
 0x1b3   : > { %v1185_v14 = vsel %vm4787_vm6, %v1008_v12, %v1184_v11  ;;  %v759_v16 = vpack.c.bf16 %v616_v13, %v616_v13  ;;  %v5039_v17 = vld [vmem:[#allocation2 + $0xa8] sm:$0xff]  ;;  %v5067_v12 = vld [vmem:[#allocation2] sm:$0xff]  ;;  %v1342_v13 = vunpack.c.l.b16 %v1200_v1 }
 0x1b4   : > { %1186 = vst [vmem:[#allocation2 + $0xb4] sm:$0xf] %v1185_v14  ;;  %v1799_v19 = vld [vmem:[#allocation2 + $0xb0] sm:$0x1]  ;;  %v2093_v23 = vshll.u32 %v5039_v17, 16  ;;  %v2091_v32 = vshrl.u32 %v5039_v17, 16 }
 0x1b5   : > { %v1011_v20 = vshrl.u32 %v759_v16, 16  ;;  %v1915_v21 = vunpack.c.l.b16 %v1799_v19  ;;  %v1014_v26 = vshll.u32 %v759_v16, 16 }
 0x1b6   : > { %v582_v22 = vpop.f32.mrf.mxu0  ;;  %v2095_v33 = vrot.slane %v2093_v23, 1  ;;  %v5079_v23 = vpack.c.b16 %v1342_v13, %v1342_v13 }
 0x1b7   : > { %v1013_v24 = vrot.slane %v1011_v20, 7  ;;  %v583_v28 = vadd.f32 %v5018_v47, %v582_v22  ;;  %v5045_v29 = vpack.c.b16 %v1915_v21, %v1915_v21  ;;  %v1378_v22 = vshll.u32 %v5067_v12, 16 }
 0x1b8   : > { %v2096_v25 = vor.u32 %v2095_v33, %v2091_v32  ;;  %v2197_v32 = vrot.slane %v5039_v17, 1 }
 0x1b9   : > { %v1016_v34 = vor.u32 %v1014_v26, %v1013_v24  ;;  %v1018_v36 = vrot.slane %v1013_v24, 4  ;;  %v617_v37 = vmax.f32 %v583_v28, 0.0  ;;  %v2098_v38 = vshll.u32 %v5045_v29, 16  ;;  %v4369_v24 = vld [vmem:[%s5993_s2 + $0x38] sm:$0xff] }
 0x1ba   : > { %v2198_v15 = vrot.slane %v5045_v29, 1  ;;  %v1376_v26 = vshrl.u32 %v5067_v12, 16  ;;  %v1380_v28 = vrot.slane %v1378_v22, 1  ;;  %4412 = vmatpush.bf16.msra.mxu2 %v4369_v24  ;;  %2390 = vmatpush.bf16.msrb.mxu0 %v4369_v24 }
 0x1bb   : > { %v1017_v40 = vsel %vm4798_vm8, %v1009_v30, %v1016_v34  ;;  %v1189_v41 = vsel %vm4756_vm2, %v1018_v36, %v1188_v31  ;;  %v760_v42 = vpack.c.bf16 %v617_v37, %v617_v37  ;;  %v2100_v43 = vrot.slane %v2098_v38, 1  ;;  %v5086_v30 = vld [vmem:[#allocation2 + $0x18] sm:$0xff]  ;;  %4413 = vmatpush.bf16.msra.mxu3 %v4369_v24  ;;  %4411 = vmatpush.bf16.msra.mxu1 %v4369_v24 }
 0x1bc   : > { %1187 = vst.msk [vmem:[#allocation2 + $0xb8] sm:$0xf] %vm619_vm5, %v1017_v40  ;;  %v2775_v31 = vunpack.c.l.b16 %v2633_v53  ;;  %v1383_v34 = vshll.u32 %v5079_v23, 16  ;;  %v2199_v29 = vsel %vm1599_vm10, %v2197_v32, %v2198_v15 }
 0x1bd   : > { %1190 = vst [vmem:[#allocation2 + $0xbc] sm:$0x1] %v1189_v41  ;;  %v1020_v44 = vshrl.u32 %v760_v42, 16  ;;  %v2101_v45 = vsel %vm1374_vm9, %v2096_v25, %v2100_v43  ;;  %v1023_v48 = vshll.u32 %v760_v42, 16  ;;  %v1381_v25 = vor.u32 %v1380_v28, %v1376_v26  ;;  %v4368_v42 = vld [vmem:[%s5993_s2 + $0x30] sm:$0xff] }
 0x1be   : > { %2152 = vrot.lane.b32.xlu1 %v2101_v45, %s4582_s18  ;;  %v584_v46 = vpop.f32.mrf.mxu0  ;;  %v2791_v40 = vpack.c.b16 %v2775_v31, %v2775_v31  ;;  %v2810_v41 = vshll.u32 %v5086_v30, 16  ;;  %4415 = vmatpush.bf16.msra.mxu2 %v4368_v42 }
 0x1bf   : > { %v1022_v18 = vrot.slane %v1020_v44, 7  ;;  %v585_v49 = vadd.f32 %v5018_v47, %v584_v46  ;;  %v1385_v44 = vrot.slane %v1383_v34, 1  ;;  %2391 = vmatpush.bf16.msrb.mxu0 %v4368_v42  ;;  %4416 = vmatpush.bf16.msra.mxu3 %v4368_v42 }
 0x1c0   : > { %4414 = vmatpush.bf16.msra.mxu1 %v4368_v42 }
 0x1c1   : > { %v1025_v51 = vor.u32 %v1023_v48, %v1022_v18  ;;  %v618_v54 = vmax.f32 %v585_v49, 0.0  ;;  %v1026_v2 = vrot.slane %v1022_v18, 4 }
 0x1c3   : > { %v1192_v55 = vsel %vm4787_vm6, %v1025_v51, %v1191_v50  ;;  %v761_v56 = vpack.c.bf16 %v618_v54, %v618_v54  ;;  %v5059_v57 = vld [vmem:[#allocation2 + $0xb4] sm:$0xff]  ;;  %v2812_v51 = vrot.slane %v2810_v41, 1 }
 0x1c4   : > { %1193 = vst [vmem:[#allocation2 + $0xc0] sm:$0xf] %v1192_v55  ;;  %v1802_v58 = vld [vmem:[#allocation2 + $0xbc] sm:$0x1]  ;;  %v2105_v61 = vshll.u32 %v5059_v57, 16  ;;  %v2200_v3 = vrot.slane %v5059_v57, 1 }
 0x1c5   : > { %v1028_v59 = vshrl.u32 %v761_v56, 16  ;;  %v1916_v60 = vunpack.c.l.b16 %v1802_v58  ;;  %v1031_v63 = vshll.u32 %v761_v56, 16  ;;  %v2103_v4 = vshrl.u32 %v5059_v57, 16  ;;  %v1760_v54 = vld [vmem:[#allocation2 + $0x14] sm:$0x1] }
 0x1c6   : > { %v2107_v5 = vrot.slane %v2105_v61, 1  ;;  %v1203_v55 = vld [vmem:[#allocation2 + $0x14] sm:$0x1]  ;;  %v1386_v58 = vsel %vm1374_vm9, %v1381_v25, %v1385_v44  ;;  %v5104_v61 = vld [vmem:[#allocation2 + $0xc] sm:$0xff]  ;;  %v1763_v25 = vld [vmem:[#allocation2 + $0x20] sm:$0x1] }
 0x1c7   : > { %v1030_v47 = vrot.slane %v1028_v59, 7  ;;  %v1932_v0 = vpack.c.b16 %v1916_v60, %v1916_v60  ;;  %v2815_v60 = vshll.u32 %v2791_v40, 16  ;;  %v1343_v1 = vunpack.c.l.b16 %v1203_v55  ;;  %v5131_v44 = vld [vmem:[#allocation2 + $0x18] sm:$0xff] }
 0x1c8   : > { %v2108_v11 = vor.u32 %v2107_v5, %v2103_v4  ;;  %v1601_v4 = vrot.slane %v5079_v23, 1  ;;  %v1937_v5 = vshll.u32 %v5104_v61, 16  ;;  %v1935_v24 = vshrl.u32 %v5104_v61, 16 }
 0x1c9   : > { %v1033_v7 = vor.u32 %v1031_v63, %v1030_v47  ;;  %v1035_v8 = vrot.slane %v1030_v47, 4  ;;  %v2201_v9 = vrot.slane %v1932_v0, 1  ;;  %v2110_v10 = vshll.u32 %v1932_v0, 16  ;;  %v5108_v0 = vld [vmem:[#allocation2 + $0xc] sm:$0xff] }
 0x1ca   : > { %v2808_v47 = vshrl.u32 %v5086_v30, 16  ;;  %v1902_v63 = vunpack.c.l.b16 %v1760_v54  ;;  %v1388_v28 = vshrl.u32 %v5108_v0, 16  ;;  %v2158_v34 = vrot.slane %v5104_v61, 1 }
 0x1cb   : > { %v1034_v14 = vsel %vm4798_vm8, %v1026_v2, %v1033_v7  ;;  %v1196_v16 = vsel %vm4756_vm2, %v1035_v8, %v1195_v39  ;;  %v2202_v19 = vsel %vm1599_vm10, %v2200_v3, %v2201_v9  ;;  %v2112_v20 = vrot.slane %v2110_v10, 1  ;;  %v2636_v7 = vld [vmem:[#allocation2 + $0x2c] sm:$0x1] }
 0x1cc   : > { %1194 = vst.msk [vmem:[#allocation2 + $0xc4] sm:$0xf] %vm619_vm5, %v1034_v14  ;;  %2234 = vrot.lane.b32.xlu0 %v2202_v19, %s4583_s20  ;;  %v2813_v2 = vor.u32 %v2812_v51, %v2808_v47  ;;  %v2817_v39 = vrot.slane %v2815_v60, 1  ;;  %v1600_v3 = vrot.slane %v5067_v12, 1  ;;  %v3032_v8 = vrot.slane %v2791_v40, 1  ;;  %v5119_v19 = vld [vmem:[#allocation2 + $0x24] sm:$0xff] }
 0x1cd   : > { %1197 = vst [vmem:[#allocation2 + $0xc8] sm:$0x1] %v1196_v16  ;;  %v2113_v21 = vsel %vm1374_vm9, %v2108_v11, %v2112_v20  ;;  %v1918_v9 = vpack.c.b16 %v1902_v63, %v1902_v63  ;;  %v1359_v10 = vpack.c.b16 %v1343_v1, %v1343_v1  ;;  %v1390_v11 = vshll.u32 %v5108_v0, 16  ;;  %v1206_v40 = vld [vmem:[#allocation2 + $0x20] sm:$0x1]  ;;  %v4351_v51 = vld [vmem:[%s5993_s2 + $0x28] sm:$0xff] }
 0x1ce   : > { %2154 = vrot.lane.b32.xlu2 %v2113_v21, %s4582_s18  ;;  %v2818_v13 = vsel %vm1374_vm9, %v2813_v2, %v2817_v39  ;;  %v1602_v14 = vsel %vm1599_vm10, %v1600_v3, %v1601_v4  ;;  %v3031_v16 = vrot.slane %v5086_v30, 1  ;;  %v2776_v20 = vunpack.c.l.b16 %v2636_v7  ;;  %2543 = vmatpush.bf16.msrb.mxu2 %v4351_v51  ;;  %v5150_v4 = vld [vmem:[#allocation2 + $0x30] sm:$0xff] }
 0x1cf   : > { %v1939_v21 = vrot.slane %v1937_v5, 1  ;;  %v1942_v23 = vshll.u32 %v1918_v9, 16  ;;  %v1392_v53 = vrot.slane %v1390_v11, 1  ;;  %v1395_v15 = vshll.u32 %v1359_v10, 16 }
 0x1d0   : > { %v3033_v22 = vsel %vm1599_vm10, %v3031_v16, %v3032_v8  ;;  %v2159_v26 = vrot.slane %v1918_v9, 1  ;;  %v2792_v31 = vpack.c.b16 %v2776_v20, %v2776_v20  ;;  %v2822_v32 = vshll.u32 %v5119_v19, 16 }
 0x1d1   : > { %v1949_v60 = vshll.u32 %v5131_v44, 16  ;;  %v1603_v2 = vrot.slane %v5108_v0, 1  ;;  %v3034_v3 = vrot.slane %v5119_v19, 1  ;;  %v1947_v16 = vshrl.u32 %v5131_v44, 16 }
 0x1d2   : > { %v2160_v41 = vsel %vm1599_vm10, %v2158_v34, %v2159_v26  ;;  %v2824_v42 = vrot.slane %v2822_v32, 1  ;;  %v3035_v47 = vrot.slane %v2792_v31, 1  ;;  %v1766_v34 = vld [vmem:[#allocation2 + $0x2c] sm:$0x1] }
 0x1d3   : > { %v5089_v33 = vld [vmem:[#allocation2 + $0xc0] sm:$0xff]  ;;  %v1951_v8 = vrot.slane %v1949_v60, 1 }
 0x1d4   : > { %v1805_v36 = vld [vmem:[#allocation2 + $0xc8] sm:$0x1]  ;;  %v2117_v38 = vshll.u32 %v5089_v33, 16  ;;  %v2115_v45 = vshrl.u32 %v5089_v33, 16  ;;  %v2203_v18 = vrot.slane %v5089_v33, 1 }
 0x1d5   : > { %v1917_v37 = vunpack.c.l.b16 %v1805_v36  ;;  %v1940_v36 = vor.u32 %v1939_v21, %v1935_v24 }
 0x1d6   : > { %2232 = vrot.lane.b32.xlu2 %v2199_v29, %s4583_s20  ;;  %v2119_v46 = vrot.slane %v2117_v38, 1  ;;  %v1944_v29 = vrot.slane %v1942_v23, 1  ;;  %v1397_v38 = vrot.slane %v1395_v15, 1  ;;  %v1952_v15 = vor.u32 %v1951_v8, %v1947_v16 }
 0x1d7   : > { %v1933_v43 = vpack.c.b16 %v1917_v37, %v1917_v37  ;;  %v1393_v37 = vor.u32 %v1392_v53, %v1388_v28  ;;  %v2161_v28 = vrot.slane %v5131_v44, 1 }
 0x1d8   : > { %v2120_v49 = vor.u32 %v2119_v46, %v2115_v45  ;;  %v1903_v45 = vunpack.c.l.b16 %v1763_v25  ;;  %v1945_v46 = vsel %vm1374_vm9, %v1940_v36, %v1944_v29  ;;  %v1209_v36 = vld [vmem:[#allocation2 + $0x2c] sm:$0x1]  ;;  %v5169_v25 = vld [vmem:[#allocation2 + $0x24] sm:$0xff] }
 0x1d9   : > { %v2204_v48 = vrot.slane %v1933_v43, 1  ;;  %v2122_v50 = vshll.u32 %v1933_v43, 16  ;;  %v2827_v43 = vshll.u32 %v2792_v31, 16 }
 0x1db   : > { %v2205_v56 = vsel %vm1599_vm10, %v2203_v18, %v2204_v48  ;;  %v2124_v59 = vrot.slane %v2122_v50, 1  ;;  %v1398_v18 = vsel %vm1374_vm9, %v1393_v37, %v1397_v38  ;;  %v2820_v48 = vshrl.u32 %v5119_v19, 16 }
 0x1dc   : > { %2236 = vrot.lane.b32.xlu1 %v2205_v56, %s4583_s20  ;;  %v1344_v50 = vunpack.c.l.b16 %v1206_v40  ;;  %v2829_v55 = vrot.slane %v2827_v43, 1  ;;  %v5173_v43 = vld [vmem:[#allocation2 + $0x24] sm:$0xff] }
 0x1dd   : > { %v2125_v62 = vsel %vm1374_vm9, %v2120_v49, %v2124_v59  ;;  %v5136_v49 = vld [vmem:[#allocation2 + $0x18] sm:$0xff]  ;;  %v2825_v54 = vor.u32 %v2824_v42, %v2820_v48  ;;  %v1919_v59 = vpack.c.b16 %v1903_v45, %v1903_v45  ;;  %v1904_v42 = vunpack.c.l.b16 %v1766_v34 }
 0x1de   : > { %1567 = vrot.lane.b32.xlu2 %v1386_v58, %s4582_s18  ;;  %2156 = vrot.lane.b32.xlu0 %v2125_v62, %s4582_s18  ;;  %v1604_v58 = vrot.slane %v1359_v10, 1  ;;  %v2639_v62 = vld [vmem:[#allocation2 + $0x38] sm:$0x1]  ;;  %v5144_v63 = vpack.c.b16 %v1344_v50, %v1344_v50  ;;  %v1402_v1 = vshll.u32 %v5136_v49, 16  ;;  %v3036_v10 = vsel %vm1599_vm10, %v3034_v3, %v3035_v47 }
 0x1df   : > { %v2830_v39 = vsel %vm1374_vm9, %v2825_v54, %v2829_v55  ;;  %v2777_v5 = vunpack.c.l.b16 %v2639_v62  ;;  %v1954_v9 = vshll.u32 %v1919_v59, 16  ;;  %v1400_v20 = vshrl.u32 %v5136_v49, 16  ;;  %v2642_v55 = vld [vmem:[#allocation2 + $0x44] sm:$0x1] }
 0x1e0   : > { %v1605_v7 = vsel %vm1599_vm10, %v1603_v2, %v1604_v58  ;;  %v1404_v11 = vrot.slane %v1402_v1, 1  ;;  %v1345_v45 = vunpack.c.l.b16 %v1209_v36  ;;  %v1607_v51 = vrot.slane %v5144_v63, 1  ;;  %v5188_v2 = vld [vmem:[#allocation2 + $0x3c] sm:$0xff]  ;;  %v5209_v36 = vld [vmem:[#allocation2 + $0x30] sm:$0xff] }
 0x1e1   : > { %v2793_v21 = vpack.c.b16 %v2777_v5, %v2777_v5  ;;  %v1956_v24 = vrot.slane %v1954_v9, 1  ;;  %v1961_v54 = vshll.u32 %v5169_v25, 16  ;;  %v1920_v58 = vpack.c.b16 %v1904_v42, %v1904_v42 }
 0x1e2   : > { %v1405_v31 = vor.u32 %v1404_v11, %v1400_v20  ;;  %v1414_v60 = vshll.u32 %v5173_v43, 16  ;;  %v1606_v62 = vrot.slane %v5136_v49, 1  ;;  %v3037_v1 = vrot.slane %v5150_v4, 1 }
 0x1e3   : > { %v2839_v38 = vshll.u32 %v2793_v21, 16  ;;  %v1963_v3 = vrot.slane %v1961_v54, 1  ;;  %v1959_v49 = vshrl.u32 %v5169_v25, 16  ;;  %v2164_v20 = vrot.slane %v5169_v25, 1 }
 0x1e4   : > { %2999 = vrot.lane.b32.xlu1 %v2818_v13, %s4582_s18  ;;  %v1407_v13 = vshll.u32 %v5144_v63, 16  ;;  %v1608_v63 = vsel %vm1599_vm10, %v1606_v62, %v1607_v51  ;;  %v1416_v8 = vrot.slane %v1414_v60, 1  ;;  %v3040_v60 = vrot.slane %v5188_v2, 1  ;;  %v5226_v62 = vld [vmem:[#allocation2 + $0x48] sm:$0xff] }
 0x1e5   : > { %v2841_v48 = vrot.slane %v2839_v38, 1 }
 0x1e6   : > { %1648 = vrot.lane.b32.xlu0 %v1602_v14, %s4583_s20  ;;  %3079 = vrot.lane.b32.xlu2 %v3033_v22, %s4583_s20  ;;  %v2162_v14 = vrot.slane %v1919_v59, 1  ;;  %v2834_v22 = vshll.u32 %v5150_v4, 16  ;;  %v1409_v32 = vrot.slane %v1407_v13, 1  ;;  %v5182_v59 = vpack.c.b16 %v1345_v45, %v1345_v45 }
 0x1e7   : > { %v2846_v13 = vshll.u32 %v5188_v2, 16 }
 0x1e8   : > { %v2163_v29 = vsel %vm1599_vm10, %v2161_v28, %v2162_v14  ;;  %v2836_v37 = vrot.slane %v2834_v22, 1  ;;  %v1410_v40 = vsel %vm1374_vm9, %v1405_v31, %v1409_v32  ;;  %v1419_v9 = vshll.u32 %v5182_v59, 16  ;;  %v4349_v28 = vld [vmem:[%s5993_s2 + $0x18] sm:$0xff] }
 0x1ec   : > { %2206 = vrot.lane.b32.xlu1 %v2160_v41, %s4583_s20  ;;  %v2832_v41 = vshrl.u32 %v5150_v4, 16  ;;  %v2165_v4 = vrot.slane %v1920_v58, 1 }
 0x1ee   : > { %2126 = vrot.lane.b32.xlu0 %v1945_v46, %s4582_s18  ;;  %1569 = vrot.lane.b32.xlu2 %v1398_v18, %s4582_s18  ;;  %v4350_v46 = vld [vmem:[%s5993_s2 + $0x20] sm:$0xff]  ;;  %v2837_v18 = vor.u32 %v2836_v37, %v2832_v41  ;;  %v2166_v31 = vsel %vm1599_vm10, %v2164_v20, %v2165_v4 }
 0x1ef   : > { %2544 = vmatpush.bf16.msrb.mxu2 %v4350_v46 }
 0x1f0   : > { %v2145_v56 = vpop.permute.xlu0 %2144  ;;  %v2842_v47 = vsel %vm1374_vm9, %v2837_v18, %v2841_v48  ;;  %v1973_v18 = vshll.u32 %v5209_v36, 16  ;;  %v2645_v48 = vld [vmem:[#allocation2 + $0x50] sm:$0x1] }
 0x1f1   : > { %v2257_v23 = vsel %vm1680_vm11, %v4938_v27, %v2145_v56  ;;  %v1957_v27 = vsel %vm1374_vm9, %v1952_v15, %v1956_v24  ;;  %v3038_v56 = vrot.slane %v2793_v21, 1  ;;  %v1964_v21 = vor.u32 %v1963_v3, %v1959_v49  ;;  %v1769_v24 = vld [vmem:[#allocation2 + $0x38] sm:$0x1] }
 0x1f2   : > { %v1421_v15 = vrot.slane %v1419_v9, 1  ;;  %v2858_v49 = vshll.u32 %v5226_v62, 16 }
 0x1f3   : > { %v3039_v5 = vsel %vm1599_vm10, %v3037_v1, %v3038_v56  ;;  %2545 = vmatpush.bf16.msrb.mxu2 %v4349_v28  ;;  %v1975_v1 = vrot.slane %v1973_v18, 1 }
 0x1f4   : > { %3001 = vrot.lane.b32.xlu1 %v2830_v39, %s4582_s18  ;;  %v2778_v39 = vunpack.c.l.b16 %v2642_v55 }
 0x1f6   : > { %1650 = vrot.lane.b32.xlu0 %v1605_v7, %s4583_s20  ;;  %3081 = vrot.lane.b32.xlu2 %v3036_v10, %s4583_s20  ;;  %v1966_v7 = vshll.u32 %v1920_v58, 16  ;;  %v1412_v10 = vshrl.u32 %v5173_v43, 16  ;;  %v2794_v11 = vpack.c.b16 %v2778_v39, %v2778_v39  ;;  %v1609_v58 = vrot.slane %v5173_v43, 1 }
 0x1f7   : > { %v1971_v43 = vshrl.u32 %v5209_v36, 16 }
 0x1f8   : > { %v2225_v53 = vpop.permute.xlu0 %2224  ;;  %v2851_v32 = vshll.u32 %v2794_v11, 16  ;;  %v2149_v34 = vpop.permute.xlu2 %2148  ;;  %v3041_v51 = vrot.slane %v2794_v11, 1 }
 0x1f9   : > { %v2289_v26 = vsel %vm1713_vm12, %v2257_v23, %v2225_v53  ;;  %v1968_v23 = vrot.slane %v1966_v7, 1  ;;  %v1417_v53 = vor.u32 %v1416_v8, %v1412_v10  ;;  %v2261_v4 = vsel %vm1680_vm11, %v4983_v52, %v2149_v34 }
 0x1fa   : > { %4113 = vmatmul.msk.bf16.vlgmr.msra.gmra.mxu2 %vm2351_vm13, %v2289_v26  ;;  %v1212_v26 = vld [vmem:[#allocation2 + $0x38] sm:$0x1]  ;;  %v2853_v45 = vrot.slane %v2851_v32, 1  ;;  %v1976_v10 = vor.u32 %v1975_v1, %v1971_v43  ;;  %v5252_v32 = vld [vmem:[#allocation2 + $0x3c] sm:$0xff] }
 0x1fb   : > { %v1969_v37 = vsel %vm1374_vm9, %v1964_v21, %v1968_v23  ;;  %v1422_v38 = vsel %vm1374_vm9, %v1417_v53, %v1421_v15  ;;  %v1346_v41 = vunpack.c.l.b16 %v1212_v26  ;;  %v4348_v21 = vld [vmem:[%s5993_s2 + $0x10] sm:$0xff]  ;;  %v1215_v23 = vld [vmem:[#allocation2 + $0x44] sm:$0x1]  ;;  %v2860_v15 = vrot.slane %v2858_v49, 1  ;;  %v5248_v26 = vld [vmem:[#allocation2 + $0x3c] sm:$0xff] }
 0x1fc   : > { %2208 = vrot.lane.b32.xlu1 %v2163_v29, %s4583_s20  ;;  %v1905_v29 = vunpack.c.l.b16 %v1769_v24  ;;  %2546 = vmatpush.bf16.msrb.mxu2 %v4348_v21  ;;  %v1347_v34 = vunpack.c.l.b16 %v1215_v23 }
 0x1fd   : > { %v5220_v54 = vpack.c.b16 %v1346_v41, %v1346_v41  ;;  %v2648_v41 = vld [vmem:[#allocation2 + $0x5c] sm:$0x1] }
 0x1fe   : > { %2128 = vrot.lane.b32.xlu0 %v1957_v27, %s4582_s18  ;;  %1571 = vrot.lane.b32.xlu2 %v1410_v40, %s4582_s18  ;;  %v2844_v27 = vshrl.u32 %v5188_v2, 16  ;;  %v5214_v40 = vld [vmem:[#allocation2 + $0x30] sm:$0xff]  ;;  %v1921_v46 = vpack.c.b16 %v1905_v29, %v1905_v29  ;;  %v5261_v18 = vpack.c.b16 %v1347_v34, %v1347_v34 }
 0x1ff   : > { %v1426_v55 = vshll.u32 %v5214_v40, 16  ;;  %v1424_v8 = vshrl.u32 %v5214_v40, 16 }
 0x200   : > { %v2147_v50 = vpop.permute.xlu1 %2146  ;;  %v1978_v39 = vshll.u32 %v1921_v46, 16  ;;  %v2229_v7 = vpop.permute.xlu2 %2228  ;;  %v2168_v2 = vrot.slane %v1921_v46, 1 }
 0x201   : > { %v2259_v14 = vsel %vm1680_vm11, %v4961_v6, %v2147_v50  ;;  %v2848_v6 = vrot.slane %v2846_v13, 1  ;;  %v1610_v50 = vrot.slane %v5182_v59, 1  ;;  %v1428_v3 = vrot.slane %v1426_v55, 1 }
 0x202   : > { %v1980_v11 = vrot.slane %v1978_v39, 1  ;;  %v2293_v13 = vsel %vm1713_vm12, %v2261_v4, %v2229_v7  ;;  %v1436_v7 = vshrl.u32 %v5252_v32, 16 }
 0x203   : > { %v2849_v42 = vor.u32 %v2848_v6, %v2844_v27  ;;  %v1611_v59 = vsel %vm1599_vm10, %v1609_v58, %v1610_v50  ;;  %v1985_v27 = vshll.u32 %v5248_v26, 16  ;;  %v1612_v50 = vrot.slane %v5214_v40, 1 }
 0x204   : > { %3003 = vrot.lane.b32.xlu1 %v2842_v47, %s4582_s18  ;;  %v2779_v47 = vunpack.c.l.b16 %v2645_v48  ;;  %v1981_v24 = vsel %vm1374_vm9, %v1976_v10, %v1980_v11  ;;  %v1438_v48 = vshll.u32 %v5252_v32, 16  ;;  %v2780_v58 = vunpack.c.l.b16 %v2648_v41 }
 0x205   : > { %v2854_v56 = vsel %vm1374_vm9, %v2849_v42, %v2853_v45  ;;  %v4395_v42 = vld [vmem:[%s5993_s2 + $0x88] sm:$0xff]  ;;  %v1443_v40 = vshll.u32 %v5261_v18, 16 }
 0x206   : > { %1652 = vrot.lane.b32.xlu0 %v1608_v63, %s4583_s20  ;;  %3083 = vrot.lane.b32.xlu2 %v3039_v5, %s4583_s20  ;;  %v3042_v63 = vsel %vm1599_vm10, %v3040_v60, %v3041_v51  ;;  %v1431_v5 = vshll.u32 %v5220_v54, 16  ;;  %v2795_v9 = vpack.c.b16 %v2779_v47, %v2779_v47  ;;  %v1987_v47 = vrot.slane %v1985_v27, 1 }
 0x207   : > { %3258 = vmatpush.bf16.msrb.mxu3 %v4395_v42  ;;  %v2796_v43 = vpack.c.b16 %v2780_v58, %v2780_v58  ;;  %v2651_v42 = vld [vmem:[#allocation2 + $0x68] sm:$0x1] }
 0x208   : > { %v2227_v16 = vpop.permute.xlu1 %2226  ;;  %v1433_v20 = vrot.slane %v1431_v5, 1  ;;  %v2863_v52 = vshll.u32 %v2795_v9, 16  ;;  %v3044_v45 = vrot.slane %v2795_v9, 1 }
 0x209   : > { %v2291_v22 = vsel %vm1713_vm12, %v2259_v14, %v2227_v16  ;;  %v2167_v14 = vrot.slane %v5209_v36, 1  ;;  %v1429_v16 = vor.u32 %v1428_v3, %v1424_v8  ;;  %v4347_v3 = vld [vmem:[%s5993_s2 + $0x8] sm:$0xff]  ;;  %v2875_v23 = vshll.u32 %v2796_v43, 16 }
 0x20a   : > { %4114 = vmatmul.msk.bf16.gmra.mxu2 %vm2351_vm13, %v2291_v22  ;;  %v1772_v22 = vld [vmem:[#allocation2 + $0x44] sm:$0x1] }
 0x20b   : > { %v2169_v53 = vsel %vm1599_vm10, %v2167_v14, %v2168_v2  ;;  %v1434_v28 = vsel %vm1374_vm9, %v1429_v16, %v1433_v20  ;;  %v1906_v6 = vunpack.c.l.b16 %v1772_v22  ;;  %2547 = vmatpush.bf16.msrb.mxu2 %v4347_v3  ;;  %v1775_v14 = vld [vmem:[#allocation2 + $0x50] sm:$0x1]  ;;  %v4394_v16 = vld [vmem:[%s5993_s2 + $0x80] sm:$0xff] }
 0x20c   : > { %2210 = vrot.lane.b32.xlu1 %v2166_v31, %s4583_s20  ;;  %v2856_v31 = vshrl.u32 %v5226_v62, 16  ;;  %v1218_v20 = vld [vmem:[#allocation2 + $0x50] sm:$0x1]  ;;  %3259 = vmatpush.bf16.msrb.mxu3 %v4394_v16  ;;  %v1221_v16 = vld [vmem:[#allocation2 + $0x5c] sm:$0x1] }
 0x20d   : > { %v1922_v46 = vpack.c.b16 %v1906_v6, %v1906_v6  ;;  %v5301_v6 = vld [vmem:[#allocation2 + $0x48] sm:$0xff]  ;;  %v1348_v34 = vunpack.c.l.b16 %v1218_v20 }
 0x20e   : > { %2130 = vrot.lane.b32.xlu0 %v1969_v37, %s4582_s18  ;;  %1573 = vrot.lane.b32.xlu2 %v1422_v38, %s4582_s18  ;;  %v2861_v29 = vor.u32 %v2860_v15, %v2856_v31  ;;  %v2865_v37 = vrot.slane %v2863_v52, 1  ;;  %v1613_v38 = vrot.slane %v5220_v54, 1  ;;  %v3043_v54 = vrot.slane %v5226_v62, 1  ;;  %v4393_v52 = vld [vmem:[%s5993_s2 + $0x78] sm:$0xff] }
 0x20f   : > { %v1990_v39 = vshll.u32 %v1922_v46, 16  ;;  %v1983_v62 = vshrl.u32 %v5248_v26, 16  ;;  %v2171_v5 = vrot.slane %v1922_v46, 1  ;;  %v1907_v15 = vunpack.c.l.b16 %v1775_v14  ;;  %v1778_v14 = vld [vmem:[#allocation2 + $0x5c] sm:$0x1] }
 0x210   : > { %v2866_v55 = vsel %vm1374_vm9, %v2861_v29, %v2865_v37  ;;  %v1614_v60 = vsel %vm1599_vm10, %v1612_v50, %v1613_v38  ;;  %v3045_v1 = vsel %vm1599_vm10, %v3043_v54, %v3044_v45  ;;  %v2877_v37 = vrot.slane %v2875_v23, 1  ;;  %3260 = vmatpush.bf16.msrb.mxu3 %v4393_v52  ;;  %v4390_v52 = vld [vmem:[%s5993_s2 + $0x60] sm:$0xff] }
 0x211   : > { %v1988_v49 = vor.u32 %v1987_v47, %v1983_v62  ;;  %v1992_v10 = vrot.slane %v1990_v39, 1  ;;  %v1923_v27 = vpack.c.b16 %v1907_v15, %v1907_v15  ;;  %v1616_v45 = vrot.slane %v5261_v18, 1  ;;  %v4346_v18 = vld [vmem:[%s5993_s2] sm:$0xff]  ;;  %v5343_v15 = vld [vmem:[#allocation2 + $0x54] sm:$0xff] }
 0x212   : > { %v3047_v46 = vrot.slane %v2796_v43, 1  ;;  %v1450_v50 = vshll.u32 %v5301_v6, 16  ;;  %v1615_v54 = vrot.slane %v5252_v32, 1  ;;  %v2781_v47 = vunpack.c.l.b16 %v2651_v42  ;;  %2548 = vmatpush.bf16.msrb.mxu2 %v4346_v18  ;;  %v5369_v18 = vld [vmem:[#allocation2 + $0x6c] sm:$0xff] }
 0x214   : > { %3005 = vrot.lane.b32.xlu1 %v2854_v56, %s4582_s18  ;;  %v5267_v56 = vld [vmem:[#allocation2 + $0x54] sm:$0xff]  ;;  %v2797_v43 = vpack.c.b16 %v2781_v47, %v2781_v47 }
 0x215   : > { %v2870_v2 = vshll.u32 %v5267_v56, 16  ;;  %v2868_v31 = vshrl.u32 %v5267_v56, 16  ;;  %v3046_v58 = vrot.slane %v5267_v56, 1  ;;  %v1452_v56 = vrot.slane %v1450_v50, 1 }
 0x216   : > { %1654 = vrot.lane.b32.xlu0 %v1611_v59, %s4583_s20  ;;  %3085 = vrot.lane.b32.xlu2 %v3042_v63, %s4583_s20  ;;  %v1440_v59 = vrot.slane %v1438_v48, 1  ;;  %v5307_v48 = vpack.c.b16 %v1348_v34, %v1348_v34  ;;  %v5350_v34 = vld [vmem:[#allocation2 + $0x54] sm:$0xff]  ;;  %v2009_v50 = vshll.u32 %v5343_v15, 16 }
 0x217   : > { %v2872_v22 = vrot.slane %v2870_v2, 1  ;;  %v3048_v32 = vsel %vm1599_vm10, %v3046_v58, %v3047_v46  ;;  %v1618_v58 = vrot.slane %v5301_v6, 1 }
 0x218   : > { %v1441_v11 = vor.u32 %v1440_v59, %v1436_v7  ;;  %v2002_v59 = vshll.u32 %v1923_v27, 16  ;;  %v1448_v7 = vshrl.u32 %v5301_v6, 16  ;;  %v1619_v46 = vrot.slane %v5307_v48, 1 }
 0x219   : > { %v2873_v29 = vor.u32 %v2872_v22, %v2868_v31  ;;  %v2887_v22 = vshll.u32 %v2797_v43, 16  ;;  %v1908_v31 = vunpack.c.l.b16 %v1778_v14 }
 0x21a   : > { %4115 = vmatmul.msk.bf16.gmra.mxu2 %vm2351_vm13, %v2293_v13  ;;  %v1445_v13 = vrot.slane %v1443_v40, 1  ;;  %v1617_v40 = vsel %vm1599_vm10, %v1615_v54, %v1616_v45  ;;  %v1462_v54 = vshll.u32 %v5350_v34, 16 }
 0x21b   : > { %v2889_v42 = vrot.slane %v2887_v22, 1 }
 0x21c   : > { %2212 = vrot.lane.b32.xlu1 %v2169_v53, %s4583_s20  ;;  %v5293_v53 = vld [vmem:[#allocation2 + $0x48] sm:$0xff] }
 0x21d   : > { %v1997_v41 = vshll.u32 %v5293_v53, 16  ;;  %v1995_v3 = vshrl.u32 %v5293_v53, 16 }
 0x21e   : > { %2132 = vrot.lane.b32.xlu0 %v1981_v24, %s4582_s18  ;;  %1575 = vrot.lane.b32.xlu2 %v1434_v28, %s4582_s18  ;;  %v2231_v8 = vpop.permute.xlu1 %2230  ;;  %v1993_v24 = vsel %vm1374_vm9, %v1988_v49, %v1992_v10  ;;  %v1446_v28 = vsel %vm1374_vm9, %v1441_v11, %v1445_v13  ;;  %v2004_v49 = vrot.slane %v2002_v59, 1  ;;  %v1453_v10 = vor.u32 %v1452_v56, %v1448_v7  ;;  %v4391_v13 = vld [vmem:[%s5993_s2 + $0x68] sm:$0xff] }
 0x21f   : > { %v1999_v39 = vrot.slane %v1997_v41, 1  ;;  %v2011_v59 = vrot.slane %v2009_v50, 1  ;;  %v1464_v56 = vrot.slane %v1462_v54, 1 }
 0x221   : > { %v2151_v51 = vpop.permute.xlu0 %2150 }
 0x222   : > { %v2263_v63 = vsel %vm1680_vm11, %v5005_v35, %v2151_v51  ;;  %v2170_v35 = vrot.slane %v5248_v26, 1 }
 0x223   : > { %v2295_v4 = vsel %vm1713_vm12, %v2263_v63, %v2231_v8  ;;  %v1455_v63 = vshll.u32 %v5307_v48, 16  ;;  %v1620_v48 = vsel %vm1599_vm10, %v1618_v58, %v1619_v46 }
 0x224   : > { %3007 = vrot.lane.b32.xlu1 %v2866_v55, %s4582_s18  ;;  %v2172_v21 = vsel %vm1599_vm10, %v2170_v35, %v2171_v5  ;;  %v2878_v55 = vsel %vm1374_vm9, %v2873_v29, %v2877_v37  ;;  %v2174_v5 = vrot.slane %v1923_v27, 1  ;;  %v2000_v35 = vor.u32 %v1999_v39, %v1995_v3 }
 0x225   : > { %v1457_v11 = vrot.slane %v1455_v63, 1  ;;  %v1349_v29 = vunpack.c.l.b16 %v1221_v16 }
 0x226   : > { %1656 = vrot.lane.b32.xlu0 %v1614_v60, %s4583_s20  ;;  %3087 = vrot.lane.b32.xlu2 %v3045_v1, %s4583_s20  ;;  %v5313_v60 = vld [vmem:[#allocation2 + $0x60] sm:$0xff]  ;;  %v4392_v1 = vld [vmem:[%s5993_s2 + $0x70] sm:$0xff]  ;;  %v2005_v23 = vsel %vm1374_vm9, %v2000_v35, %v2004_v49  ;;  %v2176_v35 = vrot.slane %v5343_v15, 1 }
 0x227   : > { %3261 = vmatpush.bf16.msrb.mxu3 %v4392_v1  ;;  %v2882_v2 = vshll.u32 %v5313_v60, 16  ;;  %v3049_v1 = vrot.slane %v5313_v60, 1 }
 0x228   : > { %v5283_v9 = vpop.permute.xlu2 %2154 }
 0x229   : > { %v2267_v37 = vsel %vm1680_vm11, %v5059_v57, %v5283_v9  ;;  %v3050_v57 = vrot.slane %v2797_v43, 1  ;;  %v1924_v9 = vpack.c.b16 %v1908_v31, %v1908_v31  ;;  %v2894_v43 = vshll.u32 %v5369_v18, 16 }
 0x22a   : > { %4116 = vmatmul.msk.bf16.gmra.mxu2 %vm2351_vm13, %v2295_v4 }
 0x22b   : > { %3262 = vmatpush.bf16.msrb.mxu3 %v4391_v13  ;;  %v2177_v3 = vrot.slane %v1924_v9, 1  ;;  %v1224_v13 = vld [vmem:[#allocation2 + $0x68] sm:$0x1]  ;;  %v2896_v16 = vrot.slane %v2894_v43, 1 }
 0x22c   : > { %2214 = vrot.lane.b32.xlu1 %v2172_v21, %s4583_s20  ;;  %v2884_v21 = vrot.slane %v2882_v2, 1  ;;  %v1350_v31 = vunpack.c.l.b16 %v1224_v13 }
 0x22d   : > { %v2178_v14 = vsel %vm1599_vm10, %v2176_v35, %v2177_v3 }
 0x22e   : > { %2134 = vrot.lane.b32.xlu0 %v1993_v24, %s4582_s18  ;;  %1577 = vrot.lane.b32.xlu2 %v1446_v28, %s4582_s18  ;;  %v1458_v24 = vsel %vm1374_vm9, %v1453_v10, %v1457_v11  ;;  %v2880_v28 = vshrl.u32 %v5313_v60, 16  ;;  %v1781_v11 = vld [vmem:[#allocation2 + $0x68] sm:$0x1]  ;;  %v5400_v54 = vpack.c.b16 %v1350_v31, %v1350_v31  ;;  %v5429_v31 = vld [vmem:[#allocation2 + $0x6c] sm:$0xff] }
 0x22f   : > { %3263 = vmatpush.bf16.msrb.mxu3 %v4390_v52  ;;  %v1909_v22 = vunpack.c.l.b16 %v1781_v11 }
 0x230   : > { %v2233_v38 = vpop.permute.xlu2 %2232  ;;  %v2153_v51 = vpop.permute.xlu1 %2152  ;;  %v2885_v41 = vor.u32 %v2884_v21, %v2880_v28  ;;  %v5385_v21 = vld [vmem:[#allocation2 + $0x60] sm:$0xff] }
 0x231   : > { %v2265_v62 = vsel %vm1680_vm11, %v5039_v17, %v2153_v51  ;;  %v2173_v17 = vrot.slane %v5293_v53, 1  ;;  %v2654_v51 = vld [vmem:[#allocation2 + $0x74] sm:$0x1]  ;;  %v5390_v28 = vld [vmem:[#allocation2 + $0x60] sm:$0xff]  ;;  %v1925_v46 = vpack.c.b16 %v1909_v22, %v1909_v22  ;;  %v2021_v50 = vshll.u32 %v5385_v21, 16 }
 0x232   : > { %v2297_v4 = vsel %vm1713_vm12, %v2265_v62, %v2233_v38  ;;  %v2890_v47 = vsel %vm1374_vm9, %v2885_v41, %v2889_v42  ;;  %v2782_v39 = vunpack.c.l.b16 %v2654_v51  ;;  %v2007_v62 = vshrl.u32 %v5343_v15, 16  ;;  %v2657_v51 = vld [vmem:[#allocation2 + $0x80] sm:$0x1]  ;;  %v1227_v22 = vld [vmem:[#allocation2 + $0x74] sm:$0x1] }
 0x233   : > { %v2175_v20 = vsel %vm1599_vm10, %v2173_v17, %v2174_v5  ;;  %v1460_v5 = vshrl.u32 %v5350_v34, 16  ;;  %v1474_v58 = vshll.u32 %v5390_v28, 16  ;;  %v2180_v43 = vrot.slane %v1925_v46, 1 }
 0x234   : > { %3009 = vrot.lane.b32.xlu1 %v2878_v55, %s4582_s18  ;;  %v5363_v55 = vpack.c.b16 %v1349_v29, %v1349_v29  ;;  %v2798_v7 = vpack.c.b16 %v2782_v39, %v2782_v39  ;;  %v2012_v49 = vor.u32 %v2011_v59, %v2007_v62  ;;  %v3052_v39 = vrot.slane %v5369_v18, 1 }
 0x235   : > { %v1465_v17 = vor.u32 %v1464_v56, %v1460_v5  ;;  %v2783_v59 = vunpack.c.l.b16 %v2657_v51  ;;  %v2026_v56 = vshll.u32 %v1925_v46, 16  ;;  %v1479_v62 = vshll.u32 %v5400_v54, 16 }
 0x236   : > { %1658 = vrot.lane.b32.xlu0 %v1617_v40, %s4583_s20  ;;  %3089 = vrot.lane.b32.xlu2 %v3048_v32, %s4583_s20  ;;  %v3051_v40 = vsel %vm1599_vm10, %v3049_v1, %v3050_v57  ;;  %v2014_v32 = vshll.u32 %v1924_v9, 16  ;;  %v1467_v63 = vshll.u32 %v5363_v55, 16  ;;  %v1622_v42 = vrot.slane %v5363_v55, 1 }
 0x237   : > { %v3053_v9 = vrot.slane %v2798_v7, 1  ;;  %v1621_v1 = vrot.slane %v5350_v34, 1  ;;  %v1472_v35 = vshrl.u32 %v5390_v28, 16  ;;  %v1351_v46 = vunpack.c.l.b16 %v1227_v22 }
 0x238   : > { %v5332_v8 = vpop.permute.xlu2 %1567  ;;  %v1469_v10 = vrot.slane %v1467_v63, 1  ;;  %v1476_v63 = vrot.slane %v1474_v58, 1  ;;  %v2182_v22 = vrot.slane %v5429_v31, 1 }
 0x239   : > { %v1682_v3 = vsel %vm1680_vm11, %v5067_v12, %v5332_v8  ;;  %v2028_v8 = vrot.slane %v2026_v56, 1 }
 0x23a   : > { %4117 = vmatmul.msk.bf16.gmra.mxu2 %vm2351_vm13, %v2297_v4  ;;  %v2016_v4 = vrot.slane %v2014_v32, 1  ;;  %v1470_v52 = vsel %vm1374_vm9, %v1465_v17, %v1469_v10  ;;  %v3054_v32 = vsel %vm1599_vm10, %v3052_v39, %v3053_v9  ;;  %v2179_v10 = vrot.slane %v5385_v21, 1  ;;  %v2660_v39 = vld [vmem:[#allocation2 + $0x8c] sm:$0x1] }
 0x23c   : > { %2216 = vrot.lane.b32.xlu1 %v2175_v20, %s4583_s20  ;;  %v2899_v20 = vshll.u32 %v2798_v7, 16  ;;  %v2019_v7 = vshrl.u32 %v5385_v21, 16 }
 0x23e   : > { %v2235_v38 = vpop.permute.xlu0 %2234  ;;  %2136 = vrot.lane.b32.xlu0 %v2005_v23, %s4582_s18  ;;  %1579 = vrot.lane.b32.xlu2 %v1458_v24, %s4582_s18  ;;  %v2017_v23 = vsel %vm1374_vm9, %v2012_v49, %v2016_v4  ;;  %v2892_v24 = vshrl.u32 %v5369_v18, 16  ;;  %v2799_v49 = vpack.c.b16 %v2783_v59, %v2783_v59 }
 0x23f   : > { %v2299_v27 = vsel %vm1713_vm12, %v2267_v37, %v2235_v38  ;;  %v2901_v38 = vrot.slane %v2899_v20, 1  ;;  %v1784_v20 = vld [vmem:[#allocation2 + $0x74] sm:$0x1] }
 0x240   : > { %4118 = vmatmul.msk.bf16.vlgmr.msra.gmra.mxu3 %vm2351_vm13, %v2299_v27  ;;  %v5359_v45 = vpop.permute.xlu2 %3079  ;;  %v2897_v37 = vor.u32 %v2896_v16, %v2892_v24  ;;  %v1481_v16 = vrot.slane %v1479_v62, 1  ;;  %v2911_v24 = vshll.u32 %v2799_v49, 16 }
 0x242   : > { %v2902_v55 = vsel %vm1374_vm9, %v2897_v37, %v2901_v38  ;;  %v2913_v9 = vrot.slane %v2911_v24, 1 }
 0x244   : > { %3011 = vrot.lane.b32.xlu1 %v2890_v47, %s4582_s18 }
 0x246   : > { %1660 = vrot.lane.b32.xlu0 %v1620_v48, %s4583_s20  ;;  %3091 = vrot.lane.b32.xlu2 %v3051_v40, %s4583_s20  ;;  %v5408_v48 = vld [vmem:[#allocation2 + $0x78] sm:$0xff]  ;;  %v2023_v40 = vrot.slane %v2021_v50, 1 }
 0x247   : > { %v2906_v4 = vshll.u32 %v5408_v48, 16  ;;  %v3055_v62 = vrot.slane %v5408_v48, 1 }
 0x248   : > { %v5380_v2 = vpop.permute.xlu2 %1569  ;;  %v2024_v11 = vor.u32 %v2023_v40, %v2019_v7  ;;  %v5444_v40 = vpack.c.b16 %v1351_v46, %v1351_v46 }
 0x24a   : > { %v2029_v37 = vsel %vm1374_vm9, %v2024_v11, %v2028_v8 }
 0x24c   : > { %2218 = vrot.lane.b32.xlu1 %v2178_v14, %s4583_s20  ;;  %v1477_v14 = vor.u32 %v1476_v63, %v1472_v35  ;;  %v1624_v63 = vrot.slane %v5390_v28, 1 }
 0x24e   : > { %v2237_v29 = vpop.permute.xlu1 %2236  ;;  %2138 = vrot.lane.b32.xlu0 %v2017_v23, %s4582_s18  ;;  %1581 = vrot.lane.b32.xlu2 %v1470_v52, %s4582_s18  ;;  %v2181_v23 = vsel %vm1599_vm10, %v2179_v10, %v2180_v43  ;;  %v2908_v52 = vrot.slane %v2906_v4, 1  ;;  %v1482_v38 = vsel %vm1374_vm9, %v1477_v14, %v1481_v16  ;;  %v1491_v4 = vshll.u32 %v5444_v40, 16 }
 0x24f   : > { %v2031_v10 = vshrl.u32 %v5429_v31, 16  ;;  %v1684_v16 = vsel %vm1680_vm11, %v5108_v0, %v5380_v2  ;;  %v5476_v0 = vld [vmem:[#allocation2 + $0x78] sm:$0xff] }
 0x250   : > { %v2157_v27 = vpop.permute.xlu0 %2156  ;;  %v5394_v41 = vpop.permute.xlu2 %3081 }
 0x251   : > { %v2269_v57 = vsel %vm1680_vm11, %v5089_v33, %v2157_v27  ;;  %v1623_v33 = vsel %vm1599_vm10, %v1621_v1, %v1622_v42  ;;  %v2904_v27 = vshrl.u32 %v5408_v48, 16  ;;  %v5434_v42 = vld [vmem:[#allocation2 + $0x6c] sm:$0xff] }
 0x252   : > { %v2301_v47 = vsel %vm1713_vm12, %v2269_v57, %v2237_v29  ;;  %v1910_v29 = vunpack.c.l.b16 %v1784_v20 }
 0x253   : > { %4119 = vmatmul.msk.bf16.gmra.mxu3 %vm2351_vm13, %v2301_v47  ;;  %v2909_v57 = vor.u32 %v2908_v52, %v2904_v27  ;;  %v1625_v47 = vrot.slane %v5400_v54, 1  ;;  %v2663_v27 = vld [vmem:[#allocation2 + $0x98] sm:$0x1] }
 0x254   : > { %3013 = vrot.lane.b32.xlu1 %v2902_v55, %s4582_s18  ;;  %v1926_v1 = vpack.c.b16 %v1910_v29, %v1910_v29  ;;  %v2033_v55 = vshll.u32 %v5429_v31, 16 }
 0x255   : > { %v1626_v7 = vsel %vm1599_vm10, %v1624_v63, %v1625_v47 }
 0x256   : > { %v3000_v5 = vpop.permute.xlu1 %2999  ;;  %1662 = vrot.lane.b32.xlu0 %v1623_v33, %s4583_s20  ;;  %3093 = vrot.lane.b32.xlu2 %v3054_v32, %s4583_s20  ;;  %v3056_v33 = vrot.slane %v2799_v49, 1  ;;  %v1486_v32 = vshll.u32 %v5434_v42, 16  ;;  %v2038_v35 = vshll.u32 %v1926_v1, 16  ;;  %v2183_v11 = vrot.slane %v1926_v1, 1  ;;  %v5483_v1 = vld [vmem:[#allocation2 + $0x90] sm:$0xff] }
 0x257   : > { %v3112_v51 = vsel %vm1680_vm11, %v5086_v30, %v3000_v5  ;;  %v2784_v5 = vunpack.c.l.b16 %v2660_v39 }
 0x258   : > { %v1649_v17 = vpop.permute.xlu0 %1648  ;;  %v5424_v12 = vpop.permute.xlu2 %1571  ;;  %v3144_v30 = vsel %vm1713_vm12, %v3112_v51, %v5359_v45  ;;  %v2035_v45 = vrot.slane %v2033_v55, 1  ;;  %v3057_v43 = vsel %vm1599_vm10, %v3055_v62, %v3056_v33  ;;  %v1488_v49 = vrot.slane %v1486_v32, 1  ;;  %v1233_v62 = vld [vmem:[#allocation2 + $0x8c] sm:$0x1] }
 0x259   : > { %v1715_v13 = vsel %vm1713_vm12, %v1682_v3, %v1649_v17  ;;  %v5457_v3 = vld [vmem:[#allocation2 + $0x84] sm:$0xff]  ;;  %v2800_v8 = vpack.c.b16 %v2784_v5, %v2784_v5  ;;  %v2040_v24 = vrot.slane %v2038_v35, 1  ;;  %v2184_v46 = vsel %vm1599_vm10, %v2182_v22, %v2183_v11 }
 0x25a   : > { %4144 = vmatmul.msk.bf16.vlgmr.msrb.gmra.mxu2 %vm2351_vm13, %v1715_v13  ;;  %v1484_v13 = vshrl.u32 %v5434_v42, 16  ;;  %v2918_v14 = vshll.u32 %v5457_v3, 16  ;;  %v2916_v47 = vshrl.u32 %v5457_v3, 16  ;;  %v2785_v55 = vunpack.c.l.b16 %v2663_v27 }
 0x25b   : > { %v2923_v51 = vshll.u32 %v2800_v8, 16 }
 0x25c   : > { %2220 = vrot.lane.b32.xlu1 %v2181_v23, %s4583_s20  ;;  %v2036_v23 = vor.u32 %v2035_v45, %v2031_v10  ;;  %v1489_v29 = vor.u32 %v1488_v49, %v1484_v13  ;;  %v5493_v45 = vpack.c.b16 %v2785_v55, %v2785_v55  ;;  %v1627_v49 = vrot.slane %v5434_v42, 1  ;;  %v2666_v55 = vld [vmem:[#allocation2 + $0xa4] sm:$0x1] }
 0x25d   : > { %v2925_v32 = vrot.slane %v2923_v51, 1 }
 0x25e   : > { %v2207_v50 = vpop.permute.xlu1 %2206  ;;  %2140 = vrot.lane.b32.xlu0 %v2029_v37, %s4582_s18  ;;  %1583 = vrot.lane.b32.xlu2 %v1482_v38, %s4582_s18  ;;  %v1493_v37 = vrot.slane %v1491_v4, 1  ;;  %v1230_v38 = vld [vmem:[#allocation2 + $0x80] sm:$0x1]  ;;  %v5504_v4 = vld [vmem:[#allocation2 + $0x84] sm:$0xff] }
 0x25f   : > { %v1352_v2 = vunpack.c.l.b16 %v1230_v38 }
 0x260   : > { %v2127_v58 = vpop.permute.xlu0 %2126  ;;  %v5451_v54 = vpop.permute.xlu2 %3083 }
 0x261   : > { %v2239_v59 = vsel %vm1680_vm11, %v5104_v61, %v2127_v58  ;;  %v2914_v61 = vsel %vm1374_vm9, %v2909_v57, %v2913_v9  ;;  %v2041_v9 = vsel %vm1374_vm9, %v2036_v23, %v2040_v24  ;;  %v1494_v58 = vsel %vm1374_vm9, %v1489_v29, %v1493_v37  ;;  %v4474_v37 = vld [vmem:[#allocation2 + $0x18] sm:$0xff] }
 0x262   : > { %v2271_v56 = vsel %vm1713_vm12, %v2239_v59, %v2207_v50  ;;  %v2920_v50 = vrot.slane %v2918_v14, 1  ;;  %v1368_v63 = vpack.c.b16 %v1352_v2, %v1352_v2  ;;  %v2935_v14 = vshll.u32 %v5493_v45, 16 }
 0x263   : > { %4104 = vmatmul.msk.bf16.vlgmr.msrb.gmra.mxu0 %vm2351_vm13, %v2271_v56  ;;  %4260 = vmatmul.msk.bf16.vlgmr.msrb.gmra.mxu3 %vm2351_vm13, %v3144_v30  ;;  %v1628_v30 = vrot.slane %v5444_v40, 1  ;;  %v1510_v29 = vshll.u32 %v5504_v4, 16  ;;  %v1686_v38 = vsel %vm1680_vm11, %v4474_v37, %v5424_v12  ;;  %v5524_v12 = vld [vmem:[#allocation2 + $0x90] sm:$0xff] }
 0x264   : > { %3015 = vrot.lane.b32.xlu1 %v2914_v61, %s4582_s18  ;;  %v2921_v33 = vor.u32 %v2920_v50, %v2916_v47  ;;  %v1498_v61 = vshll.u32 %v5476_v0, 16  ;;  %v1503_v13 = vshll.u32 %v1368_v63, 16  ;;  %v1631_v23 = vrot.slane %v1368_v63, 1  ;;  %v1236_v47 = vld [vmem:[#allocation2 + $0x98] sm:$0x1] }
 0x265   : > { %v1629_v10 = vsel %vm1599_vm10, %v1627_v49, %v1628_v30 }
 0x266   : > { %v3002_v17 = vpop.permute.xlu1 %3001  ;;  %1664 = vrot.lane.b32.xlu0 %v1626_v7, %s4583_s20  ;;  %3095 = vrot.lane.b32.xlu2 %v3057_v43, %s4583_s20  ;;  %v3059_v7 = vrot.slane %v2800_v8, 1  ;;  %v2930_v43 = vshll.u32 %v5483_v1, 16  ;;  %v2926_v40 = vsel %vm1374_vm9, %v2921_v33, %v2925_v32  ;;  %v1500_v11 = vrot.slane %v1498_v61, 1 }
 0x267   : > { %v3114_v59 = vsel %vm1680_vm11, %v5119_v19, %v3002_v17  ;;  %v1353_v17 = vunpack.c.l.b16 %v1233_v62  ;;  %v1505_v2 = vrot.slane %v1503_v13, 1  ;;  %v1354_v32 = vunpack.c.l.b16 %v1236_v47  ;;  %v5531_v62 = vld [vmem:[#allocation2 + $0x9c] sm:$0xff] }
 0x268   : > { %v1651_v20 = vpop.permute.xlu0 %1650  ;;  %v5478_v57 = vpop.permute.xlu2 %1573  ;;  %v3146_v19 = vsel %vm1713_vm12, %v3114_v59, %v5394_v41  ;;  %v2932_v8 = vrot.slane %v2930_v43, 1  ;;  %v1512_v59 = vrot.slane %v1510_v29, 1  ;;  %v1508_v61 = vshrl.u32 %v5504_v4, 16  ;;  %v4475_v43 = vld [vmem:[#allocation2 + $0x30] sm:$0xff]  ;;  %v5553_v29 = vld [vmem:[#allocation2 + $0xa8] sm:$0xff] }
 0x269   : > { %v1717_v52 = vsel %vm1713_vm12, %v1684_v16, %v1651_v20  ;;  %v1496_v20 = vshrl.u32 %v5476_v0, 16  ;;  %v1369_v24 = vpack.c.b16 %v1353_v17, %v1353_v17  ;;  %v5536_v17 = vpack.c.b16 %v1354_v32, %v1354_v32 }
 0x26a   : > { %4145 = vmatmul.msk.bf16.gmra.mxu2 %vm2351_vm13, %v1717_v52  ;;  %v2928_v52 = vshrl.u32 %v5483_v1, 16  ;;  %v2940_v47 = vshrl.u32 %v5531_v62, 16 }
 0x26b   : > { %v1501_v50 = vor.u32 %v1500_v11, %v1496_v20  ;;  %v1515_v33 = vshll.u32 %v1369_v24, 16  ;;  %v2669_v11 = vld [vmem:[#allocation2 + $0xb0] sm:$0x1]  ;;  %v2942_v20 = vshll.u32 %v5531_v62, 16 }
 0x26c   : > { %2222 = vrot.lane.b32.xlu1 %v2184_v46, %s4583_s20  ;;  %v1630_v46 = vrot.slane %v5476_v0, 1 }
 0x26d   : > { %v1506_v30 = vsel %vm1374_vm9, %v1501_v50, %v1505_v2  ;;  %v1517_v49 = vrot.slane %v1515_v33, 1  ;;  %v2944_v50 = vrot.slane %v2942_v20, 1  ;;  %v4476_v33 = vld [vmem:[#allocation2 + $0x24] sm:$0xff]  ;;  %v2952_v20 = vshrl.u32 %v5553_v29, 16 }
 0x26e   : > { %v2209_v39 = vpop.permute.xlu1 %2208  ;;  %2142 = vrot.lane.b32.xlu0 %v2041_v9, %s4582_s18  ;;  %1585 = vrot.lane.b32.xlu2 %v1494_v58, %s4582_s18  ;;  %v2933_v9 = vor.u32 %v2932_v8, %v2928_v52  ;;  %v2937_v58 = vrot.slane %v2935_v14, 1  ;;  %v3062_v8 = vrot.slane %v5493_v45, 1  ;;  %v2787_v45 = vunpack.c.l.b16 %v2669_v11  ;;  %v5578_v11 = vld [vmem:[#allocation2 + $0x9c] sm:$0xff] }
 0x26f   : > { %v1688_v32 = vsel %vm1680_vm11, %v4476_v33, %v5478_v57 }
 0x270   : > { %v2129_v56 = vpop.permute.xlu0 %2128  ;;  %v5513_v22 = vpop.permute.xlu2 %3085  ;;  %v2938_v63 = vsel %vm1374_vm9, %v2933_v9, %v2937_v58  ;;  %v1520_v9 = vshrl.u32 %v5524_v12, 16 }
 0x271   : > { %v2241_v5 = vsel %vm1680_vm11, %v5131_v44, %v2129_v56  ;;  %v3058_v44 = vrot.slane %v5457_v3, 1 }
 0x272   : > { %v2273_v35 = vsel %vm1713_vm12, %v2241_v5, %v2209_v39  ;;  %v1632_v39 = vsel %vm1599_vm10, %v1630_v46, %v1631_v23  ;;  %v2786_v5 = vunpack.c.l.b16 %v2666_v55  ;;  %v2803_v55 = vpack.c.b16 %v2787_v45, %v2787_v45 }
 0x273   : > { %4105 = vmatmul.msk.bf16.gmra.mxu0 %vm2351_vm13, %v2273_v35  ;;  %4261 = vmatmul.msk.bf16.gmra.mxu3 %vm2351_vm13, %v3146_v19  ;;  %v3060_v41 = vsel %vm1599_vm10, %v3058_v44, %v3059_v7  ;;  %v1513_v19 = vor.u32 %v1512_v59, %v1508_v61  ;;  %v1634_v44 = vrot.slane %v1369_v24, 1  ;;  %v3061_v24 = vrot.slane %v5483_v1, 1  ;;  %v4397_v59 = vld [vmem:[%s5994_s3 + $0x8] sm:$0xff] }
 0x274   : > { %3017 = vrot.lane.b32.xlu1 %v2926_v40, %s4582_s18  ;;  %v2802_v14 = vpack.c.b16 %v2786_v5, %v2786_v5  ;;  %3535 = vmatpush.bf16.msrb.mxu1 %v4397_v59  ;;  %v2959_v57 = vshll.u32 %v2803_v55, 16 }
 0x275   : > { %v1518_v52 = vsel %vm1374_vm9, %v1513_v19, %v1517_v49  ;;  %v1239_v19 = vld [vmem:[#allocation2 + $0xa4] sm:$0x1]  ;;  %v2672_v49 = vld [vmem:[#allocation2 + $0xbc] sm:$0x1] }
 0x276   : > { %v3004_v16 = vpop.permute.xlu1 %3003  ;;  %1666 = vrot.lane.b32.xlu0 %v1629_v10, %s4583_s20  ;;  %3097 = vrot.lane.b32.xlu2 %v3060_v41, %s4583_s20  ;;  %v1522_v10 = vshll.u32 %v5524_v12, 16  ;;  %v3065_v58 = vrot.slane %v2802_v14, 1 }
 0x277   : > { %v3116_v35 = vsel %vm1680_vm11, %v4475_v43, %v3004_v16  ;;  %v2945_v43 = vor.u32 %v2944_v50, %v2940_v47  ;;  %v3068_v47 = vrot.slane %v2803_v55, 1  ;;  %v5605_v55 = vld [vmem:[#allocation2 + $0xa8] sm:$0xff] }
 0x278   : > { %v1653_v27 = vpop.permute.xlu0 %1652  ;;  %v5539_v41 = vpop.permute.xlu2 %1575  ;;  %v3148_v23 = vsel %vm1713_vm12, %v3116_v35, %v5451_v54  ;;  %v1524_v37 = vrot.slane %v1522_v10, 1  ;;  %v3063_v54 = vsel %vm1599_vm10, %v3061_v24, %v3062_v8  ;;  %v4477_v24 = vld [vmem:[#allocation2 + $0x3c] sm:$0xff] }
 0x279   : > { %v1719_v51 = vsel %vm1713_vm12, %v1686_v38, %v1653_v27  ;;  %v1527_v38 = vshll.u32 %v5536_v17, 16 }
 0x27a   : > { %4146 = vmatmul.msk.bf16.gmra.mxu2 %vm2351_vm13, %v1719_v51  ;;  %v2947_v51 = vshll.u32 %v2802_v14, 16 }
 0x27b   : > { %v1529_v61 = vrot.slane %v1527_v38, 1  ;;  %v2961_v38 = vrot.slane %v2959_v57, 1 }
 0x27c   : > { %1668 = vrot.lane.b32.xlu1 %v1632_v39, %s4583_s20  ;;  %v2954_v39 = vshll.u32 %v5553_v29, 16  ;;  %v2949_v35 = vrot.slane %v2947_v51, 1  ;;  %v1534_v51 = vshll.u32 %v5578_v11, 16 }
 0x27d   : > { %v5526_v56 = vpop.f32.mrf.mxu2 }
 0x27e   : > { %v2211_v7 = vpop.permute.xlu1 %2210  ;;  %1587 = vrot.lane.b32.xlu0 %v1506_v30, %s4582_s18  ;;  %3019 = vrot.lane.b32.xlu2 %v2938_v63, %s4582_s18  ;;  %v1525_v63 = vor.u32 %v1524_v37, %v1520_v9  ;;  %v2956_v10 = vrot.slane %v2954_v39, 1  ;;  %v2950_v8 = vsel %vm1374_vm9, %v2945_v43, %v2949_v35  ;;  %v1242_v9 = vld [vmem:[#allocation2 + $0xb0] sm:$0x1] }
 0x280   : > { %v2131_v40 = vpop.permute.xlu0 %2130  ;;  %v1530_v14 = vsel %vm1374_vm9, %v1525_v63, %v1529_v61  ;;  %v2957_v37 = vor.u32 %v2956_v10, %v2952_v20  ;;  %v1536_v61 = vrot.slane %v1534_v51, 1 }
 0x281   : > { %v2243_v13 = vsel %vm1680_vm11, %v5169_v25, %v2131_v40  ;;  %v1633_v25 = vrot.slane %v5504_v4, 1  ;;  %v5574_v40 = vpop.permute.xlu2 %3087 }
 0x282   : > { %v2275_v16 = vsel %vm1713_vm12, %v2243_v13, %v2211_v7  ;;  %v3064_v7 = vrot.slane %v5531_v62, 1  ;;  %v1355_v13 = vunpack.c.l.b16 %v1239_v19 }
 0x283   : > { %4106 = vmatmul.msk.bf16.gmra.mxu0 %vm2351_vm13, %v2275_v16  ;;  %4262 = vmatmul.msk.bf16.gmra.mxu3 %vm2351_vm13, %v3148_v23  ;;  %v1635_v46 = vsel %vm1599_vm10, %v1633_v25, %v1634_v44  ;;  %v5583_v16 = vld [vmem:[#allocation2 + $0xb4] sm:$0xff]  ;;  %v2788_v23 = vunpack.c.l.b16 %v2672_v49  ;;  %v1532_v49 = vshrl.u32 %v5578_v11, 16 }
 0x284   : > { %1589 = vrot.lane.b32.xlu1 %v1518_v52, %s4582_s18  ;;  %v3066_v44 = vsel %vm1599_vm10, %v3064_v7, %v3065_v58  ;;  %v1371_v50 = vpack.c.b16 %v1355_v13, %v1355_v13  ;;  %v2966_v59 = vshll.u32 %v5583_v16, 16  ;;  %v2964_v10 = vshrl.u32 %v5583_v16, 16 }
 0x285   : > { %v5557_v27 = vpop.f32.mrf.mxu2  ;;  %v5594_v39 = vpack.c.b16 %v2788_v23, %v2788_v23  ;;  %v1546_v13 = vshll.u32 %v5605_v55, 16  ;;  %v1639_v23 = vrot.slane %v5578_v11, 1 }
 0x286   : > { %v3006_v2 = vpop.permute.xlu1 %3005  ;;  %3099 = vrot.lane.b32.xlu0 %v3063_v54, %s4583_s20  ;;  %1670 = vrot.lane.b32.xlu2 %v1635_v46, %s4583_s20  ;;  %v1637_v46 = vrot.slane %v5536_v17, 1  ;;  %v2962_v17 = vsel %vm1374_vm9, %v2957_v37, %v2961_v38  ;;  %v1539_v7 = vshll.u32 %v1371_v50, 16  ;;  %v2968_v43 = vrot.slane %v2966_v59, 1 }
 0x287   : > { %v3118_v25 = vsel %vm1680_vm11, %v4477_v24, %v3006_v2  ;;  %v2971_v35 = vshll.u32 %v5594_v39, 16 }
 0x288   : > { %v1655_v30 = vpop.permute.xlu0 %1654  ;;  %v3150_v33 = vsel %vm1713_vm12, %v3118_v25, %v5513_v22  ;;  %v1541_v37 = vrot.slane %v1539_v7, 1  ;;  %v2969_v38 = vor.u32 %v2968_v43, %v2964_v10 }
 0x289   : > { %v1721_v5 = vsel %vm1713_vm12, %v1688_v32, %v1655_v30  ;;  %v1636_v32 = vrot.slane %v5524_v12, 1  ;;  %v1356_v30 = vunpack.c.l.b16 %v1242_v9  ;;  %v1548_v9 = vrot.slane %v1546_v13, 1 }
 0x28a   : > { %4147 = vmatmul.msk.bf16.gmra.mxu2 %vm2351_vm13, %v1721_v5  ;;  %v5609_v5 = vpop.permute.xlu2 %1577 }
 0x28b   : > { %v1638_v63 = vsel %vm1599_vm10, %v1636_v32, %v1637_v46  ;;  %v1372_v57 = vpack.c.b16 %v1356_v30, %v1356_v30  ;;  %v1245_v46 = vld [vmem:[#allocation2 + $0xbc] sm:$0x1]  ;;  %v5632_v32 = vld [vmem:[#allocation2 + $0xc0] sm:$0xff] }
 0x28c   : > { %3101 = vrot.lane.b32.xlu1 %v3066_v44, %s4583_s20  ;;  %v1640_v44 = vrot.slane %v1371_v50, 1  ;;  %v2675_v50 = vld [vmem:[#allocation2 + $0xc8] sm:$0x1] }
 0x28d   : > { %v5588_v45 = vpop.f32.mrf.mxu2  ;;  %v1643_v13 = vrot.slane %v1372_v57, 1 }
 0x28e   : > { %v2213_v52 = vpop.permute.xlu1 %2212  ;;  %3021 = vrot.lane.b32.xlu0 %v2950_v8, %s4582_s18  ;;  %1591 = vrot.lane.b32.xlu2 %v1530_v14, %s4582_s18  ;;  %v4478_v8 = vld [vmem:[#allocation2 + $0x30] sm:$0xff]  ;;  %v1641_v51 = vsel %vm1599_vm10, %v1639_v23, %v1640_v44 }
 0x28f   : > { %v1690_v14 = vsel %vm1680_vm11, %v4478_v8, %v5539_v41  ;;  %v5627_v41 = vld [vmem:[#allocation2 + $0xb4] sm:$0xff] }
 0x290   : > { %v2133_v54 = vpop.permute.xlu0 %2132  ;;  %v1558_v44 = vshll.u32 %v5627_v41, 16 }
 0x291   : > { %v2245_v58 = vsel %vm1680_vm11, %v5209_v36, %v2133_v54  ;;  %v3067_v36 = vrot.slane %v5553_v29, 1  ;;  %v2973_v54 = vrot.slane %v2971_v35, 1  ;;  %v3071_v35 = vrot.slane %v5594_v39, 1 }
 0x292   : > { %v2277_v2 = vsel %vm1713_vm12, %v2245_v58, %v2213_v52  ;;  %v1537_v52 = vor.u32 %v1536_v61, %v1532_v49  ;;  %v1551_v58 = vshll.u32 %v1372_v57, 16  ;;  %v3090_v30 = vpop.permute.xlu2 %3089  ;;  %v1560_v57 = vrot.slane %v1558_v44, 1 }
 0x293   : > { %4107 = vmatmul.msk.bf16.gmra.mxu0 %vm2351_vm13, %v2277_v2  ;;  %4263 = vmatmul.msk.bf16.gmra.mxu3 %vm2351_vm13, %v3150_v33  ;;  %v3069_v22 = vsel %vm1599_vm10, %v3067_v36, %v3068_v47  ;;  %v1357_v47 = vunpack.c.l.b16 %v1245_v46  ;;  %v2974_v2 = vsel %vm1374_vm9, %v2969_v38, %v2973_v54  ;;  %v1544_v33 = vshrl.u32 %v5605_v55, 16 }
 0x294   : > { %3023 = vrot.lane.b32.xlu1 %v2962_v17, %s4582_s18  ;;  %v1542_v59 = vsel %vm1374_vm9, %v1537_v52, %v1541_v37  ;;  %v2789_v17 = vunpack.c.l.b16 %v2675_v50  ;;  %v1553_v7 = vrot.slane %v1551_v58, 1  ;;  %v3070_v52 = vrot.slane %v5583_v16, 1  ;;  %v4480_v58 = vld [vmem:[#allocation2 + $0x3c] sm:$0xff] }
 0x295   : > { %v5621_v24 = vpop.f32.mrf.mxu2  ;;  %v1373_v49 = vpack.c.b16 %v1357_v47, %v1357_v47  ;;  %v1556_v50 = vshrl.u32 %v5627_v41, 16  ;;  %v1692_v47 = vsel %vm1680_vm11, %v4480_v58, %v5609_v5 }
 0x296   : > { %v3008_v19 = vpop.permute.xlu1 %3007  ;;  %1672 = vrot.lane.b32.xlu0 %v1638_v63, %s4583_s20  ;;  %3103 = vrot.lane.b32.xlu2 %v3069_v22, %s4583_s20  ;;  %v4479_v63 = vld [vmem:[#allocation2 + $0x48] sm:$0xff]  ;;  %v1549_v22 = vor.u32 %v1548_v9, %v1544_v33  ;;  %v2805_v8 = vpack.c.b16 %v2789_v17, %v2789_v17  ;;  %v3072_v37 = vsel %vm1599_vm10, %v3070_v52, %v3071_v35  ;;  %v2976_v9 = vshrl.u32 %v5632_v32, 16 }
 0x297   : > { %v3120_v61 = vsel %vm1680_vm11, %v4479_v63, %v3008_v19  ;;  %v3073_v63 = vrot.slane %v5632_v32, 1 }
 0x298   : > { %v1657_v20 = vpop.permute.xlu0 %1656  ;;  %v3152_v19 = vsel %vm1713_vm12, %v3120_v61, %v5574_v40  ;;  %v1554_v39 = vsel %vm1374_vm9, %v1549_v22, %v1553_v7  ;;  %v2983_v54 = vshll.u32 %v2805_v8, 16 }
 0x299   : > { %v1723_v25 = vsel %vm1713_vm12, %v1690_v14, %v1657_v20  ;;  %v2978_v14 = vshll.u32 %v5632_v32, 16 }
 0x29a   : > { %4148 = vmatmul.msk.bf16.gmra.mxu2 %vm2351_vm13, %v1723_v25  ;;  %v1563_v25 = vshll.u32 %v1373_v49, 16  ;;  %v1580_v17 = vpop.permute.xlu2 %1579  ;;  %v2985_v22 = vrot.slane %v2983_v54, 1 }
 0x29b   : > { %v2980_v38 = vrot.slane %v2978_v14, 1 }
 0x29c   : > { %1674 = vrot.lane.b32.xlu1 %v1641_v51, %s4583_s20  ;;  %v3074_v51 = vrot.slane %v2805_v8, 1  ;;  %v1565_v33 = vrot.slane %v1563_v25, 1 }
 0x29d   : > { %v5645_v23 = vpop.f32.mrf.mxu2  ;;  %v2981_v61 = vor.u32 %v2980_v38, %v2976_v9 }
 0x29e   : > { %v2215_v36 = vpop.permute.xlu1 %2214  ;;  %1593 = vrot.lane.b32.xlu0 %v1542_v59, %s4582_s18  ;;  %3025 = vrot.lane.b32.xlu2 %v2974_v2, %s4582_s18  ;;  %v1561_v2 = vor.u32 %v1560_v57, %v1556_v50  ;;  %v3075_v7 = vsel %vm1599_vm10, %v3073_v63, %v3074_v51  ;;  %v1645_v57 = vrot.slane %v5627_v41, 1  ;;  %v2678_v50 = vld [vmem:[#allocation2 + $0xd4] sm:$0x1] }
 0x29f   : > { %v2986_v5 = vsel %vm1374_vm9, %v2981_v61, %v2985_v22  ;;  %v2790_v9 = vunpack.c.l.b16 %v2678_v50 }
 0x2a0   : > { %v2135_v43 = vpop.permute.xlu0 %2134  ;;  %v1566_v35 = vsel %vm1374_vm9, %v1561_v2, %v1565_v33 }
 0x2a1   : > { %v2247_v10 = vsel %vm1680_vm11, %v5248_v26, %v2135_v43  ;;  %v1642_v26 = vrot.slane %v5605_v55, 1  ;;  %v2806_v33 = vpack.c.b16 %v2790_v9, %v2790_v9 }
 0x2a2   : > { %v2279_v20 = vsel %vm1713_vm12, %v2247_v10, %v2215_v36  ;;  %v4396_v10 = vld [vmem:[%s5994_s3] sm:$0xff] }
 0x2a3   : > { %4108 = vmatmul.msk.bf16.vlgmr.msra.gmra.mxu1 %vm2351_vm13, %v2279_v20  ;;  %4264 = vmatmul.msk.bf16.gmra.mxu3 %vm2351_vm13, %v3152_v19  ;;  %v1644_v40 = vsel %vm1599_vm10, %v1642_v26, %v1643_v13  ;;  %v4481_v13 = vld [vmem:[#allocation2 + $0x54] sm:$0xff]  ;;  %v1646_v19 = vrot.slane %v1373_v49, 1  ;;  %v3092_v26 = vpop.permute.xlu2 %3091 }
 0x2a4   : > { %1595 = vrot.lane.b32.xlu1 %v1554_v39, %s4582_s18  ;;  %3536 = vmatpush.bf16.msrb.mxu1 %v4396_v10 }
 0x2a5   : > { %v5666_v43 = vpop.f32.mrf.mxu2  ;;  %v1647_v25 = vsel %vm1599_vm10, %v1645_v57, %v1646_v19 }
 0x2a6   : > { %v3010_v46 = vpop.permute.xlu1 %3009  ;;  %3105 = vrot.lane.b32.xlu0 %v3072_v37, %s4583_s20  ;;  %1676 = vrot.lane.b32.xlu2 %v1644_v40, %s4583_s20 }
 0x2a7   : > { %v3122_v8 = vsel %vm1680_vm11, %v4481_v13, %v3010_v46  ;;  %v5691_v46 = vld [vmem:[#allocation2 + $0xcc] sm:$0xff] }
 0x2a8   : > { %v1659_v59 = vpop.permute.xlu0 %1658  ;;  %v3154_v52 = vsel %vm1713_vm12, %v3122_v8, %v3090_v30 }
 0x2a9   : > { %v1725_v36 = vsel %vm1713_vm12, %v1692_v47, %v1659_v59  ;;  %v2988_v47 = vshrl.u32 %v5691_v46, 16  ;;  %v2990_v59 = vshll.u32 %v5691_v46, 16 }
 0x2aa   : > { %4149 = vmatmul.msk.bf16.gmra.mxu2 %vm2351_vm13, %v1725_v36 }
 0x2ab   : > { %v1582_v38 = vpop.permute.xlu2 %1581  ;;  %v2992_v63 = vrot.slane %v2990_v59, 1 }
 0x2ac   : > { %3107 = vrot.lane.b32.xlu1 %v3075_v7, %s4583_s20 }
 0x2ad   : > { %v5685_v40 = vpop.f32.mrf.mxu2  ;;  %v2993_v22 = vor.u32 %v2992_v63, %v2988_v47 }
 0x2ae   : > { %v2217_v44 = vpop.permute.xlu1 %2216  ;;  %3027 = vrot.lane.b32.xlu0 %v2986_v5, %s4582_s18  ;;  %1597 = vrot.lane.b32.xlu2 %v1566_v35, %s4582_s18 }
 0x2b0   : > { %v2137_v14 = vpop.permute.xlu0 %2136 }
 0x2b1   : > { %v2249_v20 = vsel %vm1680_vm11, %v5293_v53, %v2137_v14  ;;  %v1694_v53 = vsel %vm1680_vm11, %v5301_v6, %v1580_v17 }
 0x2b2   : > { %v2281_v39 = vsel %vm1713_vm12, %v2249_v20, %v2217_v44 }
 0x2b3   : > { %4109 = vmatmul.msk.bf16.gmra.mxu1 %vm2351_vm13, %v2281_v39  ;;  %4265 = vmatmul.msk.bf16.gmra.mxu3 %vm2351_vm13, %v3154_v52  ;;  %v3094_v35 = vpop.permute.xlu2 %3093 }
 0x2b5   : > { %v5697_v6 = vpop.f32.mrf.mxu2 }
 0x2b6   : > { %v3012_v37 = vpop.permute.xlu1 %3011  ;;  %1678 = vrot.lane.b32.xlu0 %v1647_v25, %s4583_s20 }
 0x2b7   : > { %v3124_v51 = vsel %vm1680_vm11, %v5313_v60, %v3012_v37  ;;  %v2995_v60 = vshll.u32 %v2806_v33, 16 }
 0x2b8   : > { %v1661_v49 = vpop.permute.xlu0 %1660  ;;  %v3156_v36 = vsel %vm1713_vm12, %v3124_v51, %v3092_v26 }
 0x2b9   : > { %v1727_v30 = vsel %vm1713_vm12, %v1694_v53, %v1661_v49  ;;  %v2997_v7 = vrot.slane %v2995_v60, 1 }
 0x2ba   : > { %4150 = vmatmul.msk.bf16.gmra.mxu2 %vm2351_vm13, %v1727_v30 }
 0x2bb   : > { %v2998_v44 = vsel %vm1374_vm9, %v2993_v22, %v2997_v7  ;;  %v1584_v52 = vpop.permute.xlu2 %1583 }
 0x2bc   : > { %3029 = vrot.lane.b32.xlu1 %v2998_v44, %s4582_s18  ;;  %v5753_v44 = vld [vmem:[%s5996_s5] ss:$0 sm:$0xff] }
 0x2bd   : > { %v5713_v8 = vpop.f32.mrf.mxu2 }
 0x2be   : > { %v2219_v54 = vpop.permute.xlu1 %2218 }
 0x2c0   : > { %v2139_v58 = vpop.permute.xlu0 %2138 }
 0x2c1   : > { %v2251_v2 = vsel %vm1680_vm11, %v5343_v15, %v2139_v58  ;;  %v1696_v15 = vsel %vm1680_vm11, %v5350_v34, %v1582_v38  ;;  %v3076_v38 = vrot.slane %v5691_v46, 1 }
 0x2c2   : > { %v2283_v17 = vsel %vm1713_vm12, %v2251_v2, %v2219_v54  ;;  %v3077_v54 = vrot.slane %v2806_v33, 1 }
 0x2c3   : > { %4110 = vmatmul.msk.bf16.gmra.mxu1 %vm2351_vm13, %v2283_v17  ;;  %4266 = vmatmul.msk.bf16.gmra.mxu3 %vm2351_vm13, %v3156_v36  ;;  %v5705_v61 = vpop.f32.mrf.mxu3 }
 0x2c4   : > { %v3078_v51 = vsel %vm1599_vm10, %v3076_v38, %v3077_v54 }
 0x2c5   : > { %v5725_v25 = vpop.f32.mrf.mxu2  ;;  %3109 = vrot.lane.b32.xlu2 %v3078_v51, %s4583_s20 }
 0x2c6   : > { %v3014_v5 = vpop.permute.xlu1 %3013 }
 0x2c7   : > { %v3126_v19 = vsel %vm1680_vm11, %v5369_v18, %v3014_v5  ;;  %v1698_v18 = vsel %vm1680_vm11, %v5390_v28, %v1584_v52 }
 0x2c8   : > { %v1663_v10 = vpop.permute.xlu0 %1662  ;;  %v3158_v57 = vsel %vm1713_vm12, %v3126_v19, %v3094_v35 }
 0x2c9   : > { %v1729_v13 = vsel %vm1713_vm12, %v1696_v15, %v1663_v10 }
 0x2ca   : > { %4151 = vmatmul.msk.bf16.gmra.mxu2 %vm2351_vm13, %v1729_v13 }
 0x2cb   : > { %v5715_v14 = vpop.f32.mrf.mxu3 }
 0x2ce   : > { %v2221_v20 = vpop.permute.xlu1 %2220 }
 0x2d0   : > { %v2141_v39 = vpop.permute.xlu0 %2140 }
 0x2d1   : > { %v2253_v34 = vsel %vm1680_vm11, %v5385_v21, %v2141_v39  ;;  %v3096_v21 = vpop.permute.xlu2 %3095 }
 0x2d2   : > { %v2285_v26 = vsel %vm1713_vm12, %v2253_v34, %v2221_v20 }
 0x2d3   : > { %4111 = vmatmul.msk.bf16.gmra.mxu1 %vm2351_vm13, %v2285_v26  ;;  %4267 = vmatmul.msk.bf16.gmra.mxu3 %vm2351_vm13, %v3158_v57 }
 0x2d6   : > { %v5727_v37 = vpop.f32.mrf.mxu3  ;;  %v3016_v53 = vpop.permute.xlu1 %3015 }
 0x2d7   : > { %v3128_v58 = vsel %vm1680_vm11, %v5408_v48, %v3016_v53 }
 0x2d8   : > { %v1665_v49 = vpop.permute.xlu0 %1664  ;;  %v3160_v33 = vsel %vm1713_vm12, %v3128_v58, %v3096_v21 }
 0x2d9   : > { %v1731_v30 = vsel %vm1713_vm12, %v1698_v18, %v1665_v49  ;;  %v1586_v36 = vpop.permute.xlu2 %1585 }
 0x2da   : > { %4152 = vmatmul.msk.bf16.gmra.mxu2 %vm2351_vm13, %v1731_v30  ;;  %v1700_v48 = vsel %vm1680_vm11, %v5434_v42, %v1586_v36 }
 0x2dd   : > { %v2550_v50 = vpop.f32.mrf.mxu2 }
 0x2de   : > { %v5735_v9 = vpop.f32.mrf.mxu3  ;;  %v2223_v59 = vpop.permute.xlu1 %2222 }
 0x2e0   : > { %v2393_v28 = vpop.f32.mrf.mxu0  ;;  %v2143_v47 = vpop.permute.xlu0 %2142 }
 0x2e1   : > { %v2255_v2 = vsel %vm1680_vm11, %v5429_v31, %v2143_v47  ;;  %v2551_v5 = vadd.f32 %v2550_v50, %v2393_v28  ;;  %v3098_v34 = vpop.permute.xlu2 %3097 }
 0x2e2   : > { %v2287_v17 = vsel %vm1713_vm12, %v2255_v2, %v2223_v59 }
 0x2e3   : > { %4112 = vmatmul.msk.bf16.gmra.mxu1 %vm2351_vm13, %v2287_v17  ;;  %4268 = vmatmul.msk.bf16.gmra.mxu3 %vm2351_vm13, %v3160_v33 }
 0x2e5   : > { %v2552_v63 = vpop.f32.mrf.mxu2 }
 0x2e6   : > { %v3265_v60 = vpop.f32.mrf.mxu3  ;;  %v3018_v15 = vpop.permute.xlu1 %3017 }
 0x2e7   : > { %v3345_v31 = vadd.f32 %v3265_v60, %v2551_v5  ;;  %v3130_v42 = vsel %vm1680_vm11, %v5457_v3, %v3018_v15 }
 0x2e8   : > { %v2395_v22 = vpop.f32.mrf.mxu0  ;;  %v1667_v7 = vpop.permute.xlu0 %1666  ;;  %v3162_v57 = vsel %vm1713_vm12, %v3130_v42, %v3098_v34 }
 0x2e9   : > { %v1733_v35 = vsel %vm1713_vm12, %v1700_v48, %v1667_v7  ;;  %v2553_v10 = vadd.f32 %v2552_v63, %v2395_v22  ;;  %v3381_v19 = vadd.f32 %v5753_v44, %v3345_v31  ;;  %v3020_v2 = vpop.permute.xlu2 %3019 }
 0x2ea   : > { %4153 = vmatmul.msk.bf16.gmra.mxu2 %vm2351_vm13, %v1733_v35  ;;  %v3132_v60 = vsel %vm1680_vm11, %v5483_v1, %v3020_v2 }
 0x2eb   : > { %v3413_v53 = vmax.f32 %v3381_v19, 0.0 }
 0x2ed   : > { %v2555_v13 = vpop.f32.mrf.mxu2 }
 0x2ee   : > { %v3267_v20 = vpop.f32.mrf.mxu3  ;;  %v1669_v3 = vpop.permute.xlu1 %1668 }
 0x2ef   : > { %v3346_v39 = vadd.f32 %v3267_v20, %v2553_v10 }
 0x2f0   : > { %v2398_v52 = vpop.f32.mrf.mxu0  ;;  %v1588_v49 = vpop.permute.xlu0 %1587 }
 0x2f1   : > { %v3382_v26 = vadd.f32 %v5753_v44, %v3346_v39  ;;  %v1702_v38 = vsel %vm1680_vm11, %v5476_v0, %v1588_v49  ;;  %v2556_v51 = vadd.f32 %v2555_v13, %v2398_v52  ;;  %v1671_v20 = vpop.permute.xlu2 %1670 }
 0x2f2   : > { %v1735_v58 = vsel %vm1713_vm12, %v1702_v38, %v1669_v3 }
 0x2f3   : > { %v3414_v18 = vmax.f32 %v3382_v26, 0.0  ;;  %4269 = vmatmul.msk.bf16.gmra.mxu3 %vm2351_vm13, %v3162_v57 }
 0x2f5   : > { %v3445_v30 = vpack.c.bf16 %v3414_v18, %v3413_v53  ;;  %v2557_v21 = vpop.f32.mrf.mxu2 }
 0x2f6   : > { %v3270_v54 = vpop.f32.mrf.mxu3  ;;  %v1590_v7 = vpop.permute.xlu1 %1589 }
 0x2f7   : > { %4284 = vmatmul.msk.bf16.vlgmr.msrb.gmra.mxu1 %vm1680_vm11, %v3445_v30  ;;  %v3347_v28 = vadd.f32 %v3270_v54, %v2556_v51  ;;  %v1704_v10 = vsel %vm1680_vm11, %v5504_v4, %v1590_v7 }
 0x2f8   : > { %v2400_v50 = vpop.f32.mrf.mxu0  ;;  %v3100_v36 = vpop.permute.xlu0 %3099  ;;  %v1737_v42 = vsel %vm1713_vm12, %v1704_v10, %v1671_v20 }
 0x2f9   : > { %v2558_v47 = vadd.f32 %v2557_v21, %v2400_v50  ;;  %v3383_v33 = vadd.f32 %v5753_v44, %v3347_v28  ;;  %v3164_v22 = vsel %vm1713_vm12, %v3132_v60, %v3100_v36  ;;  %v1592_v50 = vpop.permute.xlu2 %1591 }
 0x2fa   : > { %4154 = vmatmul.msk.bf16.gmra.mxu2 %vm2351_vm13, %v1735_v58 }
 0x2fb   : > { %v3415_v5 = vmax.f32 %v3383_v33, 0.0 }
 0x2fd   : > { %v2560_v59 = vpop.f32.mrf.mxu2 }
 0x2fe   : > { %v3272_v17 = vpop.f32.mrf.mxu3  ;;  %v3102_v30 = vpop.permute.xlu1 %3101 }
 0x2ff   : > { %v3348_v63 = vadd.f32 %v3272_v17, %v2558_v47 }
 0x300   : > { %v2403_v0 = vpop.f32.mrf.mxu0  ;;  %v3022_v52 = vpop.permute.xlu0 %3021 }
 0x301   : > { %v3384_v48 = vadd.f32 %v5753_v44, %v3348_v63  ;;  %v2561_v1 = vadd.f32 %v2560_v59, %v2403_v0  ;;  %v3134_v53 = vsel %vm1680_vm11, %v5531_v62, %v3022_v52  ;;  %v1706_v62 = vsel %vm1680_vm11, %v5524_v12, %v1592_v50 }
 0x302   : > { %v3166_v38 = vsel %vm1713_vm12, %v3134_v53, %v3102_v30 }
 0x303   : > { %v3416_v35 = vmax.f32 %v3384_v48, 0.0  ;;  %4270 = vmatmul.msk.bf16.gmra.mxu3 %vm2351_vm13, %v3164_v22 }
 0x305   : > { %v2562_v31 = vpop.f32.mrf.mxu2  ;;  %v3446_v15 = vpack.c.bf16 %v3416_v35, %v3415_v5  ;;  %v3104_v35 = vpop.permute.xlu2 %3103 }
 0x306   : > { %v3275_v13 = vpop.f32.mrf.mxu3  ;;  %v3024_v36 = vpop.permute.xlu1 %3023 }
 0x307   : > { %4285 = vmatmul.msk.bf16.gmra.mxu1 %vm1680_vm11, %v3446_v15  ;;  %v3349_v39 = vadd.f32 %v3275_v13, %v2561_v1  ;;  %v3136_v48 = vsel %vm1680_vm11, %v5553_v29, %v3024_v36 }
 0x308   : > { %v2405_v19 = vpop.f32.mrf.mxu0  ;;  %v1673_v28 = vpop.permute.xlu0 %1672 }
 0x309   : > { %v2563_v34 = vadd.f32 %v2562_v31, %v2405_v19  ;;  %v3385_v4 = vadd.f32 %v5753_v44, %v3349_v39  ;;  %v1739_v59 = vsel %vm1713_vm12, %v1706_v62, %v1673_v28  ;;  %v3168_v31 = vsel %vm1713_vm12, %v3136_v48, %v3104_v35 }
 0x30a   : > { %4155 = vmatmul.msk.bf16.gmra.mxu2 %vm2351_vm13, %v1737_v42 }
 0x30b   : > { %v3417_v54 = vmax.f32 %v3385_v4, 0.0 }
 0x30d   : > { %v2565_v26 = vpop.f32.mrf.mxu2  ;;  %v3026_v4 = vpop.permute.xlu2 %3025 }
 0x30e   : > { %v3277_v57 = vpop.f32.mrf.mxu3  ;;  %v1675_v42 = vpop.permute.xlu1 %1674 }
 0x30f   : > { %v3350_v18 = vadd.f32 %v3277_v57, %v2563_v34 }
 0x310   : > { %v2408_v49 = vpop.f32.mrf.mxu0  ;;  %v1594_v15 = vpop.permute.xlu0 %1593 }
 0x311   : > { %v3386_v21 = vadd.f32 %v5753_v44, %v3350_v18  ;;  %v2566_v2 = vadd.f32 %v2565_v26, %v2408_v49  ;;  %v1708_v1 = vsel %vm1680_vm11, %v5578_v11, %v1594_v15 }
 0x312   : > { %v1741_v34 = vsel %vm1713_vm12, %v1708_v1, %v1675_v42 }
 0x313   : > { %v3418_v3 = vmax.f32 %v3386_v21, 0.0  ;;  %4271 = vmatmul.msk.bf16.gmra.mxu3 %vm2351_vm13, %v3166_v38  ;;  %v3138_v38 = vsel %vm1680_vm11, %v5583_v16, %v3026_v4 }
 0x315   : > { %v2567_v51 = vpop.f32.mrf.mxu2  ;;  %v3447_v58 = vpack.c.bf16 %v3418_v3, %v3417_v54 }
 0x316   : > { %v3280_v47 = vpop.f32.mrf.mxu3  ;;  %v1596_v50 = vpop.permute.xlu1 %1595 }
 0x317   : > { %4286 = vmatmul.msk.bf16.gmra.mxu1 %vm1680_vm11, %v3447_v58  ;;  %v3351_v33 = vadd.f32 %v3280_v47, %v2566_v2  ;;  %v1710_v62 = vsel %vm1680_vm11, %v5605_v55, %v1596_v50  ;;  %v1677_v2 = vpop.permute.xlu2 %1676 }
 0x318   : > { %v2410_v17 = vpop.f32.mrf.mxu0  ;;  %v3106_v49 = vpop.permute.xlu0 %3105 }
 0x319   : > { %v2568_v63 = vadd.f32 %v2567_v51, %v2410_v17  ;;  %v3387_v22 = vadd.f32 %v5753_v44, %v3351_v33  ;;  %v3170_v3 = vsel %vm1713_vm12, %v3138_v38, %v3106_v49  ;;  %v1743_v33 = vsel %vm1713_vm12, %v1710_v62, %v1677_v2 }
 0x31a   : > { %4156 = vmatmul.msk.bf16.gmra.mxu2 %vm2351_vm13, %v1739_v59 }
 0x31b   : > { %v3419_v10 = vmax.f32 %v3387_v22, 0.0 }
 0x31d   : > { %v2570_v0 = vpop.f32.mrf.mxu2 }
 0x31e   : > { %v3282_v60 = vpop.f32.mrf.mxu3  ;;  %v3108_v35 = vpop.permute.xlu1 %3107 }
 0x31f   : > { %v3352_v7 = vadd.f32 %v3282_v60, %v2568_v63 }
 0x320   : > { %v2413_v5 = vpop.f32.mrf.mxu1  ;;  %v3028_v63 = vpop.permute.xlu0 %3027 }
 0x321   : > { %v3388_v12 = vadd.f32 %v5753_v44, %v3352_v7  ;;  %v2571_v52 = vadd.f32 %v2570_v0, %v2413_v5  ;;  %v3140_v22 = vsel %vm1680_vm11, %v5632_v32, %v3028_v63 }
 0x323   : > { %v3420_v13 = vmax.f32 %v3388_v12, 0.0  ;;  %4272 = vmatmul.msk.bf16.gmra.mxu3 %vm2351_vm13, %v3168_v31  ;;  %v3172_v31 = vsel %vm1713_vm12, %v3140_v22, %v3108_v35 }
 0x325   : > { %v2572_v20 = vpop.f32.mrf.mxu2  ;;  %v3448_v19 = vpack.c.bf16 %v3420_v13, %v3419_v10  ;;  %v1598_v13 = vpop.permute.xlu2 %1597 }
 0x326   : > { %v3285_v29 = vpop.f32.mrf.mxu3  ;;  %v1712_v32 = vsel %vm1680_vm11, %v5627_v41, %v1598_v13  ;;  %v302_v13 = vld [vmem:[%s4717_s16] sm:$0xff]  }
 0x327   : > { %4287 = vmatmul.msk.bf16.gmra.mxu1 %vm1680_vm11, %v3448_v19  ;;  %v3353_v26 = vadd.f32 %v3285_v29, %v2571_v52 }
 0x328   : > { %v2415_v39 = vpop.f32.mrf.mxu1  ;;  %v1679_v1 = vpop.permute.xlu0 %1678 }
 0x329   : > { %v2573_v57 = vadd.f32 %v2572_v20, %v2415_v39  ;;  %v3389_v30 = vadd.f32 %v5753_v44, %v3353_v26  ;;  %v1745_v39 = vsel %vm1713_vm12, %v1712_v32, %v1679_v1  ;;  %v3618_v32 = vunpack.c.l.bf16 %v302_v13 }
 0x32a   : > { %4157 = vmatmul.msk.bf16.gmra.mxu2 %vm2351_vm13, %v1741_v34 }
 0x32b   : > { %v3421_v51 = vmax.f32 %v3389_v30, 0.0 }
 0x32d   : > { %v2575_v53 = vpop.f32.mrf.mxu2 }
 0x32e   : > { %v3287_v18 = vpop.f32.mrf.mxu3  ;;  %v3030_v34 = vpop.permute.xlu1 %3029 }
 0x32f   : > { %v3354_v21 = vadd.f32 %v3287_v18, %v2573_v57  ;;  %v3142_v4 = vsel %vm1680_vm11, %v5691_v46, %v3030_v34  ;;  %v3110_v18 = vpop.permute.xlu2 %3109 }
 0x330   : > { %v2418_v11 = vpop.f32.mrf.mxu1  ;;  %v3174_v41 = vsel %vm1713_vm12, %v3142_v4, %v3110_v18 }
 0x331   : > { %v3390_v54 = vadd.f32 %v5753_v44, %v3354_v21  ;;  %v2576_v16 = vadd.f32 %v2575_v53, %v2418_v11 }
 0x333   : > { %v3422_v58 = vmax.f32 %v3390_v54, 0.0  ;;  %4273 = vmatmul.msk.bf16.gmra.mxu3 %vm2351_vm13, %v3170_v3 }
 0x335   : > { %v2577_v28 = vpop.f32.mrf.mxu2  ;;  %v3449_v47 = vpack.c.bf16 %v3422_v58, %v3421_v51 }
 0x336   : > { %v3290_v59 = vpop.f32.mrf.mxu3 }
 0x337   : > { %4288 = vmatmul.msk.bf16.gmra.mxu1 %vm1680_vm11, %v3449_v47  ;;  %v3355_v36 = vadd.f32 %v3290_v59, %v2576_v16 }
 0x338   : > { %v2420_v17 = vpop.f32.mrf.mxu1 }
 0x339   : > { %v2578_v0 = vadd.f32 %v2577_v28, %v2420_v17  ;;  %v3391_v55 = vadd.f32 %v5753_v44, %v3355_v36 }
 0x33a   : > { %4158 = vmatmul.msk.bf16.gmra.mxu2 %vm2351_vm13, %v1743_v33 }
 0x33b   : > { %v3423_v15 = vmax.f32 %v3391_v55, 0.0 }
 0x33d   : > { %v2580_v60 = vpop.f32.mrf.mxu2 }
 0x33e   : > { %v3292_v48 = vpop.f32.mrf.mxu3 }
 0x33f   : > { %v3356_v7 = vadd.f32 %v3292_v48, %v2578_v0 }
 0x340   : > { %v2423_v5 = vpop.f32.mrf.mxu1 }
 0x341   : > { %v3392_v12 = vadd.f32 %v5753_v44, %v3356_v7  ;;  %v2581_v52 = vadd.f32 %v2580_v60, %v2423_v5 }
 0x343   : > { %v3424_v10 = vmax.f32 %v3392_v12, 0.0  ;;  %4274 = vmatmul.msk.bf16.gmra.mxu3 %vm2351_vm13, %v3172_v31 }
 0x345   : > { %v2582_v20 = vpop.f32.mrf.mxu2  ;;  %v3450_v19 = vpack.c.bf16 %v3424_v10, %v3423_v15 }
 0x346   : > { %v3295_v29 = vpop.f32.mrf.mxu3 }
 0x347   : > { %4289 = vmatmul.msk.bf16.gmra.mxu1 %vm1680_vm11, %v3450_v19  ;;  %v3357_v26 = vadd.f32 %v3295_v29, %v2581_v52  ;;  %v5837_v19 = vld [vmem:[%s5997_s6] ss:$0 sm:$0xff] }
 0x348   : > { %v2425_v42 = vpop.f32.mrf.mxu1 }
 0x349   : > { %v2583_v57 = vadd.f32 %v2582_v20, %v2425_v42  ;;  %v3393_v30 = vadd.f32 %v5753_v44, %v3357_v26 }
 0x34a   : > { %4159 = vmatmul.msk.bf16.gmra.mxu2 %vm2351_vm13, %v1745_v39 }
 0x34b   : > { %v3425_v54 = vmax.f32 %v3393_v30, 0.0 }
 0x34d   : > { %v2585_v53 = vpop.f32.mrf.mxu2 }
 0x34e   : > { %v3297_v49 = vpop.f32.mrf.mxu3 }
 0x34f   : > { %v3358_v21 = vadd.f32 %v3297_v49, %v2583_v57  ;;  %v3619_v49 = vunpack.c.h.bf16 %v302_v13 }
 0x350   : > { %v2428_v11 = vpop.f32.mrf.mxu1 }
 0x351   : > { %v3394_v38 = vadd.f32 %v5753_v44, %v3358_v21  ;;  %v2586_v28 = vadd.f32 %v2585_v53, %v2428_v11 }
 0x353   : > { %v3426_v3 = vmax.f32 %v3394_v38, 0.0  ;;  %4275 = vmatmul.msk.bf16.gmra.mxu3 %vm2351_vm13, %v3174_v41 }
 0x355   : > { %v2587_v50 = vpop.f32.mrf.mxu2  ;;  %v3451_v51 = vpack.c.bf16 %v3426_v3, %v3425_v54 }
 0x356   : > { %v3300_v58 = vpop.f32.mrf.mxu3 }
 0x357   : > { %4290 = vmatmul.msk.bf16.gmra.mxu1 %vm1680_vm11, %v3451_v51  ;;  %v3359_v47 = vadd.f32 %v3300_v58, %v2586_v28 }
 0x358   : > { %v2430_v46 = vpop.f32.mrf.mxu1 }
 0x359   : > { %v2588_v62 = vadd.f32 %v2587_v50, %v2430_v46  ;;  %v3395_v17 = vadd.f32 %v5753_v44, %v3359_v47 }
 0x35b   : > { %v3427_v63 = vmax.f32 %v3395_v17, 0.0 }
 0x35d   : > { %v2590_v59 = vpop.f32.mrf.mxu2 }
 0x35e   : > { %v3302_v2 = vpop.f32.mrf.mxu3 }
 0x35f   : > { %v3360_v16 = vadd.f32 %v3302_v2, %v2588_v62 }
 0x360   : > { %v2433_v33 = vpop.f32.mrf.mxu1 }
 0x361   : > { %v3396_v36 = vadd.f32 %v5753_v44, %v3360_v16  ;;  %v2591_v55 = vadd.f32 %v2590_v59, %v2433_v33 }
 0x363   : > { %v3428_v0 = vmax.f32 %v3396_v36, 0.0 }
 0x365   : > { %v3452_v60 = vpack.c.bf16 %v3428_v0, %v3427_v63  ;;  %v2592_v48 = vpop.f32.mrf.mxu2 }
 0x366   : > { %v3305_v22 = vpop.f32.mrf.mxu3 }
 0x367   : > { %4291 = vmatmul.msk.bf16.gmra.mxu1 %vm1680_vm11, %v3452_v60  ;;  %v3361_v5 = vadd.f32 %v3305_v22, %v2591_v55 }
 0x368   : > { %v2435_v7 = vpop.f32.mrf.mxu1 }
 0x369   : > { %v2593_v35 = vadd.f32 %v2592_v48, %v2435_v7  ;;  %v3397_v15 = vadd.f32 %v5753_v44, %v3361_v5 }
 0x36b   : > { %v3429_v1 = vmax.f32 %v3397_v15, 0.0 }
 0x36d   : > { %v2595_v12 = vpop.f32.mrf.mxu2 }
 0x36e   : > { %v3307_v31 = vpop.f32.mrf.mxu3  ;;  %v2596_v53 = vadd.f32 %v2595_v12, %v5526_v56  ;;  %v304_v56 = vld [vmem:[%s4717_s16 + $0x8] sm:$0xff]  }
 0x36f   : > { %v3362_v10 = vadd.f32 %v3307_v31, %v2593_v35  ;;  %v3620_v47 = vunpack.c.l.bf16 %v304_v56  ;;  %v3621_v0 = vunpack.c.h.bf16 %v304_v56  ;;  %v306_v31 = vld [vmem:[%s4717_s16 + $0x10] sm:$0xff]  }
 0x371   : > { %v3398_v20 = vadd.f32 %v5753_v44, %v3362_v10 }
 0x373   : > { %v3430_v29 = vmax.f32 %v3398_v20, 0.0  ;;  %v3622_v20 = vunpack.c.l.bf16 %v306_v31 }
 0x374   : > { %v3538_v42 = vpop.f32.mrf.mxu1 }
 0x375   : > { %v3453_v39 = vpack.c.bf16 %v3430_v29, %v3429_v1  ;;  %v3539_v52 = vadd.f32 %v5837_v19, %v3538_v42  ;;  %v2597_v34 = vpop.f32.mrf.mxu2 }
 0x376   : > { %v3310_v26 = vpop.f32.mrf.mxu3  ;;  %v2598_v21 = vadd.f32 %v2597_v34, %v5557_v27 }
 0x377   : > { %v3650_v57 = vadd.f32 %v3618_v32, %v3539_v52  ;;  %4292 = vmatmul.msk.bf16.gmra.mxu1 %vm1680_vm11, %v3453_v39  ;;  %v3363_v18 = vadd.f32 %v3310_v26, %v2596_v53 }
 0x379   : > { %v3682_v4 = vmax.f32 %v3650_v57, 0.0  ;;  %v3399_v54 = vadd.f32 %v5753_v44, %v3363_v18  ;;  %v3623_v57 = vunpack.c.h.bf16 %v306_v31 }
 0x37b   : > { %3714 = vst [vmem:[%s5843_s12] sm:$0xff] %v3682_v4  ;;  %v3431_v46 = vmax.f32 %v3399_v54, 0.0 }
 0x37c   : > { %v3540_v30 = vpop.f32.mrf.mxu1 }
 0x37d   : > { %v3541_v11 = vadd.f32 %v5837_v19, %v3540_v30  ;;  %v2600_v41 = vpop.f32.mrf.mxu2 }
 0x37e   : > { %v3312_v38 = vpop.f32.mrf.mxu3  ;;  %v2601_v33 = vadd.f32 %v2600_v41, %v5588_v45 }
 0x37f   : > { %v3651_v3 = vadd.f32 %v3619_v49, %v3541_v11  ;;  %v3364_v50 = vadd.f32 %v3312_v38, %v2598_v21  ;;  %v308_v38 = vld [vmem:[%s4717_s16 + $0x18] sm:$0xff]  }
 0x380   : > { %v3624_v56 = vunpack.c.l.bf16 %v308_v38 }
 0x381   : > { %v3683_v51 = vmax.f32 %v3651_v3, 0.0  ;;  %v3400_v58 = vadd.f32 %v5753_v44, %v3364_v50 }
 0x383   : > { %3715 = vst [vmem:[%s5843_s12 + $0x8] sm:$0xff] %v3683_v51  ;;  %v3432_v28 = vmax.f32 %v3400_v58, 0.0 }
 0x384   : > { %v3543_v62 = vpop.f32.mrf.mxu1 }
 0x385   : > { %v3454_v59 = vpack.c.bf16 %v3432_v28, %v3431_v46  ;;  %v3544_v27 = vadd.f32 %v5837_v19, %v3543_v62  ;;  %v2602_v2 = vpop.f32.mrf.mxu2 }
 0x386   : > { %v3315_v17 = vpop.f32.mrf.mxu3  ;;  %v2603_v48 = vadd.f32 %v2602_v2, %v5621_v24  ;;  %v3625_v2 = vunpack.c.h.bf16 %v308_v38 }
 0x387   : > { %v3652_v16 = vadd.f32 %v3620_v47, %v3544_v27  ;;  %4293 = vmatmul.msk.bf16.gmra.mxu1 %vm1680_vm11, %v3454_v59  ;;  %v3365_v63 = vadd.f32 %v3315_v17, %v2601_v33 }
 0x389   : > { %v3684_v36 = vmax.f32 %v3652_v16, 0.0  ;;  %v3401_v5 = vadd.f32 %v5753_v44, %v3365_v63 }
 0x38b   : > { %3716 = vst [vmem:[%s5843_s12 + $0x10] sm:$0xff] %v3684_v36  ;;  %v3433_v10 = vmax.f32 %v3401_v5, 0.0 }
 0x38c   : > { %v3545_v60 = vpop.f32.mrf.mxu1 }
 0x38d   : > { %v3546_v22 = vadd.f32 %v5837_v19, %v3545_v60  ;;  %v2605_v55 = vpop.f32.mrf.mxu2 }
 0x38e   : > { %v3317_v7 = vpop.f32.mrf.mxu3  ;;  %v2606_v52 = vadd.f32 %v2605_v55, %v5645_v23 }
 0x38f   : > { %v3653_v35 = vadd.f32 %v3621_v0, %v3546_v22  ;;  %v3366_v12 = vadd.f32 %v3317_v7, %v2603_v48  ;;  %v310_v22 = vld [vmem:[%s4717_s16 + $0x20] sm:$0xff]  }
 0x391   : > { %v3685_v15 = vmax.f32 %v3653_v35, 0.0  ;;  %v3402_v45 = vadd.f32 %v5753_v44, %v3366_v12  ;;  %v3626_v35 = vunpack.c.l.bf16 %v310_v22 }
 0x393   : > { %3717 = vst [vmem:[%s5843_s12 + $0x18] sm:$0xff] %v3685_v15  ;;  %v3434_v13 = vmax.f32 %v3402_v45, 0.0 }
 0x394   : > { %v3548_v1 = vpop.f32.mrf.mxu1 }
 0x395   : > { %v3455_v29 = vpack.c.bf16 %v3434_v13, %v3433_v10  ;;  %v3549_v24 = vadd.f32 %v5837_v19, %v3548_v1  ;;  %v2607_v32 = vpop.f32.mrf.mxu2 }
 0x396   : > { %v3320_v42 = vpop.f32.mrf.mxu3  ;;  %v2608_v4 = vadd.f32 %v2607_v32, %v5666_v43 }
 0x397   : > { %v3654_v39 = vadd.f32 %v3622_v20, %v3549_v24  ;;  %4294 = vmatmul.msk.bf16.gmra.mxu1 %vm1680_vm11, %v3455_v29  ;;  %v3367_v26 = vadd.f32 %v3320_v42, %v2606_v52  ;;  %v3627_v29 = vunpack.c.h.bf16 %v310_v22 }
 0x399   : > { %v3686_v34 = vmax.f32 %v3654_v39, 0.0  ;;  %v3403_v21 = vadd.f32 %v5753_v44, %v3367_v26 }
 0x39b   : > { %3718 = vst [vmem:[%s5843_s12 + $0x20] sm:$0xff] %v3686_v34  ;;  %v3435_v3 = vmax.f32 %v3403_v21, 0.0 }
 0x39c   : > { %v3550_v53 = vpop.f32.mrf.mxu1 }
 0x39d   : > { %v3551_v18 = vadd.f32 %v5837_v19, %v3550_v53  ;;  %v2610_v49 = vpop.f32.mrf.mxu2  ;;  %v312_v53 = vld [vmem:[%s4717_s16 + $0x28] sm:$0xff]  }
 0x39e   : > { %v3322_v30 = vpop.f32.mrf.mxu3  ;;  %v2611_v62 = vadd.f32 %v2610_v49, %v5685_v40 }
 0x39f   : > { %v3655_v11 = vadd.f32 %v3623_v57, %v3551_v18  ;;  %v3368_v41 = vadd.f32 %v3322_v30, %v2608_v4  ;;  %v3628_v30 = vunpack.c.l.bf16 %v312_v53 }
 0x3a1   : > { %v3687_v54 = vmax.f32 %v3655_v11, 0.0  ;;  %v3404_v23 = vadd.f32 %v5753_v44, %v3368_v41 }
 0x3a3   : > { %3719 = vst [vmem:[%s5843_s12 + $0x28] sm:$0xff] %v3687_v54  ;;  %v3436_v50 = vmax.f32 %v3404_v23, 0.0 }
 0x3a4   : > { %v3553_v51 = vpop.f32.mrf.mxu1 }
 0x3a5   : > { %v3456_v58 = vpack.c.bf16 %v3436_v50, %v3435_v3  ;;  %v3554_v43 = vadd.f32 %v5837_v19, %v3553_v51  ;;  %v2612_v46 = vpop.f32.mrf.mxu2 }
 0x3a6   : > { %v3325_v28 = vpop.f32.mrf.mxu3  ;;  %v2613_v16 = vadd.f32 %v2612_v46, %v5697_v6 }
 0x3a7   : > { %v3656_v47 = vadd.f32 %v3624_v56, %v3554_v43  ;;  %4295 = vmatmul.msk.bf16.gmra.mxu1 %vm1680_vm11, %v3456_v58  ;;  %v3369_v27 = vadd.f32 %v3325_v28, %v2611_v62  ;;  %v3629_v56 = vunpack.c.h.bf16 %v312_v53 }
 0x3a9   : > { %v3688_v59 = vmax.f32 %v3656_v47, 0.0  ;;  %v3405_v0 = vadd.f32 %v5753_v44, %v3369_v27  ;;  %v314_v27 = vld [vmem:[%s4717_s16 + $0x30] sm:$0xff]  }
 0x3ab   : > { %3720 = vst [vmem:[%s5843_s12 + $0x30] sm:$0xff] %v3688_v59  ;;  %v3437_v7 = vmax.f32 %v3405_v0, 0.0 }
 0x3ac   : > { %v3555_v17 = vpop.f32.mrf.mxu1 }
 0x3ad   : > { %v3556_v33 = vadd.f32 %v5837_v19, %v3555_v17  ;;  %v2615_v36 = vpop.f32.mrf.mxu2 }
 0x3ae   : > { %v3327_v63 = vpop.f32.mrf.mxu3  ;;  %v2616_v13 = vadd.f32 %v2615_v36, %v5713_v8 }
 0x3af   : > { %v3657_v60 = vadd.f32 %v3625_v2, %v3556_v33  ;;  %v3370_v48 = vadd.f32 %v3327_v63, %v2613_v16  ;;  %v3630_v33 = vunpack.c.l.bf16 %v314_v27 }
 0x3b1   : > { %v3689_v55 = vmax.f32 %v3657_v60, 0.0  ;;  %v3406_v40 = vadd.f32 %v5753_v44, %v3370_v48 }
 0x3b3   : > { %3721 = vst [vmem:[%s5843_s12 + $0x38] sm:$0xff] %v3689_v55  ;;  %v3438_v5 = vmax.f32 %v3406_v40, 0.0 }
 0x3b4   : > { %v3558_v12 = vpop.f32.mrf.mxu1 }
 0x3b5   : > { %v3457_v31 = vpack.c.bf16 %v3438_v5, %v3437_v7  ;;  %v3559_v6 = vadd.f32 %v5837_v19, %v3558_v12  ;;  %v2617_v15 = vpop.f32.mrf.mxu2  ;;  %v3631_v7 = vunpack.c.h.bf16 %v314_v27 }
 0x3b6   : > { %v3330_v45 = vpop.f32.mrf.mxu3  ;;  %v2618_v32 = vadd.f32 %v2617_v15, %v5725_v25 }
 0x3b7   : > { %v3658_v10 = vadd.f32 %v3626_v35, %v3559_v6  ;;  %4296 = vmatmul.msk.bf16.gmra.mxu1 %vm1680_vm11, %v3457_v31  ;;  %v3371_v1 = vadd.f32 %v3330_v45, %v2616_v13 }
 0x3b9   : > { %v3690_v20 = vmax.f32 %v3658_v10, 0.0  ;;  %v3407_v34 = vadd.f32 %v5753_v44, %v3371_v1  ;;  %v316_v10 = vld [vmem:[%s4717_s16 + $0x38] sm:$0xff]  }
 0x3bb   : > { %3722 = vst [vmem:[%s5843_s12 + $0x40] sm:$0xff] %v3690_v20  ;;  %v3439_v18 = vmax.f32 %v3407_v34, 0.0 }
 0x3bc   : > { %v3560_v24 = vpop.f32.mrf.mxu1 }
 0x3bd   : > { %v3561_v42 = vadd.f32 %v5837_v19, %v3560_v24  ;;  %v2620_v39 = vpop.f32.mrf.mxu2 }
 0x3be   : > { %v3332_v52 = vpop.f32.mrf.mxu3  ;;  %v2621_v23 = vadd.f32 %v2620_v39, %v5705_v61 }
 0x3bf   : > { %v3659_v26 = vadd.f32 %v3627_v29, %v3561_v42  ;;  %v3372_v57 = vadd.f32 %v3332_v52, %v2618_v32  ;;  %v3632_v29 = vunpack.c.l.bf16 %v316_v10  ;;  %v3633_v52 = vunpack.c.h.bf16 %v316_v10 }
 0x3c1   : > { %v3691_v4 = vmax.f32 %v3659_v26, 0.0  ;;  %v3408_v8 = vadd.f32 %v5753_v44, %v3372_v57  ;;  %v318_v57 = vld [vmem:[%s4717_s16 + $0x40] sm:$0xff]  }
 0x3c3   : > { %3723 = vst [vmem:[%s5843_s12 + $0x48] sm:$0xff] %v3691_v4  ;;  %v3440_v49 = vmax.f32 %v3408_v8, 0.0  ;;  %v3634_v4 = vunpack.c.l.bf16 %v318_v57 }
 0x3c4   : > { %v3563_v21 = vpop.f32.mrf.mxu1 }
 0x3c5   : > { %v3458_v11 = vpack.c.bf16 %v3440_v49, %v3439_v18  ;;  %v3564_v25 = vadd.f32 %v5837_v19, %v3563_v21  ;;  %v2622_v41 = vpop.f32.mrf.mxu2  ;;  %v3635_v21 = vunpack.c.h.bf16 %v318_v57 }
 0x3c6   : > { %v3335_v38 = vpop.f32.mrf.mxu3  ;;  %v2623_v58 = vadd.f32 %v2622_v41, %v5715_v14 }
 0x3c7   : > { %v3660_v54 = vadd.f32 %v3628_v30, %v3564_v25  ;;  %4297 = vmatmul.msk.bf16.gmra.mxu1 %vm1680_vm11, %v3458_v11  ;;  %v3373_v50 = vadd.f32 %v3335_v38, %v2621_v23  ;;  %v320_v38 = vld [vmem:[%s4717_s16 + $0x48] sm:$0xff]  }
 0x3c8   : > { %v3636_v23 = vunpack.c.l.bf16 %v320_v38 }
 0x3c9   : > { %v3692_v3 = vmax.f32 %v3660_v54, 0.0  ;;  %v3409_v28 = vadd.f32 %v5753_v44, %v3373_v50 }
 0x3cb   : > { %3724 = vst [vmem:[%s5843_s12 + $0x50] sm:$0xff] %v3692_v3  ;;  %v3441_v17 = vmax.f32 %v3409_v28, 0.0 }
 0x3cc   : > { %v3565_v51 = vpop.f32.mrf.mxu1 }
 0x3cd   : > { %v3566_v43 = vadd.f32 %v5837_v19, %v3565_v51  ;;  %v2625_v59 = vpop.f32.mrf.mxu2 }
 0x3ce   : > { %v3337_v46 = vpop.f32.mrf.mxu3  ;;  %v2626_v48 = vadd.f32 %v2625_v59, %v5727_v37 }
 0x3cf   : > { %v3661_v47 = vadd.f32 %v3629_v56, %v3566_v43  ;;  %v3374_v62 = vadd.f32 %v3337_v46, %v2623_v58  ;;  %v3637_v58 = vunpack.c.h.bf16 %v320_v38 }
 0x3d1   : > { %v3693_v2 = vmax.f32 %v3661_v47, 0.0  ;;  %v3410_v61 = vadd.f32 %v5753_v44, %v3374_v62  ;;  %v322_v47 = vld [vmem:[%s4717_s16 + $0x50] sm:$0xff]  }
 0x3d2   : > { %v3638_v59 = vunpack.c.l.bf16 %v322_v47 }
 0x3d3   : > { %3725 = vst [vmem:[%s5843_s12 + $0x58] sm:$0xff] %v3693_v2  ;;  %v3442_v16 = vmax.f32 %v3410_v61, 0.0 }
 0x3d4   : > { %v3568_v36 = vpop.f32.mrf.mxu1 }
 0x3d5   : > { %v3459_v63 = vpack.c.bf16 %v3442_v16, %v3441_v17  ;;  %v3569_v14 = vadd.f32 %v5837_v19, %v3568_v36  ;;  %v2627_v55 = vpop.f32.mrf.mxu2  ;;  %v3639_v16 = vunpack.c.h.bf16 %v322_v47 }
 0x3d6   : > { %v3340_v0 = vpop.f32.mrf.mxu3  ;;  %v2628_v35 = vadd.f32 %v2627_v55, %v5735_v9 }
 0x3d7   : > { %v3662_v60 = vadd.f32 %v3630_v33, %v3569_v14  ;;  %4298 = vmatmul.msk.bf16.gmra.mxu1 %vm1680_vm11, %v3459_v63  ;;  %v3375_v40 = vadd.f32 %v3340_v0, %v2626_v48  ;;  %v324_v14 = vld [vmem:[%s4717_s16 + $0x58] sm:$0xff]  }
 0x3d9   : > { %v3694_v22 = vmax.f32 %v3662_v60, 0.0  ;;  %v3411_v6 = vadd.f32 %v5753_v44, %v3375_v40  ;;  %v3640_v60 = vunpack.c.l.bf16 %v324_v14 }
 0x3db   : > { %3726 = vst [vmem:[%s5843_s12 + $0x60] sm:$0xff] %v3694_v22  ;;  %v3443_v20 = vmax.f32 %v3411_v6, 0.0 }
 0x3dc   : > { %v3570_v5 = vpop.f32.mrf.mxu1 }
 0x3dd   : > { %v3571_v12 = vadd.f32 %v5837_v19, %v3570_v5 }
 0x3de   : > { %v3342_v31 = vpop.f32.mrf.mxu3 }
 0x3df   : > { %v3663_v15 = vadd.f32 %v3631_v7, %v3571_v12  ;;  %v3376_v45 = vadd.f32 %v3342_v31, %v2628_v35  ;;  %v3641_v7 = vunpack.c.h.bf16 %v324_v14  ;;  %v326_v31 = vld [vmem:[%s4717_s16 + $0x60] sm:$0xff]  }
 0x3e1   : > { %v3695_v13 = vmax.f32 %v3663_v15, 0.0  ;;  %v3412_v37 = vadd.f32 %v5753_v44, %v3376_v45  ;;  %v3642_v15 = vunpack.c.l.bf16 %v326_v31 }
 0x3e3   : > { %3727 = vst [vmem:[%s5843_s12 + $0x68] sm:$0xff] %v3695_v13  ;;  %v3444_v1 = vmax.f32 %v3412_v37, 0.0 }
 0x3e4   : > { %v3573_v24 = vpop.f32.mrf.mxu1 }
 0x3e5   : > { %v3460_v9 = vpack.c.bf16 %v3444_v1, %v3443_v20  ;;  %v3574_v32 = vadd.f32 %v5837_v19, %v3573_v24  ;;  %v3643_v20 = vunpack.c.h.bf16 %v326_v31 }
 0x3e7   : > { %v3664_v42 = vadd.f32 %v3632_v29, %v3574_v32  ;;  %4299 = vmatmul.msk.bf16.gmra.mxu1 %vm1680_vm11, %v3460_v9  ;;  %v328_v9 = vld [vmem:[%s4717_s16 + $0x68] sm:$0xff]  }
 0x3e9   : > { %v3696_v39 = vmax.f32 %v3664_v42, 0.0  ;;  %v3644_v42 = vunpack.c.l.bf16 %v328_v9 }
 0x3eb   : > { %3728 = vst [vmem:[%s5843_s12 + $0x70] sm:$0xff] %v3696_v39 }
 0x3ec   : > { %v3575_v34 = vpop.f32.mrf.mxu1 }
 0x3ed   : > { %v3576_v44 = vadd.f32 %v5837_v19, %v3575_v34 }
 0x3ef   : > { %v3665_v26 = vadd.f32 %v3633_v52, %v3576_v44 }
 0x3f1   : > { %v3697_v53 = vmax.f32 %v3665_v26, 0.0  ;;  %v3645_v26 = vunpack.c.h.bf16 %v328_v9 }
 0x3f3   : > { %3729 = vst [vmem:[%s5843_s12 + $0x78] sm:$0xff] %v3697_v53 }
 0x3f4   : > { %v3578_v8 = vpop.f32.mrf.mxu1 }
 0x3f5   : > { %v3579_v18 = vadd.f32 %v5837_v19, %v3578_v8  ;;  %v330_v8 = vld [vmem:[%s4717_s16 + $0x70] sm:$0xff]  }
 0x3f7   : > { %v3666_v49 = vadd.f32 %v3634_v4, %v3579_v18 }
 0x3f9   : > { %v3698_v30 = vmax.f32 %v3666_v49, 0.0  ;;  %v3646_v49 = vunpack.c.l.bf16 %v330_v8 }
 0x3fb   : > { %3730 = vst [vmem:[%s5843_s12 + $0x80] sm:$0xff] %v3698_v30 }
 0x3fc   : > { %v3580_v11 = vpop.f32.mrf.mxu1 }
 0x3fd   : > { %v3581_v25 = vadd.f32 %v5837_v19, %v3580_v11 }
 0x3ff   : > { %v3667_v41 = vadd.f32 %v3635_v21, %v3581_v25 }
 0x401   : > { %v3699_v54 = vmax.f32 %v3667_v41, 0.0  ;;  %v3647_v41 = vunpack.c.h.bf16 %v330_v8 }
 0x403   : > { %3731 = vst [vmem:[%s5843_s12 + $0x88] sm:$0xff] %v3699_v54 }
 0x404   : > { %v3583_v3 = vpop.f32.mrf.mxu1 }
 0x405   : > { %v3584_v50 = vadd.f32 %v5837_v19, %v3583_v3  ;;  %v332_v3 = vld [vmem:[%s4717_s16 + $0x78] sm:$0xff]   ;;  %s3759_s16 = sshll.u32 %s5843_s12, 4  ;;  %s3760_s16 = int_to_ptr.vmem [resolvable:$true] %s3759_s16 }
 0x407   : > { %v3668_v56 = vadd.f32 %v3636_v23, %v3584_v50 }
 0x409   : > { %v3700_v51 = vmax.f32 %v3668_v56, 0.0  ;;  %v3648_v56 = vunpack.c.l.bf16 %v332_v3 }
 0x40b   : > { %3732 = vst [vmem:[%s5843_s12 + $0x90] sm:$0xff] %v3700_v51 }
 0x40c   : > { %v3585_v43 = vpop.f32.mrf.mxu1 }
 0x40d   : > { %v3586_v46 = vadd.f32 %v5837_v19, %v3585_v43 }
 0x40f   : > { %v3669_v28 = vadd.f32 %v3637_v58, %v3586_v46 }
 0x411   : > { %v3701_v62 = vmax.f32 %v3669_v28, 0.0  ;;  %v3649_v28 = vunpack.c.h.bf16 %v332_v3 }
 0x413   : > { %3733 = vst [vmem:[%s5843_s12 + $0x98] sm:$0xff] %v3701_v62 }
 0x414   : > { %v3588_v27 = vpop.f32.mrf.mxu1 }
 0x415   : > { %v3589_v2 = vadd.f32 %v5837_v19, %v3588_v27 }
 0x417   : > { %v3670_v61 = vadd.f32 %v3638_v59, %v3589_v2 }
 0x419   : > { %v3702_v17 = vmax.f32 %v3670_v61, 0.0 }
 0x41b   : > { %3734 = vst [vmem:[%s5843_s12 + $0xa0] sm:$0xff] %v3702_v17 }
 0x41c   : > { %v3590_v33 = vpop.f32.mrf.mxu1 }
 0x41d   : > { %v3591_v36 = vadd.f32 %v5837_v19, %v3590_v33 }
 0x41f   : > { %v3671_v63 = vadd.f32 %v3639_v16, %v3591_v36 }
 0x421   : > { %v3703_v0 = vmax.f32 %v3671_v63, 0.0 }
 0x423   : > { %3735 = vst [vmem:[%s5843_s12 + $0xa8] sm:$0xff] %v3703_v0 }
 0x424   : > { %v3593_v48 = vpop.f32.mrf.mxu1 }
 0x425   : > { %v3594_v22 = vadd.f32 %v5837_v19, %v3593_v48 }
 0x427   : > { %v3672_v55 = vadd.f32 %v3640_v60, %v3594_v22 }
 0x429   : > { %v3704_v40 = vmax.f32 %v3672_v55, 0.0 }
 0x42b   : > { %3736 = vst [vmem:[%s5843_s12 + $0xb0] sm:$0xff] %v3704_v40 }
 0x42c   : > { %v3595_v5 = vpop.f32.mrf.mxu1 }
 0x42d   : > { %v3596_v35 = vadd.f32 %v5837_v19, %v3595_v5 }
 0x42f   : > { %v3673_v12 = vadd.f32 %v3641_v7, %v3596_v35 }
 0x431   : > { %v3705_v6 = vmax.f32 %v3673_v12, 0.0 }
 0x433   : > { %3737 = vst [vmem:[%s5843_s12 + $0xb8] sm:$0xff] %v3705_v6 }
 0x434   : > { %v3598_v45 = vpop.f32.mrf.mxu1 }
 0x435   : > { %v3599_v10 = vadd.f32 %v5837_v19, %v3598_v45 }
 0x437   : > { %v3674_v13 = vadd.f32 %v3642_v15, %v3599_v10 }
 0x439   : > { %v3706_v37 = vmax.f32 %v3674_v13, 0.0 }
 0x43b   : > { %3738 = vst [vmem:[%s5843_s12 + $0xc0] sm:$0xff] %v3706_v37 }
 0x43c   : > { %v3600_v1 = vpop.f32.mrf.mxu1 }
 0x43d   : > { %v3601_v29 = vadd.f32 %v5837_v19, %v3600_v1 }
 0x43f   : > { %v3675_v24 = vadd.f32 %v3643_v20, %v3601_v29 }
 0x441   : > { %v3707_v32 = vmax.f32 %v3675_v24, 0.0 }
 0x443   : > { %3739 = vst [vmem:[%s5843_s12 + $0xc8] sm:$0xff] %v3707_v32 }
 0x444   : > { %v3603_v39 = vpop.f32.mrf.mxu1 }
 0x445   : > { %v3604_v52 = vadd.f32 %v5837_v19, %v3603_v39 }
 0x447   : > { %v3676_v34 = vadd.f32 %v3644_v42, %v3604_v52 }
 0x449   : > { %v3708_v44 = vmax.f32 %v3676_v34, 0.0 }
 0x44b   : > { %3740 = vst [vmem:[%s5843_s12 + $0xd0] sm:$0xff] %v3708_v44 }
 0x44c   : > { %v3605_v57 = vpop.f32.mrf.mxu1 }
 0x44d   : > { %v3606_v53 = vadd.f32 %v5837_v19, %v3605_v57 }
 0x44f   : > { %v3677_v4 = vadd.f32 %v3645_v26, %v3606_v53 }
 0x451   : > { %v3709_v18 = vmax.f32 %v3677_v4, 0.0 }
 0x453   : > { %3741 = vst [vmem:[%s5843_s12 + $0xd8] sm:$0xff] %v3709_v18 }
 0x454   : > { %v3608_v30 = vpop.f32.mrf.mxu1 }
 0x455   : > { %v3609_v21 = vadd.f32 %v5837_v19, %v3608_v30 }
 0x457   : > { %v3678_v11 = vadd.f32 %v3646_v49, %v3609_v21 }
 0x459   : > { %v3710_v25 = vmax.f32 %v3678_v11, 0.0 }
 0x45b   : > { %3742 = vst [vmem:[%s5843_s12 + $0xe0] sm:$0xff] %v3710_v25 }
 0x45c   : > { %v3610_v38 = vpop.f32.mrf.mxu1 }
 0x45d   : > { %v3611_v54 = vadd.f32 %v5837_v19, %v3610_v38 }
 0x45f   : > { %v3679_v23 = vadd.f32 %v3647_v41, %v3611_v54 }
 0x461   : > { %v3711_v50 = vmax.f32 %v3679_v23, 0.0 }
 0x463   : > { %3743 = vst [vmem:[%s5843_s12 + $0xe8] sm:$0xff] %v3711_v50 }
 0x464   : > { %v3613_v51 = vpop.f32.mrf.mxu1 }
 0x465   : > { %v3614_v58 = vadd.f32 %v5837_v19, %v3613_v51 }
 0x467   : > { %v3680_v43 = vadd.f32 %v3648_v56, %v3614_v58 }
 0x469   : > { %v3712_v46 = vmax.f32 %v3680_v43, 0.0 }
 0x46b   : > { %3744 = vst [vmem:[%s5843_s12 + $0xf0] sm:$0xff] %v3712_v46 }
 0x46c   : > { %v3615_v47 = vpop.f32.mrf.mxu1 }
 0x46d   : > { %v3616_v62 = vadd.f32 %v5837_v19, %v3615_v47 }
 0x46f   : > { %v3681_v59 = vadd.f32 %v3649_v28, %v3616_v62 }
 0x471   : > { %v3713_v27 = vmax.f32 %v3681_v59, 0.0 }
 0x473   : > { %3745 = vst [vmem:[%s5843_s12 + $0xf8] sm:$0xff] %v3713_v27 }
 0x474   : > { %4539 = shalt.err (!%p4536_p4)
}
 0x475   : > { %s4585_s22 = smov 128   ;;  %s4586_s12 = smov 8  }
 0x476   : > { %4419 = dma.vmem_to_hbm [thread:$0]  (%p4677_p11), %s3760_s16, 4096, %s3762_s21, %s3747_s23, %s4585_s22, %s4585_s22, %s4586_s12  }
 0x477 PF: > { %s3776_s19 = sand.u32 1, %s4566_s24   ;;  %p6013_p7 = scmp.ge.s32.totalorder %s4578_s27, 2 }
 0x478   : > { %s3777_s15 = scalar_lea.sflag [#allocation5], %s3776_s19 }
 0x479   : > { %p4426_p5 = pnand %p6013_p7, %p4681_p12 }
 0x47b   : > { %p4427_p8 = pneg %p4426_p5 }
 0x47d   : > { %4561 = dma.done.wait (%p4427_p8), %s3777_s15, 4096  }
 0x47e   : > { %4563 = vsyncadd (%p4427_p8), %s3777_s15, 4294963200  ;;  %s6014_s10 = sld [smem:[#allocation9_spill]]  ;;  %p20_p10 = scmp.ge.s32.totalorder %s4652_s30, 4  }
 0x47f   : > { %s6015_s24 = smov %s4570_s25  ;;  %s6016_s25 = smov %s4574_s26 }
 0x480   : > { %s6018_s27 = smov %s4652_s30  ;;  %22 = sbr.rel (!%p20_p10) target bundleno = 5 (0x5), region = 98 }
 0x484   : > { %s6017_s26 = smov %s6014_s10 }
 0x485   :  { %3783 = vsyncpa [#allocation4], 1 }
 0x486   :  { %3785 = vsyncpa [#allocation4 + $0x1], 1 }
 0x487   :  { %3786 = vsyncpa [#allocation5], 1 }
 0x488   :  { %3788 = vsyncpa [#allocation5 + $0x1], 1 }

</bundles_post_ra>
